<compile_context>
chip_gen: v7x
topology: tpu7x:2x2x1
jax: 0.10.0
libtpu: 0.0.40
codegen_flags: <defaults>
</compile_context>

<pallas_src>
import functools
import math

import jax
import jax.numpy as jnp
from jax.experimental import pallas as pl
from jax.experimental.pallas import tpu as pltpu

KH = KW = 3
T = KH * KW              # number of 3x3 conv taps
CLS_PAD = 128            # lane-dense padded logits width (sliced in wrapper)
TILE_ROWS = 1024         # target rows per grid step (<= ~2 MiB/buffer in VMEM)


# ----------------------------------------------------------------------------
# small helpers
# ----------------------------------------------------------------------------
def _round_up(x, m):
    return ((x + m - 1) // m) * m


def _choose_tm(m, target=TILE_ROWS):
    """Largest row-tile that divides m, is a multiple of 8, and <= target."""
    if m <= target:
        return m
    tm = (target // 8) * 8
    while tm >= 8:
        if m % tm == 0:
            return tm
        tm -= 8
    return m


def _const_spec(shape):
    nd = len(shape)
    return pl.BlockSpec(tuple(shape), lambda i: (0,) * nd)


def _row_spec(tm, cols):
    return pl.BlockSpec((tm, cols), lambda i: (i, 0))


def _parallel():
    return pltpu.CompilerParams(dimension_semantics=("parallel",))


# ----------------------------------------------------------------------------
# Kernel bodies
# ----------------------------------------------------------------------------
def make_stem_kernel(n_sup):
    """conv1 (bn1 folded) + ReLU + superposition bind & sum over sup index."""

    def kernel(taps_ref, w_ref, b_ref, keys_ref, o_ref):
        w = w_ref[...]
        bias = b_ref[...]
        keys = keys_ref[...]                         # (n_sup, c0) f32
        out = None
        for s in range(n_sup):
            acc = jnp.dot(taps_ref[s], w, preferred_element_type=jnp.float32)
            y = jnp.maximum(acc + bias, 0.0) * keys[s:s + 1, :]
            out = y if out is None else out + y
        o_ref[...] = out.astype(o_ref.dtype)

    return kernel


def conv_bias_relu_kernel(taps_ref, w_ref, b_ref, o_ref):
    """block conv1 (bn2 folded into the packed-K weights) + ReLU epilogue."""
    acc = jnp.dot(taps_ref[...], w_ref[...], preferred_element_type=jnp.float32)
    o_ref[...] = jnp.maximum(acc + b_ref[...], 0.0).astype(o_ref.dtype)


def conv_add_kernel(taps_ref, w_ref, add_ref, o_ref):
    """block conv2 + additive epilogue.

    add_ref is either the residual rows (M, Cout) for identity-skip blocks, or
    the folded-downsample BN bias (1, Cout) when the 1x1 downsample has been
    packed into the contraction dim of the same dot."""
    acc = jnp.dot(taps_ref[...], w_ref[...], preferred_element_type=jnp.float32)
    o_ref[...] = (acc + add_ref[...].astype(jnp.float32)).astype(o_ref.dtype)


def make_head_kernel(n_sup):
    """adaptive avg-pool (1,1) + unbind (folded into fc weights) + final FC."""

    def kernel(x_ref, w_ref, b_ref, o_ref):
        pooled = jnp.mean(x_ref[...].astype(jnp.float32), axis=1)   # (Bs, C3)
        pooled = pooled.astype(jnp.bfloat16)
        bias = b_ref[...]
        for s in range(n_sup):
            logits = jnp.dot(pooled, w_ref[s],
                             preferred_element_type=jnp.float32)
            o_ref[s] = (logits + bias).astype(o_ref.dtype)

    return kernel


# ----------------------------------------------------------------------------
# pallas_call wrappers (tiled over M; weights kept at a constant block index)
# ----------------------------------------------------------------------------
def _stem_call(taps, w, b, keys, n_sup):
    _, msum, kpad = taps.shape
    c0 = w.shape[1]
    tm = _choose_tm(msum)
    return pl.pallas_call(
        make_stem_kernel(n_sup),
        grid=(msum // tm,),
        in_specs=[pl.BlockSpec((n_sup, tm, kpad), lambda i: (0, i, 0)),
                  _const_spec(w.shape), _const_spec(b.shape),
                  _const_spec(keys.shape)],
        out_specs=_row_spec(tm, c0),
        out_shape=jax.ShapeDtypeStruct((msum, c0), jnp.bfloat16),
        compiler_params=_parallel(),
    )(taps, w, b, keys)


def _conv_call(kernel, taps, w, extra, out_dtype=jnp.bfloat16):
    m, kpad = taps.shape
    cout = w.shape[1]
    tm = _choose_tm(m)
    extra_spec = (_row_spec(tm, extra.shape[1]) if extra.shape[0] == m
                  else _const_spec(extra.shape))
    return pl.pallas_call(
        kernel,
        grid=(m // tm,),
        in_specs=[_row_spec(tm, kpad), _const_spec(w.shape), extra_spec],
        out_specs=_row_spec(tm, cout),
        out_shape=jax.ShapeDtypeStruct((m, cout), out_dtype),
        compiler_params=_parallel(),
    )(taps, w, extra)


def _head_call(x, w, b, n_sup):
    bs = x.shape[0]
    return pl.pallas_call(
        make_head_kernel(n_sup),
        grid=(1,),
        in_specs=[_const_spec(x.shape), _const_spec(w.shape),
                  _const_spec(b.shape)],
        out_specs=_const_spec((n_sup, bs, CLS_PAD)),
        out_shape=jax.ShapeDtypeStruct((n_sup, bs, CLS_PAD), jnp.float32),
        compiler_params=pltpu.CompilerParams(
            dimension_semantics=("arbitrary",)),
    )(x, w, b)


# ----------------------------------------------------------------------------
# JAX glue: packed-K im2col (fuses into one XLA fusion per conv)
# ----------------------------------------------------------------------------
def _build_taps(a, stride, k_pad=0):
    """a: (N,H,W,C) activated bf16. Returns ((N*Ho*Wo, 9*C [-> k_pad]), Ho, Wo)."""
    n, h, w, c = a.shape
    ap = jnp.pad(a, ((0, 0), (1, 1), (1, 1), (0, 0)))
    ho = (h + 2 - KH) // stride + 1
    wo = (w + 2 - KW) // stride + 1
    views = []
    for kh in range(KH):
        for kw in range(KW):
            views.append(ap[:, kh:kh + (ho - 1) * stride + 1:stride,
                             kw:kw + (wo - 1) * stride + 1:stride, :])
    taps = jnp.concatenate(views, axis=-1).reshape(n * ho * wo, T * c)
    if k_pad > T * c:
        taps = jnp.pad(taps, ((0, 0), (0, k_pad - T * c)))
    return taps, ho, wo


# ----------------------------------------------------------------------------
# Raw parameters (deterministic, matching the module's __init__ shapes & init)
# ----------------------------------------------------------------------------
def _conv_w(key, kh, kw, cin, cout):
    # kaiming_normal_, mode='fan_out', nonlinearity='relu'
    std = math.sqrt(2.0 / (cout * kh * kw))
    return jax.random.normal(key, (kh, kw, cin, cout), jnp.float32) * std


def _bn_params(c):
    # freshly initialized BatchNorm2d: weight=1, bias=0, running stats (0, 1)
    return dict(gamma=jnp.ones((c,), jnp.float32),
                beta=jnp.zeros((c,), jnp.float32),
                mean=jnp.zeros((c,), jnp.float32),
                var=jnp.ones((c,), jnp.float32))


def init_params(key, *, input_channels=3, initial_width=1, width=1,
                num_classes=10, num_img_sup_cap=2):
    c0 = 16 * initial_width
    c1, c2, c3 = 16 * width, 32 * width, 64 * width
    ks = jax.random.split(key, 12)
    p = {}
    p["conv1_w"] = _conv_w(ks[0], 3, 3, input_channels, c0)
    p["bn1"] = _bn_params(c0)
    p["layer1_0"] = dict(
        bn1=_bn_params(c0),
        conv1_w=_conv_w(ks[1], 3, 3, c0, c1),
        bn2=_bn_params(c1),
        conv2_w=_conv_w(ks[2], 3, 3, c1, c1),
    )
    p["layer2_0"] = dict(
        bn1=_bn_params(c1),
        conv1_w=_conv_w(ks[3], 3, 3, c1, c2),
        bn2=_bn_params(c2),
        conv2_w=_conv_w(ks[4], 3, 3, c2, c2),
        ds_w=_conv_w(ks[5], 1, 1, c1, c2).reshape(c1, c2),
        ds_bn=_bn_params(c2),
    )
    p["layer3_0"] = dict(
        bn1=_bn_params(c2),
        conv1_w=_conv_w(ks[6], 3, 3, c2, c3),
        bn2=_bn_params(c3),
        conv2_w=_conv_w(ks[7], 3, 3, c3, c3),
        ds_w=_conv_w(ks[8], 1, 1, c2, c3).reshape(c2, c3),
        ds_bn=_bn_params(c3),
    )
    bound = 1.0 / math.sqrt(c3)
    p["fc_w"] = jax.random.uniform(ks[9], (c3, num_classes), jnp.float32,
                                   -bound, bound)
    p["fc_b"] = jax.random.uniform(ks[10], (num_classes,), jnp.float32,
                                   -bound, bound)
    # identity bind/unbind keys model binding_type=None (see TODO above)
    p["bind_keys"] = jnp.ones((num_img_sup_cap, c0), jnp.float32)
    p["unbind_keys"] = jnp.ones((num_img_sup_cap, c3), jnp.float32)
    return p


# ----------------------------------------------------------------------------
# Parameter prep: fold BN + downsample + unbind keys, pack K, cast to bf16
# ----------------------------------------------------------------------------
def prepare_kernel_params(raw, *, num_img_sup_cap, num_img_sup, num_classes,
                          eps=1e-5):
    sup_ratio = num_img_sup_cap // num_img_sup

    def bn_affine(bn):
        scale = bn["gamma"] / jnp.sqrt(bn["var"] + eps)
        bias = bn["beta"] - bn["mean"] * scale
        return scale, bias

    def fold_conv(w, bn):
        # conv -> BN chain: fold BN into a packed-K (9*Cin -> mult of 128) matrix
        scale, bias = bn_affine(bn)
        cin, cout = w.shape[2], w.shape[3]
        wf = (w * scale[None, None, None, :]).reshape(T * cin, cout)
        kpad = _round_up(T * cin, 128)
        wf = jnp.pad(wf, ((0, kpad - T * cin), (0, 0)))
        return wf.astype(jnp.bfloat16), bias.reshape(1, cout).astype(jnp.float32)

    def pre_affine(bn):
        # block bn1, applied to the block input in the wrapper (fuses w/ im2col)
        scale, bias = bn_affine(bn)
        c = scale.shape[0]
        return (scale.reshape(1, 1, 1, c).astype(jnp.float32),
                bias.reshape(1, 1, 1, c).astype(jnp.float32))

    kp = {}
    kp["stem_w"], kp["stem_b"] = fold_conv(raw["conv1_w"], raw["bn1"])

    c0 = raw["conv1_w"].shape[3]
    c3 = raw["fc_w"].shape[0]
    # effective bind keys after repeat(sup_ratio) + sum over capacity slots
    bk = raw["bind_keys"].reshape(sup_ratio, num_img_sup, c0).sum(0)
    kp["bind_keys"] = bk.astype(jnp.float32)                        # (n_sup, c0)

    for name in ("layer1_0", "layer2_0", "layer3_0"):
        rb = raw[name]
        blk = {}
        blk["scale1"], blk["bias1"] = pre_affine(rb["bn1"])
        blk["w1"], blk["b2"] = fold_conv(rb["conv1_w"], rb["bn2"])
        cmid, cout = rb["conv2_w"].shape[2], rb["conv2_w"].shape[3]
        w2 = rb["conv2_w"].reshape(T * cmid, cout)
        if "ds_w" in rb:
            # fold the 1x1-downsample (+ its BN) into extra K rows of conv2
            ds_scale, ds_bias = bn_affine(rb["ds_bn"])
            dsw = rb["ds_w"] * ds_scale[None, :]
            w2 = jnp.concatenate([w2, dsw], axis=0)
            blk["dsb"] = ds_bias.reshape(1, cout).astype(jnp.float32)
        k2p = _round_up(w2.shape[0], 128)
        blk["w2"] = jnp.pad(w2, ((0, k2p - w2.shape[0]), (0, 0))
                            ).astype(jnp.bfloat16)
        kp[name] = blk

    # unbind keys folded straight into per-sup FC weights (one matmul per slot)
    uk = raw["unbind_keys"].reshape(sup_ratio, num_img_sup, c3).mean(0)
    fcw = uk[:, :, None] * raw["fc_w"][None, :, :]       # (n_sup, c3, ncls)
    kp["head_w"] = jnp.pad(fcw, ((0, 0), (0, 0),
                                 (0, CLS_PAD - num_classes))).astype(jnp.bfloat16)
    kp["head_b"] = jnp.pad(raw["fc_b"], (0, CLS_PAD - num_classes)
                           ).reshape(1, CLS_PAD).astype(jnp.float32)
    return kp


# ----------------------------------------------------------------------------
# Forward pass
# ----------------------------------------------------------------------------
def _block(x, p, *, stride, has_ds):
    """Pre-activation BasicBlock; two tiled Pallas GEMM kernels."""
    bs, _, _, cin = x.shape
    cmid = p["w1"].shape[1]
    cout = p["w2"].shape[1]
    k1p = p["w1"].shape[0]
    k2p = p["w2"].shape[0]

    # bn1 + relu on the block input; fuses into the im2col tap-build fusion.
    a = jnp.maximum(x.astype(jnp.float32) * p["scale1"] + p["bias1"], 0.0
                    ).astype(jnp.bfloat16)
    taps1, ho, wo = _build_taps(a, stride, k1p)
    m = bs * ho * wo

    # conv1 (+ folded bn2 + relu) -> bf16 activation at real channel width
    hmid = _conv_call(conv_bias_relu_kernel, taps1, p["w1"], p["b2"])

    base, _, _ = _build_taps(hmid.reshape(bs, ho, wo, cmid), 1, 0)
    if has_ds:
        # identity branch: 1x1 stride-s conv(+BN) on the RAW block input,
        # packed into the conv2 contraction as extra K columns.
        xs = x[:, ::stride, ::stride, :].reshape(m, cin)
        taps2 = jnp.concatenate([base, xs], axis=-1)
        taps2 = jnp.pad(taps2, ((0, 0), (0, k2p - taps2.shape[1])))
        out = _conv_call(conv_add_kernel, taps2, p["w2"], p["dsb"])
    else:
        taps2 = jnp.pad(base, ((0, 0), (0, k2p - base.shape[1])))
        res = x.reshape(m, cout)
        out = _conv_call(conv_add_kernel, taps2, p["w2"], res)
    return out.reshape(bs, ho, wo, cout)


def super_wide_resnet_forward(x_nchw, kp, *, num_img_sup=2, num_classes=10):
    b = x_nchw.shape[0]
    eff = b - b % num_img_sup
    assert eff > 0
    bs = eff // num_img_sup

    c0 = kp["stem_w"].shape[1]
    k0p = kp["stem_w"].shape[0]

    x = jnp.transpose(x_nchw[:eff], (0, 2, 3, 1)).astype(jnp.bfloat16)  # NHWC
    _, h, w, cin = x.shape
    # Reorder the batch so the superposition index is outermost; the stem
    # kernel then bind+sums over the leading block dimension of its taps.
    x = x.reshape(bs, num_img_sup, h, w, cin).transpose(1, 0, 2, 3, 4)
    x = x.reshape(eff, h, w, cin)

    # stem: conv1 + bn1 + relu + bind&sum, one tiled Pallas kernel
    taps0, ho, wo = _build_taps(x, 1, k0p)
    taps0 = taps0.reshape(num_img_sup, bs * ho * wo, k0p)
    stem = _stem_call(taps0, kp["stem_w"], kp["stem_b"], kp["bind_keys"],
                      num_img_sup)
    x = stem.reshape(bs, ho, wo, c0)

    # residual layers (layers = [1, 1, 1]; layer4 is Identity)
    x = _block(x, kp["layer1_0"], stride=1, has_ds=False)
    x = _block(x, kp["layer2_0"], stride=2, has_ds=True)
    x = _block(x, kp["layer3_0"], stride=2, has_ds=True)

    # head: avg-pool + unbind (folded into fc) + fc, one Pallas kernel
    bs2, hf, wf, c3 = x.shape
    logits = _head_call(x.reshape(bs2, hf * wf, c3), kp["head_w"],
                        kp["head_b"], num_img_sup)       # (n_sup, Bs, CLS_PAD)
    logits = logits.transpose(1, 0, 2).reshape(eff, CLS_PAD)
    return logits[:, :num_classes]


# ----------------------------------------------------------------------------
if __name__ == "__main__":
    key = jax.random.PRNGKey(0)
    pkey, xkey = jax.random.split(key)

    raw = init_params(pkey, input_channels=3, initial_width=1, width=1,
                      num_classes=10, num_img_sup_cap=2)
    kparams = prepare_kernel_params(raw, num_img_sup_cap=2, num_img_sup=2,
                                    num_classes=10)
    x = jax.random.normal(xkey, (2, 3, 16, 16), jnp.float32)   # (N, C, H, W)

    fwd = jax.jit(functools.partial(super_wide_resnet_forward,
                                    num_img_sup=2, num_classes=10))
    out = jax.block_until_ready(fwd(x, kparams))
    assert out.shape == (2, 10), out.shape
    assert bool(jnp.all(jnp.isfinite(out)))
    print("KERNEL_OK")
</pallas_src>

<mosaic_0001>
module attributes {stable_mosaic.version = 11 : i64} {
  func.func @kernel(%arg0: i32, %arg1: memref<2x256x128xbf16, #tpu.memory_space<vmem>>, %arg2: memref<128x16xbf16, #tpu.memory_space<vmem>>, %arg3: memref<1x16xf32, #tpu.memory_space<vmem>>, %arg4: memref<2x16xf32, #tpu.memory_space<vmem>>, %arg5: memref<256x16xbf16, #tpu.memory_space<vmem>>) attributes {dimension_semantics = [#tpu.dimension_semantics<parallel>], iteration_bounds = array<i64: 1>, scalar_prefetch = 0 : i64, scratch_operands = 0 : i64, tpu.core_type = #tpu.core_type<tc>, window_params = [{transform_indices = @transform_0, window_bounds = array<i64: 2, 256, 128>}, {pipeline_mode = #tpu.pipeline_mode<synchronous>, transform_indices = @transform_1, window_bounds = array<i64: 128, 16>}, {pipeline_mode = #tpu.pipeline_mode<synchronous>, transform_indices = @transform_2, window_bounds = array<i64: 1, 16>}, {pipeline_mode = #tpu.pipeline_mode<synchronous>, transform_indices = @transform_3, window_bounds = array<i64: 2, 16>}, {transform_indices = @transform_4, window_bounds = array<i64: 256, 16>}]} {
    %c0 = arith.constant 0 : index
    %c0_0 = arith.constant 0 : index
    %0 = vector.load %arg2[%c0, %c0_0] : memref<128x16xbf16, #tpu.memory_space<vmem>>, vector<128x16xbf16>
    %c0_1 = arith.constant 0 : index
    %c0_2 = arith.constant 0 : index
    %1 = vector.load %arg3[%c0_1, %c0_2] : memref<1x16xf32, #tpu.memory_space<vmem>>, vector<1x16xf32>
    %c0_3 = arith.constant 0 : index
    %c0_4 = arith.constant 0 : index
    %2 = vector.load %arg4[%c0_3, %c0_4] : memref<2x16xf32, #tpu.memory_space<vmem>>, vector<2x16xf32>
    %c0_5 = arith.constant 0 : index
    %c0_6 = arith.constant 0 : index
    %c0_7 = arith.constant 0 : index
    %3 = vector.load %arg1[%c0_5, %c0_6, %c0_7] : memref<2x256x128xbf16, #tpu.memory_space<vmem>>, vector<1x256x128xbf16>
    %4 = vector.shape_cast %3 : vector<1x256x128xbf16> to vector<256x128xbf16>
    %cst = arith.constant dense<0.000000e+00> : vector<256x16xf32>
    %5 = tpu.matmul %4, %0, %cst {dimension_numbers = #tpu.dot_dimension_numbers<[1], [0], [0], [1], [0, 0, 1, 1], [], []>} : vector<256x128xbf16>, vector<128x16xbf16>, vector<256x16xf32> -> vector<256x16xf32>
    %6 = vector.broadcast %1 : vector<1x16xf32> to vector<256x16xf32>
    %7 = arith.addf %5, %6 : vector<256x16xf32>
    %cst_8 = arith.constant 0.000000e+00 : f32
    %8 = vector.broadcast %cst_8 : f32 to vector<256x16xf32>
    %9 = arith.maximumf %7, %8 : vector<256x16xf32>
    %10 = vector.extract_strided_slice %2 {offsets = [0, 0], sizes = [1, 16], strides = [1, 1]} : vector<2x16xf32> to vector<1x16xf32>
    %11 = vector.broadcast %10 : vector<1x16xf32> to vector<256x16xf32>
    %12 = arith.mulf %9, %11 : vector<256x16xf32>
    %c1 = arith.constant 1 : index
    %c0_9 = arith.constant 0 : index
    %c0_10 = arith.constant 0 : index
    %13 = vector.load %arg1[%c1, %c0_9, %c0_10] : memref<2x256x128xbf16, #tpu.memory_space<vmem>>, vector<1x256x128xbf16>
    %14 = vector.shape_cast %13 : vector<1x256x128xbf16> to vector<256x128xbf16>
    %cst_11 = arith.constant dense<0.000000e+00> : vector<256x16xf32>
    %15 = tpu.matmul %14, %0, %cst_11 {dimension_numbers = #tpu.dot_dimension_numbers<[1], [0], [0], [1], [0, 0, 1, 1], [], []>} : vector<256x128xbf16>, vector<128x16xbf16>, vector<256x16xf32> -> vector<256x16xf32>
    %16 = vector.broadcast %1 : vector<1x16xf32> to vector<256x16xf32>
    %17 = arith.addf %15, %16 : vector<256x16xf32>
    %cst_12 = arith.constant 0.000000e+00 : f32
    %18 = vector.broadcast %cst_12 : f32 to vector<256x16xf32>
    %19 = arith.maximumf %17, %18 : vector<256x16xf32>
    %20 = vector.extract_strided_slice %2 {offsets = [1, 0], sizes = [1, 16], strides = [1, 1]} : vector<2x16xf32> to vector<1x16xf32>
    %21 = vector.broadcast %20 : vector<1x16xf32> to vector<256x16xf32>
    %22 = arith.mulf %19, %21 : vector<256x16xf32>
    %23 = arith.addf %12, %22 : vector<256x16xf32>
    %24 = arith.truncf %23 : vector<256x16xf32> to vector<256x16xbf16>
    %c0_13 = arith.constant 0 : index
    %c0_14 = arith.constant 0 : index
    %25 = vector.load %arg5[%c0_13, %c0_14] : memref<256x16xbf16, #tpu.memory_space<vmem>>, vector<256x16xbf16>
    tpu.vector_store %arg5[%c0_13, %c0_14], %24 {strides = array<i32>} : memref<256x16xbf16, #tpu.memory_space<vmem>>, vector<256x16xbf16>,
    return
  }
  func.func @transform_0(%arg0: i32) -> (i32, i32, i32) {
    %c0_i32 = arith.constant 0 : i32
    %c0_i32_0 = arith.constant 0 : i32
    %c0_i32_1 = arith.constant 0 : i32
    return %c0_i32, %arg0, %c0_i32_0 : i32, i32, i32
  }
  func.func @transform_1(%arg0: i32) -> (i32, i32) {
    %c0_i32 = arith.constant 0 : i32
    %c0_i32_0 = arith.constant 0 : i32
    %c0_i32_1 = arith.constant 0 : i32
    return %c0_i32, %c0_i32_0 : i32, i32
  }
  func.func @transform_2(%arg0: i32) -> (i32, i32) {
    %c0_i32 = arith.constant 0 : i32
    %c0_i32_0 = arith.constant 0 : i32
    %c0_i32_1 = arith.constant 0 : i32
    return %c0_i32, %c0_i32_0 : i32, i32
  }
  func.func @transform_3(%arg0: i32) -> (i32, i32) {
    %c0_i32 = arith.constant 0 : i32
    %c0_i32_0 = arith.constant 0 : i32
    %c0_i32_1 = arith.constant 0 : i32
    return %c0_i32, %c0_i32_0 : i32, i32
  }
  func.func @transform_4(%arg0: i32) -> (i32, i32) {
    %c0_i32 = arith.constant 0 : i32
    %c0_i32_0 = arith.constant 0 : i32
    return %arg0, %c0_i32 : i32, i32
  }
}

module attributes {stable_mosaic.version = 11 : i64} {
  func.func @conv_bias_relu_kernel(%arg0: i32, %arg1: memref<256x256xbf16, #tpu.memory_space<vmem>>, %arg2: memref<256x16xbf16, #tpu.memory_space<vmem>>, %arg3: memref<1x16xf32, #tpu.memory_space<vmem>>, %arg4: memref<256x16xbf16, #tpu.memory_space<vmem>>) attributes {dimension_semantics = [#tpu.dimension_semantics<parallel>], iteration_bounds = array<i64: 1>, scalar_prefetch = 0 : i64, scratch_operands = 0 : i64, tpu.core_type = #tpu.core_type<tc>, window_params = [{transform_indices = @transform_0, window_bounds = array<i64: 256, 256>}, {pipeline_mode = #tpu.pipeline_mode<synchronous>, transform_indices = @transform_1, window_bounds = array<i64: 256, 16>}, {pipeline_mode = #tpu.pipeline_mode<synchronous>, transform_indices = @transform_2, window_bounds = array<i64: 1, 16>}, {transform_indices = @transform_3, window_bounds = array<i64: 256, 16>}]} {
    %c0 = arith.constant 0 : index
    %c0_0 = arith.constant 0 : index
    %0 = vector.load %arg1[%c0, %c0_0] : memref<256x256xbf16, #tpu.memory_space<vmem>>, vector<256x256xbf16>
    %c0_1 = arith.constant 0 : index
    %c0_2 = arith.constant 0 : index
    %1 = vector.load %arg2[%c0_1, %c0_2] : memref<256x16xbf16, #tpu.memory_space<vmem>>, vector<256x16xbf16>
    %cst = arith.constant dense<0.000000e+00> : vector<256x16xf32>
    %2 = tpu.matmul %0, %1, %cst {dimension_numbers = #tpu.dot_dimension_numbers<[1], [0], [0], [1], [0, 0, 1, 1], [], []>} : vector<256x256xbf16>, vector<256x16xbf16>, vector<256x16xf32> -> vector<256x16xf32>
    %c0_3 = arith.constant 0 : index
    %c0_4 = arith.constant 0 : index
    %3 = vector.load %arg3[%c0_3, %c0_4] : memref<1x16xf32, #tpu.memory_space<vmem>>, vector<1x16xf32>
    %4 = vector.broadcast %3 : vector<1x16xf32> to vector<256x16xf32>
    %5 = arith.addf %2, %4 : vector<256x16xf32>
    %cst_5 = arith.constant 0.000000e+00 : f32
    %6 = vector.broadcast %cst_5 : f32 to vector<256x16xf32>
    %7 = arith.maximumf %5, %6 : vector<256x16xf32>
    %8 = arith.truncf %7 : vector<256x16xf32> to vector<256x16xbf16>
    %c0_6 = arith.constant 0 : index
    %c0_7 = arith.constant 0 : index
    %9 = vector.load %arg4[%c0_6, %c0_7] : memref<256x16xbf16, #tpu.memory_space<vmem>>, vector<256x16xbf16>
    tpu.vector_store %arg4[%c0_6, %c0_7], %8 {strides = array<i32>} : memref<256x16xbf16, #tpu.memory_space<vmem>>, vector<256x16xbf16>,
    return
  }
  func.func @transform_0(%arg0: i32) -> (i32, i32) {
    %c0_i32 = arith.constant 0 : i32
    %c0_i32_0 = arith.constant 0 : i32
    return %arg0, %c0_i32 : i32, i32
  }
  func.func @transform_1(%arg0: i32) -> (i32, i32) {
    %c0_i32 = arith.constant 0 : i32
    %c0_i32_0 = arith.constant 0 : i32
    %c0_i32_1 = arith.constant 0 : i32
    return %c0_i32, %c0_i32_0 : i32, i32
  }
  func.func @transform_2(%arg0: i32) -> (i32, i32) {
    %c0_i32 = arith.constant 0 : i32
    %c0_i32_0 = arith.constant 0 : i32
    %c0_i32_1 = arith.constant 0 : i32
    return %c0_i32, %c0_i32_0 : i32, i32
  }
  func.func @transform_3(%arg0: i32) -> (i32, i32) {
    %c0_i32 = arith.constant 0 : i32
    %c0_i32_0 = arith.constant 0 : i32
    return %arg0, %c0_i32 : i32, i32
  }
}

module attributes {stable_mosaic.version = 11 : i64} {
  func.func @conv_add_kernel(%arg0: i32, %arg1: memref<256x256xbf16, #tpu.memory_space<vmem>>, %arg2: memref<256x16xbf16, #tpu.memory_space<vmem>>, %arg3: memref<256x16xbf16, #tpu.memory_space<vmem>>, %arg4: memref<256x16xbf16, #tpu.memory_space<vmem>>) attributes {dimension_semantics = [#tpu.dimension_semantics<parallel>], iteration_bounds = array<i64: 1>, scalar_prefetch = 0 : i64, scratch_operands = 0 : i64, tpu.core_type = #tpu.core_type<tc>, window_params = [{transform_indices = @transform_0, window_bounds = array<i64: 256, 256>}, {pipeline_mode = #tpu.pipeline_mode<synchronous>, transform_indices = @transform_1, window_bounds = array<i64: 256, 16>}, {transform_indices = @transform_2, window_bounds = array<i64: 256, 16>}, {transform_indices = @transform_3, window_bounds = array<i64: 256, 16>}]} {
    %c0 = arith.constant 0 : index
    %c0_0 = arith.constant 0 : index
    %0 = vector.load %arg1[%c0, %c0_0] : memref<256x256xbf16, #tpu.memory_space<vmem>>, vector<256x256xbf16>
    %c0_1 = arith.constant 0 : index
    %c0_2 = arith.constant 0 : index
    %1 = vector.load %arg2[%c0_1, %c0_2] : memref<256x16xbf16, #tpu.memory_space<vmem>>, vector<256x16xbf16>
    %cst = arith.constant dense<0.000000e+00> : vector<256x16xf32>
    %2 = tpu.matmul %0, %1, %cst {dimension_numbers = #tpu.dot_dimension_numbers<[1], [0], [0], [1], [0, 0, 1, 1], [], []>} : vector<256x256xbf16>, vector<256x16xbf16>, vector<256x16xf32> -> vector<256x16xf32>
    %c0_3 = arith.constant 0 : index
    %c0_4 = arith.constant 0 : index
    %3 = vector.load %arg3[%c0_3, %c0_4] : memref<256x16xbf16, #tpu.memory_space<vmem>>, vector<256x16xbf16>
    %4 = arith.extf %3 : vector<256x16xbf16> to vector<256x16xf32>
    %5 = arith.addf %2, %4 : vector<256x16xf32>
    %6 = arith.truncf %5 : vector<256x16xf32> to vector<256x16xbf16>
    %c0_5 = arith.constant 0 : index
    %c0_6 = arith.constant 0 : index
    %7 = vector.load %arg4[%c0_5, %c0_6] : memref<256x16xbf16, #tpu.memory_space<vmem>>, vector<256x16xbf16>
    tpu.vector_store %arg4[%c0_5, %c0_6], %6 {strides = array<i32>} : memref<256x16xbf16, #tpu.memory_space<vmem>>, vector<256x16xbf16>,
    return
  }
  func.func @transform_0(%arg0: i32) -> (i32, i32) {
    %c0_i32 = arith.constant 0 : i32
    %c0_i32_0 = arith.constant 0 : i32
    return %arg0, %c0_i32 : i32, i32
  }
  func.func @transform_1(%arg0: i32) -> (i32, i32) {
    %c0_i32 = arith.constant 0 : i32
    %c0_i32_0 = arith.constant 0 : i32
    %c0_i32_1 = arith.constant 0 : i32
    return %c0_i32, %c0_i32_0 : i32, i32
  }
  func.func @transform_2(%arg0: i32) -> (i32, i32) {
    %c0_i32 = arith.constant 0 : i32
    %c0_i32_0 = arith.constant 0 : i32
    return %arg0, %c0_i32 : i32, i32
  }
  func.func @transform_3(%arg0: i32) -> (i32, i32) {
    %c0_i32 = arith.constant 0 : i32
    %c0_i32_0 = arith.constant 0 : i32
    return %arg0, %c0_i32 : i32, i32
  }
}

module attributes {stable_mosaic.version = 11 : i64} {
  func.func @conv_bias_relu_kernel(%arg0: i32, %arg1: memref<64x256xbf16, #tpu.memory_space<vmem>>, %arg2: memref<256x32xbf16, #tpu.memory_space<vmem>>, %arg3: memref<1x32xf32, #tpu.memory_space<vmem>>, %arg4: memref<64x32xbf16, #tpu.memory_space<vmem>>) attributes {dimension_semantics = [#tpu.dimension_semantics<parallel>], iteration_bounds = array<i64: 1>, scalar_prefetch = 0 : i64, scratch_operands = 0 : i64, tpu.core_type = #tpu.core_type<tc>, window_params = [{transform_indices = @transform_0, window_bounds = array<i64: 64, 256>}, {pipeline_mode = #tpu.pipeline_mode<synchronous>, transform_indices = @transform_1, window_bounds = array<i64: 256, 32>}, {pipeline_mode = #tpu.pipeline_mode<synchronous>, transform_indices = @transform_2, window_bounds = array<i64: 1, 32>}, {transform_indices = @transform_3, window_bounds = array<i64: 64, 32>}]} {
    %c0 = arith.constant 0 : index
    %c0_0 = arith.constant 0 : index
    %0 = vector.load %arg1[%c0, %c0_0] : memref<64x256xbf16, #tpu.memory_space<vmem>>, vector<64x256xbf16>
    %c0_1 = arith.constant 0 : index
    %c0_2 = arith.constant 0 : index
    %1 = vector.load %arg2[%c0_1, %c0_2] : memref<256x32xbf16, #tpu.memory_space<vmem>>, vector<256x32xbf16>
    %cst = arith.constant dense<0.000000e+00> : vector<64x32xf32>
    %2 = tpu.matmul %0, %1, %cst {dimension_numbers = #tpu.dot_dimension_numbers<[1], [0], [0], [1], [0, 0, 1, 1], [], []>} : vector<64x256xbf16>, vector<256x32xbf16>, vector<64x32xf32> -> vector<64x32xf32>
    %c0_3 = arith.constant 0 : index
    %c0_4 = arith.constant 0 : index
    %3 = vector.load %arg3[%c0_3, %c0_4] : memref<1x32xf32, #tpu.memory_space<vmem>>, vector<1x32xf32>
    %4 = vector.broadcast %3 : vector<1x32xf32> to vector<64x32xf32>
    %5 = arith.addf %2, %4 : vector<64x32xf32>
    %cst_5 = arith.constant 0.000000e+00 : f32
    %6 = vector.broadcast %cst_5 : f32 to vector<64x32xf32>
    %7 = arith.maximumf %5, %6 : vector<64x32xf32>
    %8 = arith.truncf %7 : vector<64x32xf32> to vector<64x32xbf16>
    %c0_6 = arith.constant 0 : index
    %c0_7 = arith.constant 0 : index
    %9 = vector.load %arg4[%c0_6, %c0_7] : memref<64x32xbf16, #tpu.memory_space<vmem>>, vector<64x32xbf16>
    tpu.vector_store %arg4[%c0_6, %c0_7], %8 {strides = array<i32>} : memref<64x32xbf16, #tpu.memory_space<vmem>>, vector<64x32xbf16>,
    return
  }
  func.func @transform_0(%arg0: i32) -> (i32, i32) {
    %c0_i32 = arith.constant 0 : i32
    %c0_i32_0 = arith.constant 0 : i32
    return %arg0, %c0_i32 : i32, i32
  }
  func.func @transform_1(%arg0: i32) -> (i32, i32) {
    %c0_i32 = arith.constant 0 : i32
    %c0_i32_0 = arith.constant 0 : i32
    %c0_i32_1 = arith.constant 0 : i32
    return %c0_i32, %c0_i32_0 : i32, i32
  }
  func.func @transform_2(%arg0: i32) -> (i32, i32) {
    %c0_i32 = arith.constant 0 : i32
    %c0_i32_0 = arith.constant 0 : i32
    %c0_i32_1 = arith.constant 0 : i32
    return %c0_i32, %c0_i32_0 : i32, i32
  }
  func.func @transform_3(%arg0: i32) -> (i32, i32) {
    %c0_i32 = arith.constant 0 : i32
    %c0_i32_0 = arith.constant 0 : i32
    return %arg0, %c0_i32 : i32, i32
  }
}

module attributes {stable_mosaic.version = 11 : i64} {
  func.func @conv_add_kernel(%arg0: i32, %arg1: memref<64x384xbf16, #tpu.memory_space<vmem>>, %arg2: memref<384x32xbf16, #tpu.memory_space<vmem>>, %arg3: memref<1x32xf32, #tpu.memory_space<vmem>>, %arg4: memref<64x32xbf16, #tpu.memory_space<vmem>>) attributes {dimension_semantics = [#tpu.dimension_semantics<parallel>], iteration_bounds = array<i64: 1>, scalar_prefetch = 0 : i64, scratch_operands = 0 : i64, tpu.core_type = #tpu.core_type<tc>, window_params = [{transform_indices = @transform_0, window_bounds = array<i64: 64, 384>}, {pipeline_mode = #tpu.pipeline_mode<synchronous>, transform_indices = @transform_1, window_bounds = array<i64: 384, 32>}, {pipeline_mode = #tpu.pipeline_mode<synchronous>, transform_indices = @transform_2, window_bounds = array<i64: 1, 32>}, {transform_indices = @transform_3, window_bounds = array<i64: 64, 32>}]} {
    %c0 = arith.constant 0 : index
    %c0_0 = arith.constant 0 : index
    %0 = vector.load %arg1[%c0, %c0_0] : memref<64x384xbf16, #tpu.memory_space<vmem>>, vector<64x384xbf16>
    %c0_1 = arith.constant 0 : index
    %c0_2 = arith.constant 0 : index
    %1 = vector.load %arg2[%c0_1, %c0_2] : memref<384x32xbf16, #tpu.memory_space<vmem>>, vector<384x32xbf16>
    %cst = arith.constant dense<0.000000e+00> : vector<64x32xf32>
    %2 = tpu.matmul %0, %1, %cst {dimension_numbers = #tpu.dot_dimension_numbers<[1], [0], [0], [1], [0, 0, 1, 1], [], []>} : vector<64x384xbf16>, vector<384x32xbf16>, vector<64x32xf32> -> vector<64x32xf32>
    %c0_3 = arith.constant 0 : index
    %c0_4 = arith.constant 0 : index
    %3 = vector.load %arg3[%c0_3, %c0_4] : memref<1x32xf32, #tpu.memory_space<vmem>>, vector<1x32xf32>
    %4 = vector.broadcast %3 : vector<1x32xf32> to vector<64x32xf32>
    %5 = arith.addf %2, %4 : vector<64x32xf32>
    %6 = arith.truncf %5 : vector<64x32xf32> to vector<64x32xbf16>
    %c0_5 = arith.constant 0 : index
    %c0_6 = arith.constant 0 : index
    %7 = vector.load %arg4[%c0_5, %c0_6] : memref<64x32xbf16, #tpu.memory_space<vmem>>, vector<64x32xbf16>
    tpu.vector_store %arg4[%c0_5, %c0_6], %6 {strides = array<i32>} : memref<64x32xbf16, #tpu.memory_space<vmem>>, vector<64x32xbf16>,
    return
  }
  func.func @transform_0(%arg0: i32) -> (i32, i32) {
    %c0_i32 = arith.constant 0 : i32
    %c0_i32_0 = arith.constant 0 : i32
    return %arg0, %c0_i32 : i32, i32
  }
  func.func @transform_1(%arg0: i32) -> (i32, i32) {
    %c0_i32 = arith.constant 0 : i32
    %c0_i32_0 = arith.constant 0 : i32
    %c0_i32_1 = arith.constant 0 : i32
    return %c0_i32, %c0_i32_0 : i32, i32
  }
  func.func @transform_2(%arg0: i32) -> (i32, i32) {
    %c0_i32 = arith.constant 0 : i32
    %c0_i32_0 = arith.constant 0 : i32
    %c0_i32_1 = arith.constant 0 : i32
    return %c0_i32, %c0_i32_0 : i32, i32
  }
  func.func @transform_3(%arg0: i32) -> (i32, i32) {
    %c0_i32 = arith.constant 0 : i32
    %c0_i32_0 = arith.constant 0 : i32
    return %arg0, %c0_i32 : i32, i32
  }
}

module attributes {stable_mosaic.version = 11 : i64} {
  func.func @conv_bias_relu_kernel(%arg0: i32, %arg1: memref<16x384xbf16, #tpu.memory_space<vmem>>, %arg2: memref<384x64xbf16, #tpu.memory_space<vmem>>, %arg3: memref<1x64xf32, #tpu.memory_space<vmem>>, %arg4: memref<16x64xbf16, #tpu.memory_space<vmem>>) attributes {dimension_semantics = [#tpu.dimension_semantics<parallel>], iteration_bounds = array<i64: 1>, scalar_prefetch = 0 : i64, scratch_operands = 0 : i64, tpu.core_type = #tpu.core_type<tc>, window_params = [{transform_indices = @transform_0, window_bounds = array<i64: 16, 384>}, {pipeline_mode = #tpu.pipeline_mode<synchronous>, transform_indices = @transform_1, window_bounds = array<i64: 384, 64>}, {pipeline_mode = #tpu.pipeline_mode<synchronous>, transform_indices = @transform_2, window_bounds = array<i64: 1, 64>}, {transform_indices = @transform_3, window_bounds = array<i64: 16, 64>}]} {
    %c0 = arith.constant 0 : index
    %c0_0 = arith.constant 0 : index
    %0 = vector.load %arg1[%c0, %c0_0] : memref<16x384xbf16, #tpu.memory_space<vmem>>, vector<16x384xbf16>
    %c0_1 = arith.constant 0 : index
    %c0_2 = arith.constant 0 : index
    %1 = vector.load %arg2[%c0_1, %c0_2] : memref<384x64xbf16, #tpu.memory_space<vmem>>, vector<384x64xbf16>
    %cst = arith.constant dense<0.000000e+00> : vector<16x64xf32>
    %2 = tpu.matmul %0, %1, %cst {dimension_numbers = #tpu.dot_dimension_numbers<[1], [0], [0], [1], [0, 0, 1, 1], [], []>} : vector<16x384xbf16>, vector<384x64xbf16>, vector<16x64xf32> -> vector<16x64xf32>
    %c0_3 = arith.constant 0 : index
    %c0_4 = arith.constant 0 : index
    %3 = vector.load %arg3[%c0_3, %c0_4] : memref<1x64xf32, #tpu.memory_space<vmem>>, vector<1x64xf32>
    %4 = vector.broadcast %3 : vector<1x64xf32> to vector<16x64xf32>
    %5 = arith.addf %2, %4 : vector<16x64xf32>
    %cst_5 = arith.constant 0.000000e+00 : f32
    %6 = vector.broadcast %cst_5 : f32 to vector<16x64xf32>
    %7 = arith.maximumf %5, %6 : vector<16x64xf32>
    %8 = arith.truncf %7 : vector<16x64xf32> to vector<16x64xbf16>
    %c0_6 = arith.constant 0 : index
    %c0_7 = arith.constant 0 : index
    %9 = vector.load %arg4[%c0_6, %c0_7] : memref<16x64xbf16, #tpu.memory_space<vmem>>, vector<16x64xbf16>
    tpu.vector_store %arg4[%c0_6, %c0_7], %8 {strides = array<i32>} : memref<16x64xbf16, #tpu.memory_space<vmem>>, vector<16x64xbf16>,
    return
  }
  func.func @transform_0(%arg0: i32) -> (i32, i32) {
    %c0_i32 = arith.constant 0 : i32
    %c0_i32_0 = arith.constant 0 : i32
    return %arg0, %c0_i32 : i32, i32
  }
  func.func @transform_1(%arg0: i32) -> (i32, i32) {
    %c0_i32 = arith.constant 0 : i32
    %c0_i32_0 = arith.constant 0 : i32
    %c0_i32_1 = arith.constant 0 : i32
    return %c0_i32, %c0_i32_0 : i32, i32
  }
  func.func @transform_2(%arg0: i32) -> (i32, i32) {
    %c0_i32 = arith.constant 0 : i32
    %c0_i32_0 = arith.constant 0 : i32
    %c0_i32_1 = arith.constant 0 : i32
    return %c0_i32, %c0_i32_0 : i32, i32
  }
  func.func @transform_3(%arg0: i32) -> (i32, i32) {
    %c0_i32 = arith.constant 0 : i32
    %c0_i32_0 = arith.constant 0 : i32
    return %arg0, %c0_i32 : i32, i32
  }
}

module attributes {stable_mosaic.version = 11 : i64} {
  func.func @conv_add_kernel(%arg0: i32, %arg1: memref<16x640xbf16, #tpu.memory_space<vmem>>, %arg2: memref<640x64xbf16, #tpu.memory_space<vmem>>, %arg3: memref<1x64xf32, #tpu.memory_space<vmem>>, %arg4: memref<16x64xbf16, #tpu.memory_space<vmem>>) attributes {dimension_semantics = [#tpu.dimension_semantics<parallel>], iteration_bounds = array<i64: 1>, scalar_prefetch = 0 : i64, scratch_operands = 0 : i64, tpu.core_type = #tpu.core_type<tc>, window_params = [{transform_indices = @transform_0, window_bounds = array<i64: 16, 640>}, {pipeline_mode = #tpu.pipeline_mode<synchronous>, transform_indices = @transform_1, window_bounds = array<i64: 640, 64>}, {pipeline_mode = #tpu.pipeline_mode<synchronous>, transform_indices = @transform_2, window_bounds = array<i64: 1, 64>}, {transform_indices = @transform_3, window_bounds = array<i64: 16, 64>}]} {
    %c0 = arith.constant 0 : index
    %c0_0 = arith.constant 0 : index
    %0 = vector.load %arg1[%c0, %c0_0] : memref<16x640xbf16, #tpu.memory_space<vmem>>, vector<16x640xbf16>
    %c0_1 = arith.constant 0 : index
    %c0_2 = arith.constant 0 : index
    %1 = vector.load %arg2[%c0_1, %c0_2] : memref<640x64xbf16, #tpu.memory_space<vmem>>, vector<640x64xbf16>
    %cst = arith.constant dense<0.000000e+00> : vector<16x64xf32>
    %2 = tpu.matmul %0, %1, %cst {dimension_numbers = #tpu.dot_dimension_numbers<[1], [0], [0], [1], [0, 0, 1, 1], [], []>} : vector<16x640xbf16>, vector<640x64xbf16>, vector<16x64xf32> -> vector<16x64xf32>
    %c0_3 = arith.constant 0 : index
    %c0_4 = arith.constant 0 : index
    %3 = vector.load %arg3[%c0_3, %c0_4] : memref<1x64xf32, #tpu.memory_space<vmem>>, vector<1x64xf32>
    %4 = vector.broadcast %3 : vector<1x64xf32> to vector<16x64xf32>
    %5 = arith.addf %2, %4 : vector<16x64xf32>
    %6 = arith.truncf %5 : vector<16x64xf32> to vector<16x64xbf16>
    %c0_5 = arith.constant 0 : index
    %c0_6 = arith.constant 0 : index
    %7 = vector.load %arg4[%c0_5, %c0_6] : memref<16x64xbf16, #tpu.memory_space<vmem>>, vector<16x64xbf16>
    tpu.vector_store %arg4[%c0_5, %c0_6], %6 {strides = array<i32>} : memref<16x64xbf16, #tpu.memory_space<vmem>>, vector<16x64xbf16>,
    return
  }
  func.func @transform_0(%arg0: i32) -> (i32, i32) {
    %c0_i32 = arith.constant 0 : i32
    %c0_i32_0 = arith.constant 0 : i32
    return %arg0, %c0_i32 : i32, i32
  }
  func.func @transform_1(%arg0: i32) -> (i32, i32) {
    %c0_i32 = arith.constant 0 : i32
    %c0_i32_0 = arith.constant 0 : i32
    %c0_i32_1 = arith.constant 0 : i32
    return %c0_i32, %c0_i32_0 : i32, i32
  }
  func.func @transform_2(%arg0: i32) -> (i32, i32) {
    %c0_i32 = arith.constant 0 : i32
    %c0_i32_0 = arith.constant 0 : i32
    %c0_i32_1 = arith.constant 0 : i32
    return %c0_i32, %c0_i32_0 : i32, i32
  }
  func.func @transform_3(%arg0: i32) -> (i32, i32) {
    %c0_i32 = arith.constant 0 : i32
    %c0_i32_0 = arith.constant 0 : i32
    return %arg0, %c0_i32 : i32, i32
  }
}

module attributes {stable_mosaic.version = 11 : i64} {
  func.func @kernel(%arg0: i32, %arg1: memref<1x16x64xbf16, #tpu.memory_space<vmem>>, %arg2: memref<2x64x128xbf16, #tpu.memory_space<vmem>>, %arg3: memref<1x128xf32, #tpu.memory_space<vmem>>, %arg4: memref<2x1x128xf32, #tpu.memory_space<vmem>>) attributes {dimension_semantics = [#tpu.dimension_semantics<arbitrary>], iteration_bounds = array<i64: 1>, scalar_prefetch = 0 : i64, scratch_operands = 0 : i64, tpu.core_type = #tpu.core_type<tc>, window_params = [{pipeline_mode = #tpu.pipeline_mode<synchronous>, transform_indices = @transform_0, window_bounds = array<i64: 1, 16, 64>}, {pipeline_mode = #tpu.pipeline_mode<synchronous>, transform_indices = @transform_1, window_bounds = array<i64: 2, 64, 128>}, {pipeline_mode = #tpu.pipeline_mode<synchronous>, transform_indices = @transform_2, window_bounds = array<i64: 1, 128>}, {pipeline_mode = #tpu.pipeline_mode<synchronous>, transform_indices = @transform_3, window_bounds = array<i64: 2, 1, 128>}]} {
    %c0 = arith.constant 0 : index
    %c0_0 = arith.constant 0 : index
    %c0_1 = arith.constant 0 : index
    %0 = vector.load %arg1[%c0, %c0_0, %c0_1] : memref<1x16x64xbf16, #tpu.memory_space<vmem>>, vector<1x16x64xbf16>
    %1 = arith.extf %0 : vector<1x16x64xbf16> to vector<1x16x64xf32>
    %cst = arith.constant dense<0.000000e+00> : vector<1x64xf32>
    %2 = vector.multi_reduction <add>, %1, %cst [1] : vector<1x16x64xf32> to vector<1x64xf32>
    %cst_2 = arith.constant 1.600000e+01 : f32
    %3 = vector.broadcast %cst_2 : f32 to vector<1x64xf32>
    %4 = arith.divf %2, %3 : vector<1x64xf32>
    %5 = arith.truncf %4 : vector<1x64xf32> to vector<1x64xbf16>
    %c0_3 = arith.constant 0 : index
    %c0_4 = arith.constant 0 : index
    %6 = vector.load %arg3[%c0_3, %c0_4] : memref<1x128xf32, #tpu.memory_space<vmem>>, vector<1x128xf32>
    %c0_5 = arith.constant 0 : index
    %c0_6 = arith.constant 0 : index
    %c0_7 = arith.constant 0 : index
    %7 = vector.load %arg2[%c0_5, %c0_6, %c0_7] : memref<2x64x128xbf16, #tpu.memory_space<vmem>>, vector<1x64x128xbf16>
    %8 = vector.shape_cast %7 : vector<1x64x128xbf16> to vector<64x128xbf16>
    %cst_8 = arith.constant dense<0.000000e+00> : vector<1x128xf32>
    %9 = tpu.matmul %5, %8, %cst_8 {dimension_numbers = #tpu.dot_dimension_numbers<[1], [0], [0], [1], [0, 0, 1, 1], [], []>} : vector<1x64xbf16>, vector<64x128xbf16>, vector<1x128xf32> -> vector<1x128xf32>
    %10 = arith.addf %9, %6 : vector<1x128xf32>
    %c0_9 = arith.constant 0 : index
    %c0_10 = arith.constant 0 : index
    %c0_11 = arith.constant 0 : index
    %11 = vector.load %arg4[%c0_9, %c0_10, %c0_11] : memref<2x1x128xf32, #tpu.memory_space<vmem>>, vector<1x1x128xf32>
    %12 = vector.shape_cast %11 : vector<1x1x128xf32> to vector<1x128xf32>
    %13 = vector.shape_cast %10 : vector<1x128xf32> to vector<1x1x128xf32>
    tpu.vector_store %arg4[%c0_9, %c0_10, %c0_11], %13 {strides = array<i32>} : memref<2x1x128xf32, #tpu.memory_space<vmem>>, vector<1x1x128xf32>,
    %c1 = arith.constant 1 : index
    %c0_12 = arith.constant 0 : index
    %c0_13 = arith.constant 0 : index
    %14 = vector.load %arg2[%c1, %c0_12, %c0_13] : memref<2x64x128xbf16, #tpu.memory_space<vmem>>, vector<1x64x128xbf16>
    %15 = vector.shape_cast %14 : vector<1x64x128xbf16> to vector<64x128xbf16>
    %cst_14 = arith.constant dense<0.000000e+00> : vector<1x128xf32>
    %16 = tpu.matmul %5, %15, %cst_14 {dimension_numbers = #tpu.dot_dimension_numbers<[1], [0], [0], [1], [0, 0, 1, 1], [], []>} : vector<1x64xbf16>, vector<64x128xbf16>, vector<1x128xf32> -> vector<1x128xf32>
    %17 = arith.addf %16, %6 : vector<1x128xf32>
    %c1_15 = arith.constant 1 : index
    %c0_16 = arith.constant 0 : index
    %c0_17 = arith.constant 0 : index
    %18 = vector.load %arg4[%c1_15, %c0_16, %c0_17] : memref<2x1x128xf32, #tpu.memory_space<vmem>>, vector<1x1x128xf32>
    %19 = vector.shape_cast %18 : vector<1x1x128xf32> to vector<1x128xf32>
    %20 = vector.shape_cast %17 : vector<1x128xf32> to vector<1x1x128xf32>
    tpu.vector_store %arg4[%c1_15, %c0_16, %c0_17], %20 {strides = array<i32>} : memref<2x1x128xf32, #tpu.memory_space<vmem>>, vector<1x1x128xf32>,
    return
  }
  func.func @transform_0(%arg0: i32) -> (i32, i32, i32) {
    %c0_i32 = arith.constant 0 : i32
    %c0_i32_0 = arith.constant 0 : i32
    %c0_i32_1 = arith.constant 0 : i32
    %c0_i32_2 = arith.constant 0 : i32
    return %c0_i32, %c0_i32_0, %c0_i32_1 : i32, i32, i32
  }
  func.func @transform_1(%arg0: i32) -> (i32, i32, i32) {
    %c0_i32 = arith.constant 0 : i32
    %c0_i32_0 = arith.constant 0 : i32
    %c0_i32_1 = arith.constant 0 : i32
    %c0_i32_2 = arith.constant 0 : i32
    return %c0_i32, %c0_i32_0, %c0_i32_1 : i32, i32, i32
  }
  func.func @transform_2(%arg0: i32) -> (i32, i32) {
    %c0_i32 = arith.constant 0 : i32
    %c0_i32_0 = arith.constant 0 : i32
    %c0_i32_1 = arith.constant 0 : i32
    return %c0_i32, %c0_i32_0 : i32, i32
  }
  func.func @transform_3(%arg0: i32) -> (i32, i32, i32) {
    %c0_i32 = arith.constant 0 : i32
    %c0_i32_0 = arith.constant 0 : i32
    %c0_i32_1 = arith.constant 0 : i32
    %c0_i32_2 = arith.constant 0 : i32
    return %c0_i32, %c0_i32_0, %c0_i32_1 : i32, i32, i32
  }
}

</mosaic_0001>

<bundles_post_ra>
// kernel: super_wide_resnet_forward.8
= control target key start
LH: loop header
LB: loop body
LE: loop exit
PB: predicated region body
PF: predicated region fallthrough
CT: control target
= control target key end

     0   :  { %v411_v40 = vlaneseq  ;;  %vm965_vm0 = vcmask 125952   ;;  %s1736_s1 = inlined_call_operand.vmem [shape: bf16[128,16], index: 1, kind: input, shape index: {}]   ;;  %s1737_s0 = inlined_call_operand.vmem [shape: bf16[2,256,128], index: 0, kind: input, shape index: {}]   ;;  %s1738_s2 = inlined_call_operand.vmem [shape: f32[1,16], index: 2, kind: input, shape index: {}]   ;;  %s1739_s3 = inlined_call_operand.vmem [shape: f32[2,16], index: 3, kind: input, shape index: {}]   ;;  %s1740_s4 = inlined_call_operand.vmem [shape: bf16[256,16], index: 4, kind: output, shape index: {}]  }
   0x1   :  { %v1283_v0 = vld [vmem:[%s1736_s1] sm:$0xff]   ;;  %v1284_v1 = vld [vmem:[%s1736_s1 + $0x8] sm:$0xff]   ;;  %v1285_v2 = vld [vmem:[%s1736_s1 + $0x10] sm:$0xff]  }
   0x2   :  { %1187 = vmatprep.subr.bf16.mxu0 %v1283_v0  ;;  %1235 = vmatprep.subr.bf16.mxu1 %v1283_v0  ;;  %v1286_v3 = vld [vmem:[%s1736_s1 + $0x18] sm:$0xff]   ;;  %v1291_v4 = vld [vmem:[%s1737_s0] sm:$0xff]   ;;  %v1288_v7 = vld [vmem:[%s1736_s1 + $0x28] sm:$0xff]   ;;  %v412_v41 = vshrl.u32 %v411_v40, 7 }
   0x3   :  { %1188 = vmatpush3.bf16.msra.mxu0 %v1283_v0  ;;  %1236 = vmatpush3.bf16.msra.mxu1 %v1283_v0  ;;  %v1292_v5 = vld [vmem:[%s1737_s0 + $0x80] sm:$0xff]   ;;  %v1289_v8 = vld [vmem:[%s1736_s1 + $0x30] sm:$0xff]   ;;  %v1290_v9 = vld [vmem:[%s1736_s1 + $0x38] sm:$0xff]  }
   0x4   :  { %1189 = vmatprep.subr.bf16.mxu0 %v1284_v1  ;;  %1237 = vmatprep.subr.bf16.mxu1 %v1284_v1  ;;  %v1287_v6 = vld [vmem:[%s1736_s1 + $0x20] sm:$0xff]   ;;  %v1293_v10 = vld [vmem:[%s1737_s0 + $0x8] sm:$0xff]   ;;  %v1295_v12 = vld [vmem:[%s1737_s0 + $0x10] sm:$0xff]   ;;  %v413_v42 = vsub.s32 0, %v412_v41  ;;  %v771_v43 = vsub.s32 1, %v412_v41 }
   0x5   :  { %1203 = vmatprep.mubr.bf16.mxu0 %v1291_v4  ;;  %1251 = vmatprep.mubr.bf16.mxu1 %v1292_v5  ;;  %v1294_v11 = vld [vmem:[%s1737_s0 + $0x88] sm:$0xff]   ;;  %v1296_v13 = vld [vmem:[%s1737_s0 + $0x90] sm:$0xff]   ;;  %v1297_v14 = vld [vmem:[%s1737_s0 + $0x18] sm:$0xff]  }
   0x6   :  { %v1298_v15 = vld [vmem:[%s1737_s0 + $0x98] sm:$0xff]   ;;  %v1299_v16 = vld [vmem:[%s1737_s0 + $0x20] sm:$0xff]   ;;  %v1301_v18 = vld [vmem:[%s1737_s0 + $0x28] sm:$0xff]  }
   0x7   :  { %1190 = vmatpush3.bf16.msra.mxu0 %v1284_v1  ;;  %1238 = vmatpush3.bf16.msra.mxu1 %v1284_v1  ;;  %v1300_v17 = vld [vmem:[%s1737_s0 + $0xa0] sm:$0xff]   ;;  %v1302_v19 = vld [vmem:[%s1737_s0 + $0xa8] sm:$0xff]   ;;  %v1303_v20 = vld [vmem:[%s1737_s0 + $0x30] sm:$0xff]  }
   0x8   :  { %1191 = vmatprep.subr.bf16.mxu0 %v1285_v2  ;;  %1239 = vmatprep.subr.bf16.mxu1 %v1285_v2  ;;  %v1304_v21 = vld [vmem:[%s1737_s0 + $0xb0] sm:$0xff]   ;;  %v1305_v22 = vld [vmem:[%s1737_s0 + $0x38] sm:$0xff]   ;;  %v1307_v24 = vld [vmem:[%s1737_s0 + $0x40] sm:$0xff]  }
   0x9   :  { %v1306_v23 = vld [vmem:[%s1737_s0 + $0xb8] sm:$0xff]   ;;  %v1308_v25 = vld [vmem:[%s1737_s0 + $0xc0] sm:$0xff]   ;;  %v1309_v26 = vld [vmem:[%s1737_s0 + $0x48] sm:$0xff]  }
   0xa   :  { %v1310_v27 = vld [vmem:[%s1737_s0 + $0xc8] sm:$0xff]   ;;  %v1311_v28 = vld [vmem:[%s1737_s0 + $0x50] sm:$0xff]   ;;  %v1313_v30 = vld [vmem:[%s1737_s0 + $0x58] sm:$0xff]  }
   0xb   :  { %1192 = vmatpush3.bf16.msra.mxu0 %v1285_v2  ;;  %1240 = vmatpush3.bf16.msra.mxu1 %v1285_v2  ;;  %v1312_v29 = vld [vmem:[%s1737_s0 + $0xd0] sm:$0xff]   ;;  %v1314_v31 = vld [vmem:[%s1737_s0 + $0xd8] sm:$0xff]   ;;  %v1315_v32 = vld [vmem:[%s1737_s0 + $0x60] sm:$0xff]  }
   0xc   :  { %1193 = vmatprep.subr.bf16.mxu0 %v1286_v3  ;;  %1241 = vmatprep.subr.bf16.mxu1 %v1286_v3  ;;  %v1316_v33 = vld [vmem:[%s1737_s0 + $0xe0] sm:$0xff]   ;;  %v1317_v34 = vld [vmem:[%s1737_s0 + $0x68] sm:$0xff]   ;;  %v1319_v36 = vld [vmem:[%s1737_s0 + $0x70] sm:$0xff]  }
   0xd   :  { %v1318_v35 = vld [vmem:[%s1737_s0 + $0xe8] sm:$0xff]   ;;  %v1320_v37 = vld [vmem:[%s1737_s0 + $0xf0] sm:$0xff]   ;;  %v1321_v38 = vld [vmem:[%s1737_s0 + $0x78] sm:$0xff]  }
   0xe   :  { %v1322_v39 = vld [vmem:[%s1737_s0 + $0xf8] sm:$0xff]   ;;  %v35_v44 = vld [vmem:[%s1739_s3] sm:$0x3] }
   0xf   :  { %1194 = vmatpush3.bf16.msra.mxu0 %v1286_v3  ;;  %1242 = vmatpush3.bf16.msra.mxu1 %v1286_v3  ;;  %v1474_v45 = vld [vmem:[%s1738_s2] ss:$0 sm:$0xff]  ;;  %v1477_v49 = vrot.slane %v35_v44, %v413_v42  ;;  %v1480_v51 = vrot.slane %v35_v44, %v771_v43 }
  0x10   :  { %1195 = vmatprep.subr.bf16.mxu0 %v1287_v6  ;;  %1243 = vmatprep.subr.bf16.mxu1 %v1287_v6 }
  0x13   :  { %1196 = vmatpush3.bf16.msra.mxu0 %v1287_v6  ;;  %1244 = vmatpush3.bf16.msra.mxu1 %v1287_v6 }
  0x14   :  { %1197 = vmatprep.subr.bf16.mxu0 %v1288_v7  ;;  %1245 = vmatprep.subr.bf16.mxu1 %v1288_v7 }
  0x17   :  { %1198 = vmatpush3.bf16.msra.mxu0 %v1288_v7  ;;  %1246 = vmatpush3.bf16.msra.mxu1 %v1288_v7 }
  0x18   :  { %1199 = vmatprep.subr.bf16.mxu0 %v1289_v8  ;;  %1247 = vmatprep.subr.bf16.mxu1 %v1289_v8 }
  0x1b   :  { %1200 = vmatpush3.bf16.msra.mxu0 %v1289_v8  ;;  %1248 = vmatpush3.bf16.msra.mxu1 %v1289_v8 }
  0x1c   :  { %1201 = vmatprep.subr.bf16.mxu0 %v1290_v9  ;;  %1249 = vmatprep.subr.bf16.mxu1 %v1290_v9 }
  0x1f   :  { %1202 = vmatpush3.bf16.msra.mxu0 %v1290_v9  ;;  %1250 = vmatpush3.bf16.msra.mxu1 %v1290_v9 }
  0x22   :  { %1204 = vmatmul.mubr.bf16.vlgmr.msra.gmra.mrb[0].mxu0 %v1293_v10  ;;  %1252 = vmatmul.mubr.bf16.vlgmr.msra.gmra.mrb[0].mxu1 %v1294_v11 }
  0x23   :  { %1207 = vmatprep.mubr.bf16.mxu0 %v1295_v12  ;;  %1255 = vmatprep.mubr.bf16.mxu1 %v1296_v13 }
  0x2a   :  { %1208 = vmatmul.mubr.bf16.gmra.mrb[4].mxu0 %v1297_v14  ;;  %1256 = vmatmul.mubr.bf16.gmra.mrb[4].mxu1 %v1298_v15 }
  0x2b   :  { %1211 = vmatprep.mubr.bf16.mxu0 %v1299_v16  ;;  %1259 = vmatprep.mubr.bf16.mxu1 %v1300_v17 }
  0x32   :  { %1212 = vmatmul.mubr.bf16.gmra.mrb[8].mxu0 %v1301_v18  ;;  %1260 = vmatmul.mubr.bf16.gmra.mrb[8].mxu1 %v1302_v19 }
  0x33   :  { %1215 = vmatprep.mubr.bf16.mxu0 %v1303_v20  ;;  %1263 = vmatprep.mubr.bf16.mxu1 %v1304_v21 }
  0x3a   :  { %1216 = vmatmul.mubr.bf16.gmra.mrb[12].mxu0 %v1305_v22  ;;  %1264 = vmatmul.mubr.bf16.gmra.mrb[12].mxu1 %v1306_v23 }
  0x3b   :  { %1219 = vmatprep.mubr.bf16.mxu0 %v1307_v24  ;;  %1267 = vmatprep.mubr.bf16.mxu1 %v1308_v25 }
  0x42   :  { %1220 = vmatmul.mubr.bf16.gmra.mrb[16].mxu0 %v1309_v26  ;;  %1268 = vmatmul.mubr.bf16.gmra.mrb[16].mxu1 %v1310_v27 }
  0x43   :  { %1223 = vmatprep.mubr.bf16.mxu0 %v1311_v28  ;;  %1271 = vmatprep.mubr.bf16.mxu1 %v1312_v29 }
  0x4a   :  { %1224 = vmatmul.mubr.bf16.gmra.mrb[20].mxu0 %v1313_v30  ;;  %1272 = vmatmul.mubr.bf16.gmra.mrb[20].mxu1 %v1314_v31 }
  0x4b   :  { %1227 = vmatprep.mubr.bf16.mxu0 %v1315_v32  ;;  %1275 = vmatprep.mubr.bf16.mxu1 %v1316_v33 }
  0x52   :  { %1228 = vmatmul.mubr.bf16.gmra.mrb[24].mxu0 %v1317_v34  ;;  %1276 = vmatmul.mubr.bf16.gmra.mrb[24].mxu1 %v1318_v35 }
  0x53   :  { %1231 = vmatprep.mubr.bf16.mxu0 %v1319_v36  ;;  %1279 = vmatprep.mubr.bf16.mxu1 %v1320_v37 }
  0x5a   :  { %1232 = vmatmul.mubr.bf16.gmra.mrb[28].mxu0 %v1321_v38  ;;  %1280 = vmatmul.mubr.bf16.gmra.mrb[28].mxu1 %v1322_v39 }
  0xf5   :  { %v1205_v46 = vpop.f32.mrb[0].mxu0  ;;  %v1253_v47 = vpop.f32.mrb[0].mxu1 }
  0xf6   :  { %v261_v48 = vadd.f32 %v1205_v46, %v1474_v45  ;;  %v619_v50 = vadd.f32 %v1253_v47, %v1474_v45  ;;  %v252_v52 = vpop.f32.mrb[1].mxu0  ;;  %v610_v53 = vpop.f32.mrb[1].mxu1 }
  0xf7   :  { %v253_v54 = vadd.f32 %v1474_v45, %v252_v52  ;;  %v611_v55 = vadd.f32 %v1474_v45, %v610_v53  ;;  %v1206_v56 = vpop.f32.mrb[2].mxu0  ;;  %v1254_v57 = vpop.f32.mrb[2].mxu1 }
  0xf8   :  { %v381_v58 = vmax.f32 %v261_v48, 0.0  ;;  %v739_v59 = vmax.f32 %v619_v50, 0.0  ;;  %v264_v60 = vadd.f32 %v1206_v56, %v1474_v45  ;;  %v622_v61 = vadd.f32 %v1254_v57, %v1474_v45  ;;  %v255_v62 = vpop.f32.mrb[3].mxu0  ;;  %v613_v63 = vpop.f32.mrb[3].mxu1 }
  0xf9   :  { %v379_v0 = vmax.f32 %v253_v54, 0.0  ;;  %v737_v1 = vmax.f32 %v611_v55, 0.0  ;;  %v256_v2 = vadd.f32 %v1474_v45, %v255_v62  ;;  %v614_v3 = vadd.f32 %v1474_v45, %v613_v63 }
  0xfa   :  { %v417_v4 = vmul.f32 %v1477_v49, %v381_v58  ;;  %v775_v5 = vmul.f32 %v1480_v51, %v739_v59  ;;  %v382_v6 = vmax.f32 %v264_v60, 0.0  ;;  %v740_v7 = vmax.f32 %v622_v61, 0.0 }
  0xfb   :  { %v415_v8 = vmul.f32 %v1477_v49, %v379_v0  ;;  %v773_v9 = vmul.f32 %v1480_v51, %v737_v1  ;;  %v380_v10 = vmax.f32 %v256_v2, 0.0  ;;  %v738_v11 = vmax.f32 %v614_v3, 0.0 }
  0xfc   :  { %v807_v12 = vadd.f32 %v775_v5, %v417_v4  ;;  %v418_v13 = vmul.f32 %v1477_v49, %v382_v6  ;;  %v776_v14 = vmul.f32 %v1480_v51, %v740_v7 }
  0xfd   :  { %v805_v15 = vadd.f32 %v773_v9, %v415_v8  ;;  %v416_v16 = vmul.f32 %v1477_v49, %v380_v10  ;;  %v774_v17 = vmul.f32 %v1480_v51, %v738_v11  ;;  %v1209_v18 = vpop.f32.mrb[4].mxu0  ;;  %v1257_v19 = vpop.f32.mrb[4].mxu1 }
  0xfe   :  { %v1109_v20 = vpack.c.bf16 %v807_v12, %v807_v12  ;;  %v808_v21 = vadd.f32 %v776_v14, %v418_v13  ;;  %v277_v22 = vadd.f32 %v1209_v18, %v1474_v45  ;;  %v635_v23 = vadd.f32 %v1257_v19, %v1474_v45  ;;  %v268_v24 = vpop.f32.mrb[5].mxu0  ;;  %v626_v25 = vpop.f32.mrb[5].mxu1 }
  0xff   :  { %v1107_v26 = vpack.c.bf16 %v805_v15, %v805_v15  ;;  %v806_v27 = vadd.f32 %v774_v17, %v416_v16  ;;  %v269_v28 = vadd.f32 %v1474_v45, %v268_v24  ;;  %v627_v29 = vadd.f32 %v1474_v45, %v626_v25  ;;  %v1210_v30 = vpop.f32.mrb[6].mxu0  ;;  %v1258_v31 = vpop.f32.mrb[6].mxu1 }
 0x100   :  { %968 = vst.msk [vmem:[%s1740_s4 + $0x8] sm:$0xf] %vm965_vm0, %v1109_v20  ;;  %v1110_v32 = vpack.c.bf16 %v808_v21, %v808_v21  ;;  %v385_v33 = vmax.f32 %v277_v22, 0.0  ;;  %v743_v34 = vmax.f32 %v635_v23, 0.0  ;;  %v280_v35 = vadd.f32 %v1210_v30, %v1474_v45  ;;  %v271_v36 = vpop.f32.mrb[7].mxu0  ;;  %v629_v37 = vpop.f32.mrb[7].mxu1 }
 0x101   :  { %966 = vst.msk [vmem:[%s1740_s4] sm:$0xf] %vm965_vm0, %v1107_v26  ;;  %v1108_v38 = vpack.c.bf16 %v806_v27, %v806_v27  ;;  %v383_v39 = vmax.f32 %v269_v28, 0.0  ;;  %v741_v40 = vmax.f32 %v627_v29, 0.0  ;;  %v638_v41 = vadd.f32 %v1258_v31, %v1474_v45 }
 0x102   :  { %969 = vst.msk [vmem:[%s1740_s4 + $0xc] sm:$0xf] %vm965_vm0, %v1110_v32  ;;  %v421_v42 = vmul.f32 %v1477_v49, %v385_v33  ;;  %v779_v43 = vmul.f32 %v1480_v51, %v743_v34  ;;  %v386_v44 = vmax.f32 %v280_v35, 0.0  ;;  %v272_v46 = vadd.f32 %v1474_v45, %v271_v36 }
 0x103   :  { %967 = vst.msk [vmem:[%s1740_s4 + $0x4] sm:$0xf] %vm965_vm0, %v1108_v38  ;;  %v419_v47 = vmul.f32 %v1477_v49, %v383_v39  ;;  %v777_v48 = vmul.f32 %v1480_v51, %v741_v40  ;;  %v744_v50 = vmax.f32 %v638_v41, 0.0  ;;  %v630_v52 = vadd.f32 %v1474_v45, %v629_v37 }
 0x104   :  { %v811_v53 = vadd.f32 %v779_v43, %v421_v42  ;;  %v422_v54 = vmul.f32 %v1477_v49, %v386_v44  ;;  %v384_v55 = vmax.f32 %v272_v46, 0.0 }
 0x105   :  { %v809_v56 = vadd.f32 %v777_v48, %v419_v47  ;;  %v780_v57 = vmul.f32 %v1480_v51, %v744_v50  ;;  %v742_v58 = vmax.f32 %v630_v52, 0.0  ;;  %v1213_v59 = vpop.f32.mrb[8].mxu0  ;;  %v1261_v60 = vpop.f32.mrb[8].mxu1 }
 0x106   :  { %v1113_v61 = vpack.c.bf16 %v811_v53, %v811_v53  ;;  %v420_v62 = vmul.f32 %v1477_v49, %v384_v55  ;;  %v293_v63 = vadd.f32 %v1213_v59, %v1474_v45  ;;  %v651_v0 = vadd.f32 %v1261_v60, %v1474_v45  ;;  %v284_v1 = vpop.f32.mrb[9].mxu0  ;;  %v642_v2 = vpop.f32.mrb[9].mxu1 }
 0x107   :  { %v1111_v3 = vpack.c.bf16 %v809_v56, %v809_v56  ;;  %v812_v4 = vadd.f32 %v780_v57, %v422_v54  ;;  %v778_v5 = vmul.f32 %v1480_v51, %v742_v58  ;;  %v285_v6 = vadd.f32 %v1474_v45, %v284_v1  ;;  %v1214_v7 = vpop.f32.mrb[10].mxu0  ;;  %v1262_v8 = vpop.f32.mrb[10].mxu1 }
 0x108   :  { %972 = vst.msk [vmem:[%s1740_s4 + $0x18] sm:$0xf] %vm965_vm0, %v1113_v61  ;;  %v389_v9 = vmax.f32 %v293_v63, 0.0  ;;  %v747_v10 = vmax.f32 %v651_v0, 0.0  ;;  %v643_v11 = vadd.f32 %v1474_v45, %v642_v2  ;;  %v296_v12 = vadd.f32 %v1214_v7, %v1474_v45  ;;  %v287_v13 = vpop.f32.mrb[11].mxu0  ;;  %v645_v14 = vpop.f32.mrb[11].mxu1 }
 0x109   :  { %970 = vst.msk [vmem:[%s1740_s4 + $0x10] sm:$0xf] %vm965_vm0, %v1111_v3  ;;  %v1114_v15 = vpack.c.bf16 %v812_v4, %v812_v4  ;;  %v810_v16 = vadd.f32 %v778_v5, %v420_v62  ;;  %v387_v17 = vmax.f32 %v285_v6, 0.0  ;;  %v654_v18 = vadd.f32 %v1262_v8, %v1474_v45 }
 0x10a   :  { %v425_v19 = vmul.f32 %v1477_v49, %v389_v9  ;;  %v783_v20 = vmul.f32 %v1480_v51, %v747_v10  ;;  %v745_v21 = vmax.f32 %v643_v11, 0.0  ;;  %v390_v22 = vmax.f32 %v296_v12, 0.0 }
 0x10b   :  { %973 = vst.msk [vmem:[%s1740_s4 + $0x1c] sm:$0xf] %vm965_vm0, %v1114_v15  ;;  %v1112_v23 = vpack.c.bf16 %v810_v16, %v810_v16  ;;  %v423_v24 = vmul.f32 %v1477_v49, %v387_v17  ;;  %v748_v25 = vmax.f32 %v654_v18, 0.0  ;;  %v288_v26 = vadd.f32 %v1474_v45, %v287_v13 }
 0x10c   :  { %v815_v27 = vadd.f32 %v783_v20, %v425_v19  ;;  %v781_v28 = vmul.f32 %v1480_v51, %v745_v21  ;;  %v426_v29 = vmul.f32 %v1477_v49, %v390_v22  ;;  %v646_v30 = vadd.f32 %v1474_v45, %v645_v14 }
 0x10d   :  { %971 = vst.msk [vmem:[%s1740_s4 + $0x14] sm:$0xf] %vm965_vm0, %v1112_v23  ;;  %v784_v31 = vmul.f32 %v1480_v51, %v748_v25  ;;  %v388_v32 = vmax.f32 %v288_v26, 0.0  ;;  %v1217_v33 = vpop.f32.mrb[12].mxu0  ;;  %v1265_v34 = vpop.f32.mrb[12].mxu1 }
 0x10e   :  { %v1117_v35 = vpack.c.bf16 %v815_v27, %v815_v27  ;;  %v813_v36 = vadd.f32 %v781_v28, %v423_v24  ;;  %v746_v37 = vmax.f32 %v646_v30, 0.0  ;;  %v309_v38 = vadd.f32 %v1217_v33, %v1474_v45  ;;  %v300_v39 = vpop.f32.mrb[13].mxu0  ;;  %v658_v40 = vpop.f32.mrb[13].mxu1 }
 0x10f   :  { %v816_v41 = vadd.f32 %v784_v31, %v426_v29  ;;  %v424_v42 = vmul.f32 %v1477_v49, %v388_v32  ;;  %v667_v43 = vadd.f32 %v1265_v34, %v1474_v45  ;;  %v301_v44 = vadd.f32 %v1474_v45, %v300_v39  ;;  %v1218_v46 = vpop.f32.mrb[14].mxu0  ;;  %v1266_v47 = vpop.f32.mrb[14].mxu1 }
 0x110   :  { %976 = vst.msk [vmem:[%s1740_s4 + $0x28] sm:$0xf] %vm965_vm0, %v1117_v35  ;;  %v1115_v48 = vpack.c.bf16 %v813_v36, %v813_v36  ;;  %v782_v50 = vmul.f32 %v1480_v51, %v746_v37  ;;  %v393_v52 = vmax.f32 %v309_v38, 0.0  ;;  %v659_v53 = vadd.f32 %v1474_v45, %v658_v40  ;;  %v303_v54 = vpop.f32.mrb[15].mxu0  ;;  %v661_v55 = vpop.f32.mrb[15].mxu1 }
 0x111   :  { %v1118_v56 = vpack.c.bf16 %v816_v41, %v816_v41  ;;  %v751_v57 = vmax.f32 %v667_v43, 0.0  ;;  %v391_v58 = vmax.f32 %v301_v44, 0.0  ;;  %v312_v59 = vadd.f32 %v1218_v46, %v1474_v45 }
 0x112   :  { %974 = vst.msk [vmem:[%s1740_s4 + $0x20] sm:$0xf] %vm965_vm0, %v1115_v48  ;;  %v814_v60 = vadd.f32 %v782_v50, %v424_v42  ;;  %v429_v61 = vmul.f32 %v1477_v49, %v393_v52  ;;  %v749_v62 = vmax.f32 %v659_v53, 0.0  ;;  %v670_v63 = vadd.f32 %v1266_v47, %v1474_v45 }
 0x113   :  { %977 = vst.msk [vmem:[%s1740_s4 + $0x2c] sm:$0xf] %vm965_vm0, %v1118_v56  ;;  %v787_v0 = vmul.f32 %v1480_v51, %v751_v57  ;;  %v427_v1 = vmul.f32 %v1477_v49, %v391_v58  ;;  %v394_v2 = vmax.f32 %v312_v59, 0.0  ;;  %v304_v3 = vadd.f32 %v1474_v45, %v303_v54 }
 0x114   :  { %v1116_v4 = vpack.c.bf16 %v814_v60, %v814_v60  ;;  %v785_v5 = vmul.f32 %v1480_v51, %v749_v62  ;;  %v752_v6 = vmax.f32 %v670_v63, 0.0  ;;  %v662_v7 = vadd.f32 %v1474_v45, %v661_v55 }
 0x115   :  { %v819_v8 = vadd.f32 %v787_v0, %v429_v61  ;;  %v430_v9 = vmul.f32 %v1477_v49, %v394_v2  ;;  %v392_v10 = vmax.f32 %v304_v3, 0.0  ;;  %v1221_v11 = vpop.f32.mrb[16].mxu0  ;;  %v1269_v12 = vpop.f32.mrb[16].mxu1 }
 0x116   :  { %975 = vst.msk [vmem:[%s1740_s4 + $0x24] sm:$0xf] %vm965_vm0, %v1116_v4  ;;  %v817_v13 = vadd.f32 %v785_v5, %v427_v1  ;;  %v788_v14 = vmul.f32 %v1480_v51, %v752_v6  ;;  %v750_v15 = vmax.f32 %v662_v7, 0.0  ;;  %v325_v16 = vadd.f32 %v1221_v11, %v1474_v45  ;;  %v316_v17 = vpop.f32.mrb[17].mxu0  ;;  %v674_v18 = vpop.f32.mrb[17].mxu1 }
 0x117   :  { %v1121_v19 = vpack.c.bf16 %v819_v8, %v819_v8  ;;  %v428_v20 = vmul.f32 %v1477_v49, %v392_v10  ;;  %v683_v21 = vadd.f32 %v1269_v12, %v1474_v45  ;;  %v317_v22 = vadd.f32 %v1474_v45, %v316_v17  ;;  %v1222_v23 = vpop.f32.mrb[18].mxu0  ;;  %v1270_v24 = vpop.f32.mrb[18].mxu1 }
 0x118   :  { %v1119_v25 = vpack.c.bf16 %v817_v13, %v817_v13  ;;  %v820_v26 = vadd.f32 %v788_v14, %v430_v9  ;;  %v786_v27 = vmul.f32 %v1480_v51, %v750_v15  ;;  %v397_v28 = vmax.f32 %v325_v16, 0.0  ;;  %v319_v29 = vpop.f32.mrb[19].mxu0  ;;  %v677_v30 = vpop.f32.mrb[19].mxu1 }
 0x119   :  { %980 = vst.msk [vmem:[%s1740_s4 + $0x38] sm:$0xf] %vm965_vm0, %v1121_v19  ;;  %v755_v31 = vmax.f32 %v683_v21, 0.0  ;;  %v395_v32 = vmax.f32 %v317_v22, 0.0  ;;  %v675_v33 = vadd.f32 %v1474_v45, %v674_v18  ;;  %v328_v34 = vadd.f32 %v1222_v23, %v1474_v45 }
 0x11a   :  { %978 = vst.msk [vmem:[%s1740_s4 + $0x30] sm:$0xf] %vm965_vm0, %v1119_v25  ;;  %v1122_v35 = vpack.c.bf16 %v820_v26, %v820_v26  ;;  %v818_v36 = vadd.f32 %v786_v27, %v428_v20  ;;  %v433_v37 = vmul.f32 %v1477_v49, %v397_v28  ;;  %v686_v38 = vadd.f32 %v1270_v24, %v1474_v45 }
 0x11b   :  { %v791_v39 = vmul.f32 %v1480_v51, %v755_v31  ;;  %v431_v40 = vmul.f32 %v1477_v49, %v395_v32  ;;  %v753_v41 = vmax.f32 %v675_v33, 0.0  ;;  %v398_v42 = vmax.f32 %v328_v34, 0.0 }
 0x11c   :  { %981 = vst.msk [vmem:[%s1740_s4 + $0x3c] sm:$0xf] %vm965_vm0, %v1122_v35  ;;  %v1120_v43 = vpack.c.bf16 %v818_v36, %v818_v36  ;;  %v756_v44 = vmax.f32 %v686_v38, 0.0  ;;  %v320_v46 = vadd.f32 %v1474_v45, %v319_v29  ;;  %v678_v47 = vadd.f32 %v1474_v45, %v677_v30 }
 0x11d   :  { %v823_v48 = vadd.f32 %v791_v39, %v433_v37  ;;  %v789_v50 = vmul.f32 %v1480_v51, %v753_v41  ;;  %v434_v52 = vmul.f32 %v1477_v49, %v398_v42  ;;  %v1225_v53 = vpop.f32.mrb[20].mxu0  ;;  %v1273_v54 = vpop.f32.mrb[20].mxu1 }
 0x11e   :  { %979 = vst.msk [vmem:[%s1740_s4 + $0x34] sm:$0xf] %vm965_vm0, %v1120_v43  ;;  %v792_v55 = vmul.f32 %v1480_v51, %v756_v44  ;;  %v396_v56 = vmax.f32 %v320_v46, 0.0  ;;  %v754_v57 = vmax.f32 %v678_v47, 0.0  ;;  %v341_v58 = vadd.f32 %v1225_v53, %v1474_v45  ;;  %v332_v59 = vpop.f32.mrb[21].mxu0  ;;  %v690_v60 = vpop.f32.mrb[21].mxu1 }
 0x11f   :  { %v1125_v61 = vpack.c.bf16 %v823_v48, %v823_v48  ;;  %v821_v62 = vadd.f32 %v789_v50, %v431_v40  ;;  %v699_v63 = vadd.f32 %v1273_v54, %v1474_v45  ;;  %v333_v0 = vadd.f32 %v1474_v45, %v332_v59  ;;  %v1226_v1 = vpop.f32.mrb[22].mxu0  ;;  %v1274_v2 = vpop.f32.mrb[22].mxu1 }
 0x120   :  { %v824_v3 = vadd.f32 %v792_v55, %v434_v52  ;;  %v432_v4 = vmul.f32 %v1477_v49, %v396_v56  ;;  %v790_v5 = vmul.f32 %v1480_v51, %v754_v57  ;;  %v401_v6 = vmax.f32 %v341_v58, 0.0  ;;  %v335_v7 = vpop.f32.mrb[23].mxu0  ;;  %v693_v8 = vpop.f32.mrb[23].mxu1 }
 0x121   :  { %984 = vst.msk [vmem:[%s1740_s4 + $0x48] sm:$0xf] %vm965_vm0, %v1125_v61  ;;  %v1123_v9 = vpack.c.bf16 %v821_v62, %v821_v62  ;;  %v759_v10 = vmax.f32 %v699_v63, 0.0  ;;  %v399_v11 = vmax.f32 %v333_v0, 0.0  ;;  %v691_v12 = vadd.f32 %v1474_v45, %v690_v60 }
 0x122   :  { %v1126_v13 = vpack.c.bf16 %v824_v3, %v824_v3  ;;  %v822_v14 = vadd.f32 %v790_v5, %v432_v4  ;;  %v437_v15 = vmul.f32 %v1477_v49, %v401_v6  ;;  %v344_v16 = vadd.f32 %v1226_v1, %v1474_v45 }
 0x123   :  { %982 = vst.msk [vmem:[%s1740_s4 + $0x40] sm:$0xf] %vm965_vm0, %v1123_v9  ;;  %v795_v17 = vmul.f32 %v1480_v51, %v759_v10  ;;  %v435_v18 = vmul.f32 %v1477_v49, %v399_v11  ;;  %v757_v19 = vmax.f32 %v691_v12, 0.0  ;;  %v702_v20 = vadd.f32 %v1274_v2, %v1474_v45 }
 0x124   :  { %985 = vst.msk [vmem:[%s1740_s4 + $0x4c] sm:$0xf] %vm965_vm0, %v1126_v13  ;;  %v1124_v21 = vpack.c.bf16 %v822_v14, %v822_v14  ;;  %v402_v22 = vmax.f32 %v344_v16, 0.0  ;;  %v336_v23 = vadd.f32 %v1474_v45, %v335_v7  ;;  %v694_v24 = vadd.f32 %v1474_v45, %v693_v8 }
 0x125   :  { %v827_v25 = vadd.f32 %v795_v17, %v437_v15  ;;  %v793_v26 = vmul.f32 %v1480_v51, %v757_v19  ;;  %v760_v27 = vmax.f32 %v702_v20, 0.0  ;;  %v1229_v28 = vpop.f32.mrb[24].mxu0  ;;  %v1277_v29 = vpop.f32.mrb[24].mxu1 }
 0x126   :  { %983 = vst.msk [vmem:[%s1740_s4 + $0x44] sm:$0xf] %vm965_vm0, %v1124_v21  ;;  %v438_v30 = vmul.f32 %v1477_v49, %v402_v22  ;;  %v400_v31 = vmax.f32 %v336_v23, 0.0  ;;  %v758_v32 = vmax.f32 %v694_v24, 0.0  ;;  %v357_v33 = vadd.f32 %v1229_v28, %v1474_v45  ;;  %v348_v34 = vpop.f32.mrb[25].mxu0  ;;  %v706_v35 = vpop.f32.mrb[25].mxu1 }
 0x127   :  { %v1129_v36 = vpack.c.bf16 %v827_v25, %v827_v25  ;;  %v825_v37 = vadd.f32 %v793_v26, %v435_v18  ;;  %v796_v38 = vmul.f32 %v1480_v51, %v760_v27  ;;  %v715_v39 = vadd.f32 %v1277_v29, %v1474_v45  ;;  %v1230_v40 = vpop.f32.mrb[26].mxu0  ;;  %v1278_v41 = vpop.f32.mrb[26].mxu1 }
 0x128   :  { %v436_v42 = vmul.f32 %v1477_v49, %v400_v31  ;;  %v794_v43 = vmul.f32 %v1480_v51, %v758_v32  ;;  %v405_v44 = vmax.f32 %v357_v33, 0.0  ;;  %v349_v46 = vadd.f32 %v1474_v45, %v348_v34  ;;  %v351_v47 = vpop.f32.mrb[27].mxu0  ;;  %v709_v48 = vpop.f32.mrb[27].mxu1 }
 0x129   :  { %988 = vst.msk [vmem:[%s1740_s4 + $0x58] sm:$0xf] %vm965_vm0, %v1129_v36  ;;  %v1127_v50 = vpack.c.bf16 %v825_v37, %v825_v37  ;;  %v828_v52 = vadd.f32 %v796_v38, %v438_v30  ;;  %v763_v53 = vmax.f32 %v715_v39, 0.0  ;;  %v707_v54 = vadd.f32 %v1474_v45, %v706_v35 }
 0x12a   :  { %v826_v55 = vadd.f32 %v794_v43, %v436_v42  ;;  %v441_v56 = vmul.f32 %v1477_v49, %v405_v44  ;;  %v403_v57 = vmax.f32 %v349_v46, 0.0  ;;  %v360_v58 = vadd.f32 %v1230_v40, %v1474_v45 }
 0x12b   :  { %986 = vst.msk [vmem:[%s1740_s4 + $0x50] sm:$0xf] %vm965_vm0, %v1127_v50  ;;  %v1130_v59 = vpack.c.bf16 %v828_v52, %v828_v52  ;;  %v799_v60 = vmul.f32 %v1480_v51, %v763_v53  ;;  %v761_v61 = vmax.f32 %v707_v54, 0.0  ;;  %v718_v62 = vadd.f32 %v1278_v41, %v1474_v45 }
 0x12c   :  { %v1128_v63 = vpack.c.bf16 %v826_v55, %v826_v55  ;;  %v439_v0 = vmul.f32 %v1477_v49, %v403_v57  ;;  %v406_v1 = vmax.f32 %v360_v58, 0.0  ;;  %v352_v2 = vadd.f32 %v1474_v45, %v351_v47 }
 0x12d   :  { %989 = vst.msk [vmem:[%s1740_s4 + $0x5c] sm:$0xf] %vm965_vm0, %v1130_v59  ;;  %v831_v3 = vadd.f32 %v799_v60, %v441_v56  ;;  %v797_v4 = vmul.f32 %v1480_v51, %v761_v61  ;;  %v764_v5 = vmax.f32 %v718_v62, 0.0  ;;  %v710_v6 = vadd.f32 %v1474_v45, %v709_v48  ;;  %v1233_v7 = vpop.f32.mrb[28].mxu0  ;;  %v1281_v8 = vpop.f32.mrb[28].mxu1 }
 0x12e   :  { %987 = vst.msk [vmem:[%s1740_s4 + $0x54] sm:$0xf] %vm965_vm0, %v1128_v63  ;;  %v442_v9 = vmul.f32 %v1477_v49, %v406_v1  ;;  %v404_v10 = vmax.f32 %v352_v2, 0.0  ;;  %v373_v11 = vadd.f32 %v1233_v7, %v1474_v45  ;;  %v731_v12 = vadd.f32 %v1281_v8, %v1474_v45  ;;  %v364_v13 = vpop.f32.mrb[29].mxu0  ;;  %v722_v14 = vpop.f32.mrb[29].mxu1 }
 0x12f   :  { %v1133_v15 = vpack.c.bf16 %v831_v3, %v831_v3  ;;  %v829_v16 = vadd.f32 %v797_v4, %v439_v0  ;;  %v800_v17 = vmul.f32 %v1480_v51, %v764_v5  ;;  %v762_v18 = vmax.f32 %v710_v6, 0.0  ;;  %v1234_v19 = vpop.f32.mrb[30].mxu0  ;;  %v1282_v20 = vpop.f32.mrb[30].mxu1 }
 0x130   :  { %v440_v21 = vmul.f32 %v1477_v49, %v404_v10  ;;  %v409_v22 = vmax.f32 %v373_v11, 0.0  ;;  %v767_v23 = vmax.f32 %v731_v12, 0.0  ;;  %v365_v24 = vadd.f32 %v1474_v45, %v364_v13  ;;  %v367_v25 = vpop.f32.mrb[31].mxu0  ;;  %v725_v26 = vpop.f32.mrb[31].mxu1 }
 0x131   :  { %992 = vst.msk [vmem:[%s1740_s4 + $0x68] sm:$0xf] %vm965_vm0, %v1133_v15  ;;  %v1131_v27 = vpack.c.bf16 %v829_v16, %v829_v16  ;;  %v832_v28 = vadd.f32 %v800_v17, %v442_v9  ;;  %v798_v29 = vmul.f32 %v1480_v51, %v762_v18  ;;  %v723_v30 = vadd.f32 %v1474_v45, %v722_v14 }
 0x132   :  { %v445_v31 = vmul.f32 %v1477_v49, %v409_v22  ;;  %v803_v32 = vmul.f32 %v1480_v51, %v767_v23  ;;  %v407_v33 = vmax.f32 %v365_v24, 0.0  ;;  %v376_v34 = vadd.f32 %v1234_v19, %v1474_v45 }
 0x133   :  { %990 = vst.msk [vmem:[%s1740_s4 + $0x60] sm:$0xf] %vm965_vm0, %v1131_v27  ;;  %v1134_v35 = vpack.c.bf16 %v832_v28, %v832_v28  ;;  %v830_v36 = vadd.f32 %v798_v29, %v440_v21  ;;  %v765_v37 = vmax.f32 %v723_v30, 0.0  ;;  %v734_v38 = vadd.f32 %v1282_v20, %v1474_v45 }
 0x134   :  { %v835_v39 = vadd.f32 %v803_v32, %v445_v31  ;;  %v443_v40 = vmul.f32 %v1477_v49, %v407_v33  ;;  %v410_v41 = vmax.f32 %v376_v34, 0.0  ;;  %v368_v42 = vadd.f32 %v1474_v45, %v367_v25 }
 0x135   :  { %993 = vst.msk [vmem:[%s1740_s4 + $0x6c] sm:$0xf] %vm965_vm0, %v1134_v35  ;;  %v1132_v43 = vpack.c.bf16 %v830_v36, %v830_v36  ;;  %v801_v44 = vmul.f32 %v1480_v51, %v765_v37  ;;  %v768_v46 = vmax.f32 %v734_v38, 0.0  ;;  %v726_v47 = vadd.f32 %v1474_v45, %v725_v26 }
 0x136   :  { %v1137_v48 = vpack.c.bf16 %v835_v39, %v835_v39  ;;  %v446_v50 = vmul.f32 %v1477_v49, %v410_v41  ;;  %v408_v52 = vmax.f32 %v368_v42, 0.0 }
 0x137   :  { %991 = vst.msk [vmem:[%s1740_s4 + $0x64] sm:$0xf] %vm965_vm0, %v1132_v43  ;;  %v833_v53 = vadd.f32 %v801_v44, %v443_v40  ;;  %v804_v54 = vmul.f32 %v1480_v51, %v768_v46  ;;  %v766_v55 = vmax.f32 %v726_v47, 0.0 }
 0x138   :  { %996 = vst.msk [vmem:[%s1740_s4 + $0x78] sm:$0xf] %vm965_vm0, %v1137_v48  ;;  %v444_v45 = vmul.f32 %v1477_v49, %v408_v52 }
 0x139   :  { %v1135_v56 = vpack.c.bf16 %v833_v53, %v833_v53  ;;  %v836_v57 = vadd.f32 %v804_v54, %v446_v50  ;;  %v802_v58 = vmul.f32 %v1480_v51, %v766_v55 }
 0x13b   :  { %994 = vst.msk [vmem:[%s1740_s4 + $0x70] sm:$0xf] %vm965_vm0, %v1135_v56  ;;  %v1138_v59 = vpack.c.bf16 %v836_v57, %v836_v57  ;;  %v834_v60 = vadd.f32 %v802_v58, %v444_v45 }
 0x13d   :  { %997 = vst.msk [vmem:[%s1740_s4 + $0x7c] sm:$0xf] %vm965_vm0, %v1138_v59  ;;  %v1136_v61 = vpack.c.bf16 %v834_v60, %v834_v60 }
 0x13f   :  { %995 = vst.msk [vmem:[%s1740_s4 + $0x74] sm:$0xf] %vm965_vm0, %v1136_v61 }

// kernel: super_wide_resnet_forward.9
= control target key start
LH: loop header
LB: loop body
LE: loop exit
PB: predicated region body
PF: predicated region fallthrough
CT: control target
= control target key end

     0   :  { %vm663_vm0 = vcmask 125952   ;;  %s1334_s1 = inlined_call_operand.vmem [shape: bf16[256,16], index: 1, kind: input, shape index: {}]   ;;  %s1335_s0 = inlined_call_operand.vmem [shape: bf16[256,256], index: 0, kind: input, shape index: {}]   ;;  %s1336_s2 = inlined_call_operand.vmem [shape: f32[1,16], index: 2, kind: input, shape index: {}]   ;;  %s1337_s3 = inlined_call_operand.vmem [shape: bf16[256,16], index: 3, kind: output, shape index: {}]  }
   0x1   :  { %v941_v0 = vld [vmem:[%s1334_s1 + $0x40] sm:$0xff]   ;;  %v943_v2 = vld [vmem:[%s1334_s1 + $0x48] sm:$0xff]   ;;  %v945_v4 = vld [vmem:[%s1334_s1 + $0x50] sm:$0xff]  }
   0x2   :  { %v942_v1 = vld [vmem:[%s1334_s1] sm:$0xff]   ;;  %813 = vmatprep.subr.bf16.mxu0 %v941_v0  ;;  %925 = vmatprep.subr.bf16.mxu1 %v941_v0  ;;  %v944_v3 = vld [vmem:[%s1334_s1 + $0x8] sm:$0xff]   ;;  %v946_v5 = vld [vmem:[%s1334_s1 + $0x10] sm:$0xff]  }
   0x3   :  { %814 = vmatpush3.bf16.msra.mxu0 %v942_v1  ;;  %933 = vmatpush3.bf16.msra.mxu1 %v942_v1  ;;  %v947_v6 = vld [vmem:[%s1334_s1 + $0x58] sm:$0xff]   ;;  %v949_v8 = vld [vmem:[%s1334_s1 + $0x60] sm:$0xff]   ;;  %v951_v10 = vld [vmem:[%s1334_s1 + $0x68] sm:$0xff]  }
   0x4   :  { %815 = vmatprep.subr.bf16.mxu0 %v943_v2  ;;  %926 = vmatprep.subr.bf16.mxu1 %v943_v2  ;;  %v948_v7 = vld [vmem:[%s1334_s1 + $0x18] sm:$0xff]   ;;  %v950_v9 = vld [vmem:[%s1334_s1 + $0x20] sm:$0xff]   ;;  %v952_v13 = vld [vmem:[%s1334_s1 + $0x28] sm:$0xff]  }
   0x5   :  { %v959_v11 = vld [vmem:[%s1335_s0 + $0x4] ss:$8 sps:$4 sm:$0xff]   ;;  %v953_v14 = vld [vmem:[%s1334_s1 + $0x70] sm:$0xff]   ;;  %v955_v16 = vld [vmem:[%s1334_s1 + $0x78] sm:$0xff]  }
   0x6   :  { %v962_v12 = vld [vmem:[%s1335_s0 + $0x84] ss:$8 sps:$4 sm:$0xff]   ;;  %374 = vmatprep.mubr.bf16.mxu0 %v959_v11  ;;  %v954_v15 = vld [vmem:[%s1334_s1 + $0x30] sm:$0xff]   ;;  %v956_v17 = vld [vmem:[%s1334_s1 + $0x38] sm:$0xff]  }
   0x7   :  { %816 = vmatpush3.bf16.msra.mxu0 %v944_v3  ;;  %934 = vmatpush3.bf16.msra.mxu1 %v944_v3  ;;  %v957_v18 = vld [vmem:[%s1335_s0] ss:$8 sps:$4 sm:$0xff]   ;;  %v963_v20 = vld [vmem:[%s1335_s0 + $0x14] ss:$8 sps:$4 sm:$0xff]   ;;  %v967_v22 = vld [vmem:[%s1335_s0 + $0x10] ss:$8 sps:$4 sm:$0xff]  }
   0x8   :  { %817 = vmatprep.subr.bf16.mxu0 %v945_v4  ;;  %927 = vmatprep.subr.bf16.mxu1 %v945_v4  ;;  %v960_v19 = vld [vmem:[%s1335_s0 + $0x80] ss:$8 sps:$4 sm:$0xff]   ;;  %v965_v21 = vld [vmem:[%s1335_s0 + $0x94] ss:$8 sps:$4 sm:$0xff]   ;;  %v968_v23 = vld [vmem:[%s1335_s0 + $0x90] ss:$8 sps:$4 sm:$0xff]  }
   0x9   :  { %438 = vmatprep.mubr.bf16.mxu1 %v962_v12  ;;  %v969_v24 = vld [vmem:[%s1335_s0 + $0x24] ss:$8 sps:$4 sm:$0xff]   ;;  %v973_v26 = vld [vmem:[%s1335_s0 + $0x20] ss:$8 sps:$4 sm:$0xff]   ;;  %v975_v28 = vld [vmem:[%s1335_s0 + $0x34] ss:$8 sps:$4 sm:$0xff]  }
   0xa   :  { %v971_v25 = vld [vmem:[%s1335_s0 + $0xa4] ss:$8 sps:$4 sm:$0xff]   ;;  %v974_v27 = vld [vmem:[%s1335_s0 + $0xa0] ss:$8 sps:$4 sm:$0xff]   ;;  %v977_v29 = vld [vmem:[%s1335_s0 + $0xb4] ss:$8 sps:$4 sm:$0xff]  }
   0xb   :  { %818 = vmatpush3.bf16.msra.mxu0 %v946_v5  ;;  %935 = vmatpush3.bf16.msra.mxu1 %v946_v5  ;;  %v979_v30 = vld [vmem:[%s1335_s0 + $0x30] ss:$8 sps:$4 sm:$0xff]   ;;  %v981_v32 = vld [vmem:[%s1335_s0 + $0x44] ss:$8 sps:$4 sm:$0xff]   ;;  %v985_v34 = vld [vmem:[%s1335_s0 + $0x40] ss:$8 sps:$4 sm:$0xff]  }
   0xc   :  { %819 = vmatprep.subr.bf16.mxu0 %v947_v6  ;;  %928 = vmatprep.subr.bf16.mxu1 %v947_v6  ;;  %v980_v31 = vld [vmem:[%s1335_s0 + $0xb0] ss:$8 sps:$4 sm:$0xff]   ;;  %v983_v33 = vld [vmem:[%s1335_s0 + $0xc4] ss:$8 sps:$4 sm:$0xff]   ;;  %v986_v35 = vld [vmem:[%s1335_s0 + $0xc0] ss:$8 sps:$4 sm:$0xff]  }
   0xd   :  { %v987_v36 = vld [vmem:[%s1335_s0 + $0x54] ss:$8 sps:$4 sm:$0xff]   ;;  %v991_v38 = vld [vmem:[%s1335_s0 + $0x50] ss:$8 sps:$4 sm:$0xff]   ;;  %v993_v40 = vld [vmem:[%s1335_s0 + $0x64] ss:$8 sps:$4 sm:$0xff]  }
   0xe   :  { %v989_v37 = vld [vmem:[%s1335_s0 + $0xd4] ss:$8 sps:$4 sm:$0xff]   ;;  %v992_v39 = vld [vmem:[%s1335_s0 + $0xd0] ss:$8 sps:$4 sm:$0xff]   ;;  %v995_v41 = vld [vmem:[%s1335_s0 + $0xe4] ss:$8 sps:$4 sm:$0xff]  }
   0xf   :  { %820 = vmatpush3.bf16.msra.mxu0 %v948_v7  ;;  %936 = vmatpush3.bf16.msra.mxu1 %v948_v7  ;;  %v997_v42 = vld [vmem:[%s1335_s0 + $0x60] ss:$8 sps:$4 sm:$0xff]   ;;  %v999_v44 = vld [vmem:[%s1335_s0 + $0x74] ss:$8 sps:$4 sm:$0xff]   ;;  %v1003_v46 = vld [vmem:[%s1335_s0 + $0x70] ss:$8 sps:$4 sm:$0xff]  }
  0x10   :  { %821 = vmatprep.subr.bf16.mxu0 %v949_v8  ;;  %929 = vmatprep.subr.bf16.mxu1 %v949_v8  ;;  %v998_v43 = vld [vmem:[%s1335_s0 + $0xe0] ss:$8 sps:$4 sm:$0xff]   ;;  %v1001_v45 = vld [vmem:[%s1335_s0 + $0xf4] ss:$8 sps:$4 sm:$0xff]   ;;  %v1004_v47 = vld [vmem:[%s1335_s0 + $0xf0] ss:$8 sps:$4 sm:$0xff]  }
  0x11   :  { %v1172_v50 = vld [vmem:[%s1336_s2] ss:$0 sm:$0xff] }
  0x13   :  { %822 = vmatpush3.bf16.msra.mxu0 %v950_v9  ;;  %937 = vmatpush3.bf16.msra.mxu1 %v950_v9 }
  0x14   :  { %823 = vmatprep.subr.bf16.mxu0 %v951_v10  ;;  %930 = vmatprep.subr.bf16.mxu1 %v951_v10 }
  0x17   :  { %824 = vmatpush3.bf16.msra.mxu0 %v952_v13  ;;  %938 = vmatpush3.bf16.msra.mxu1 %v952_v13 }
  0x18   :  { %825 = vmatprep.subr.bf16.mxu0 %v953_v14  ;;  %931 = vmatprep.subr.bf16.mxu1 %v953_v14 }
  0x1b   :  { %826 = vmatpush3.bf16.msra.mxu0 %v954_v15  ;;  %939 = vmatpush3.bf16.msra.mxu1 %v954_v15 }
  0x1c   :  { %827 = vmatprep.subr.bf16.mxu0 %v955_v16  ;;  %932 = vmatprep.subr.bf16.mxu1 %v955_v16 }
  0x1f   :  { %828 = vmatpush3.bf16.msra.mxu0 %v956_v17  ;;  %940 = vmatpush3.bf16.msra.mxu1 %v956_v17 }
  0x22   :  { %375 = vmatmul.mubr.bf16.vlgmr.msra.gmra.mrb[0].mxu0 %v957_v18  ;;  %439 = vmatmul.mubr.bf16.vlgmr.msra.gmra.mrb[0].mxu1 %v960_v19 }
  0x23   :  { %382 = vmatprep.mubr.bf16.mxu0 %v963_v20  ;;  %446 = vmatprep.mubr.bf16.mxu1 %v965_v21 }
  0x2a   :  { %383 = vmatmul.mubr.bf16.gmra.mrb[4].mxu0 %v967_v22  ;;  %447 = vmatmul.mubr.bf16.gmra.mrb[4].mxu1 %v968_v23 }
  0x2b   :  { %390 = vmatprep.mubr.bf16.mxu0 %v969_v24  ;;  %454 = vmatprep.mubr.bf16.mxu1 %v971_v25 }
  0x32   :  { %391 = vmatmul.mubr.bf16.gmra.mrb[8].mxu0 %v973_v26  ;;  %455 = vmatmul.mubr.bf16.gmra.mrb[8].mxu1 %v974_v27 }
  0x33   :  { %398 = vmatprep.mubr.bf16.mxu0 %v975_v28  ;;  %462 = vmatprep.mubr.bf16.mxu1 %v977_v29 }
  0x3a   :  { %399 = vmatmul.mubr.bf16.gmra.mrb[12].mxu0 %v979_v30  ;;  %463 = vmatmul.mubr.bf16.gmra.mrb[12].mxu1 %v980_v31 }
  0x3b   :  { %406 = vmatprep.mubr.bf16.mxu0 %v981_v32  ;;  %470 = vmatprep.mubr.bf16.mxu1 %v983_v33 }
  0x42   :  { %407 = vmatmul.mubr.bf16.gmra.mrb[16].mxu0 %v985_v34  ;;  %471 = vmatmul.mubr.bf16.gmra.mrb[16].mxu1 %v986_v35 }
  0x43   :  { %414 = vmatprep.mubr.bf16.mxu0 %v987_v36  ;;  %478 = vmatprep.mubr.bf16.mxu1 %v989_v37 }
  0x4a   :  { %415 = vmatmul.mubr.bf16.gmra.mrb[20].mxu0 %v991_v38  ;;  %479 = vmatmul.mubr.bf16.gmra.mrb[20].mxu1 %v992_v39 }
  0x4b   :  { %422 = vmatprep.mubr.bf16.mxu0 %v993_v40  ;;  %486 = vmatprep.mubr.bf16.mxu1 %v995_v41 }
  0x52   :  { %423 = vmatmul.mubr.bf16.gmra.mrb[24].mxu0 %v997_v42  ;;  %487 = vmatmul.mubr.bf16.gmra.mrb[24].mxu1 %v998_v43 }
  0x53   :  { %430 = vmatprep.mubr.bf16.mxu0 %v999_v44  ;;  %494 = vmatprep.mubr.bf16.mxu1 %v1001_v45 }
  0x5a   :  { %431 = vmatmul.mubr.bf16.gmra.mrb[28].mxu0 %v1003_v46  ;;  %495 = vmatmul.mubr.bf16.gmra.mrb[28].mxu1 %v1004_v47 }
  0xf5   :  { %v829_v48 = vpop.f32.mrb[0].mxu0  ;;  %v877_v49 = vpop.f32.mrb[0].mxu1 }
  0xf6   :  { %v830_v51 = vpop.f32.mrb[1].mxu0  ;;  %v878_v52 = vpop.f32.mrb[1].mxu1 }
  0xf7   :  { %v831_v53 = vadd.f32 %v830_v51, %v829_v48  ;;  %v879_v54 = vadd.f32 %v878_v52, %v877_v49  ;;  %v832_v55 = vpop.f32.mrb[2].mxu0  ;;  %v880_v56 = vpop.f32.mrb[2].mxu1 }
  0xf8   :  { %v833_v57 = vpop.f32.mrb[3].mxu0  ;;  %v881_v58 = vpop.f32.mrb[3].mxu1 }
  0xf9   :  { %v377_v59 = vadd.f32 %v831_v53, %v1172_v50  ;;  %v441_v60 = vadd.f32 %v879_v54, %v1172_v50  ;;  %v834_v61 = vadd.f32 %v833_v57, %v832_v55  ;;  %v882_v62 = vadd.f32 %v881_v58, %v880_v56 }
  0xfb   :  { %v503_v63 = vmax.f32 %v377_v59, 0.0  ;;  %v519_v0 = vmax.f32 %v441_v60, 0.0  ;;  %v380_v1 = vadd.f32 %v834_v61, %v1172_v50  ;;  %v444_v2 = vadd.f32 %v882_v62, %v1172_v50 }
  0xfd   :  { %v781_v3 = vpack.c.bf16 %v503_v63, %v503_v63  ;;  %v797_v4 = vpack.c.bf16 %v519_v0, %v519_v0  ;;  %v504_v5 = vmax.f32 %v380_v1, 0.0  ;;  %v520_v6 = vmax.f32 %v444_v2, 0.0  ;;  %v835_v7 = vpop.f32.mrb[4].mxu0  ;;  %v883_v8 = vpop.f32.mrb[4].mxu1 }
  0xfe   :  { %v836_v9 = vpop.f32.mrb[5].mxu0  ;;  %v884_v10 = vpop.f32.mrb[5].mxu1 }
  0xff   :  { %664 = vst.msk [vmem:[%s1337_s3] sm:$0xf] %vm663_vm0, %v781_v3  ;;  %680 = vst.msk [vmem:[%s1337_s3 + $0x40] sm:$0xf] %vm663_vm0, %v797_v4  ;;  %v782_v11 = vpack.c.bf16 %v504_v5, %v504_v5  ;;  %v798_v12 = vpack.c.bf16 %v520_v6, %v520_v6  ;;  %v837_v13 = vadd.f32 %v836_v9, %v835_v7  ;;  %v838_v15 = vpop.f32.mrb[6].mxu0  ;;  %v886_v16 = vpop.f32.mrb[6].mxu1 }
 0x100   :  { %v885_v14 = vadd.f32 %v884_v10, %v883_v8  ;;  %v839_v17 = vpop.f32.mrb[7].mxu0  ;;  %v887_v18 = vpop.f32.mrb[7].mxu1 }
 0x101   :  { %665 = vst.msk [vmem:[%s1337_s3 + $0x4] sm:$0xf] %vm663_vm0, %v782_v11  ;;  %681 = vst.msk [vmem:[%s1337_s3 + $0x44] sm:$0xf] %vm663_vm0, %v798_v12  ;;  %v385_v19 = vadd.f32 %v837_v13, %v1172_v50  ;;  %v840_v21 = vadd.f32 %v839_v17, %v838_v15  ;;  %v888_v22 = vadd.f32 %v887_v18, %v886_v16 }
 0x102   :  { %v449_v20 = vadd.f32 %v885_v14, %v1172_v50 }
 0x103   :  { %v505_v23 = vmax.f32 %v385_v19, 0.0  ;;  %v388_v25 = vadd.f32 %v840_v21, %v1172_v50  ;;  %v452_v26 = vadd.f32 %v888_v22, %v1172_v50 }
 0x104   :  { %v521_v24 = vmax.f32 %v449_v20, 0.0 }
 0x105   :  { %v783_v27 = vpack.c.bf16 %v505_v23, %v505_v23  ;;  %v506_v29 = vmax.f32 %v388_v25, 0.0  ;;  %v522_v30 = vmax.f32 %v452_v26, 0.0  ;;  %v841_v31 = vpop.f32.mrb[8].mxu0  ;;  %v889_v32 = vpop.f32.mrb[8].mxu1 }
 0x106   :  { %v799_v28 = vpack.c.bf16 %v521_v24, %v521_v24  ;;  %v842_v33 = vpop.f32.mrb[9].mxu0  ;;  %v890_v34 = vpop.f32.mrb[9].mxu1 }
 0x107   :  { %666 = vst.msk [vmem:[%s1337_s3 + $0x8] sm:$0xf] %vm663_vm0, %v783_v27  ;;  %v784_v35 = vpack.c.bf16 %v506_v29, %v506_v29  ;;  %v800_v36 = vpack.c.bf16 %v522_v30, %v522_v30  ;;  %v843_v37 = vadd.f32 %v842_v33, %v841_v31  ;;  %v891_v38 = vadd.f32 %v890_v34, %v889_v32  ;;  %v844_v39 = vpop.f32.mrb[10].mxu0  ;;  %v892_v40 = vpop.f32.mrb[10].mxu1 }
 0x108   :  { %682 = vst.msk [vmem:[%s1337_s3 + $0x48] sm:$0xf] %vm663_vm0, %v799_v28  ;;  %v845_v41 = vpop.f32.mrb[11].mxu0  ;;  %v893_v42 = vpop.f32.mrb[11].mxu1 }
 0x109   :  { %667 = vst.msk [vmem:[%s1337_s3 + $0xc] sm:$0xf] %vm663_vm0, %v784_v35  ;;  %683 = vst.msk [vmem:[%s1337_s3 + $0x4c] sm:$0xf] %vm663_vm0, %v800_v36  ;;  %v393_v43 = vadd.f32 %v843_v37, %v1172_v50  ;;  %v457_v44 = vadd.f32 %v891_v38, %v1172_v50  ;;  %v846_v45 = vadd.f32 %v845_v41, %v844_v39 }
 0x10a   :  { %v894_v46 = vadd.f32 %v893_v42, %v892_v40 }
 0x10b   :  { %v507_v47 = vmax.f32 %v393_v43, 0.0  ;;  %v523_v48 = vmax.f32 %v457_v44, 0.0  ;;  %v396_v49 = vadd.f32 %v846_v45, %v1172_v50 }
 0x10c   :  { %v460_v51 = vadd.f32 %v894_v46, %v1172_v50 }
 0x10d   :  { %v785_v52 = vpack.c.bf16 %v507_v47, %v507_v47  ;;  %v801_v53 = vpack.c.bf16 %v523_v48, %v523_v48  ;;  %v508_v54 = vmax.f32 %v396_v49, 0.0  ;;  %v847_v56 = vpop.f32.mrb[12].mxu0  ;;  %v895_v57 = vpop.f32.mrb[12].mxu1 }
 0x10e   :  { %v524_v55 = vmax.f32 %v460_v51, 0.0  ;;  %v848_v58 = vpop.f32.mrb[13].mxu0  ;;  %v896_v59 = vpop.f32.mrb[13].mxu1 }
 0x10f   :  { %668 = vst.msk [vmem:[%s1337_s3 + $0x10] sm:$0xf] %vm663_vm0, %v785_v52  ;;  %684 = vst.msk [vmem:[%s1337_s3 + $0x50] sm:$0xf] %vm663_vm0, %v801_v53  ;;  %v786_v60 = vpack.c.bf16 %v508_v54, %v508_v54  ;;  %v849_v62 = vadd.f32 %v848_v58, %v847_v56  ;;  %v897_v63 = vadd.f32 %v896_v59, %v895_v57  ;;  %v850_v0 = vpop.f32.mrb[14].mxu0  ;;  %v898_v1 = vpop.f32.mrb[14].mxu1 }
 0x110   :  { %v802_v61 = vpack.c.bf16 %v524_v55, %v524_v55  ;;  %v851_v2 = vpop.f32.mrb[15].mxu0  ;;  %v899_v3 = vpop.f32.mrb[15].mxu1 }
 0x111   :  { %669 = vst.msk [vmem:[%s1337_s3 + $0x14] sm:$0xf] %vm663_vm0, %v786_v60  ;;  %v401_v4 = vadd.f32 %v849_v62, %v1172_v50  ;;  %v465_v5 = vadd.f32 %v897_v63, %v1172_v50  ;;  %v852_v6 = vadd.f32 %v851_v2, %v850_v0  ;;  %v900_v7 = vadd.f32 %v899_v3, %v898_v1 }
 0x112   :  { %685 = vst.msk [vmem:[%s1337_s3 + $0x54] sm:$0xf] %vm663_vm0, %v802_v61 }
 0x113   :  { %v509_v8 = vmax.f32 %v401_v4, 0.0  ;;  %v525_v9 = vmax.f32 %v465_v5, 0.0  ;;  %v404_v10 = vadd.f32 %v852_v6, %v1172_v50  ;;  %v468_v11 = vadd.f32 %v900_v7, %v1172_v50 }
 0x115   :  { %v787_v12 = vpack.c.bf16 %v509_v8, %v509_v8  ;;  %v803_v13 = vpack.c.bf16 %v525_v9, %v525_v9  ;;  %v510_v14 = vmax.f32 %v404_v10, 0.0  ;;  %v526_v15 = vmax.f32 %v468_v11, 0.0  ;;  %v853_v16 = vpop.f32.mrb[16].mxu0  ;;  %v901_v17 = vpop.f32.mrb[16].mxu1 }
 0x116   :  { %v854_v18 = vpop.f32.mrb[17].mxu0  ;;  %v902_v19 = vpop.f32.mrb[17].mxu1 }
 0x117   :  { %670 = vst.msk [vmem:[%s1337_s3 + $0x18] sm:$0xf] %vm663_vm0, %v787_v12  ;;  %686 = vst.msk [vmem:[%s1337_s3 + $0x58] sm:$0xf] %vm663_vm0, %v803_v13  ;;  %v788_v20 = vpack.c.bf16 %v510_v14, %v510_v14  ;;  %v804_v21 = vpack.c.bf16 %v526_v15, %v526_v15  ;;  %v855_v22 = vadd.f32 %v854_v18, %v853_v16  ;;  %v856_v24 = vpop.f32.mrb[18].mxu0  ;;  %v904_v25 = vpop.f32.mrb[18].mxu1 }
 0x118   :  { %v903_v23 = vadd.f32 %v902_v19, %v901_v17  ;;  %v857_v26 = vpop.f32.mrb[19].mxu0  ;;  %v905_v27 = vpop.f32.mrb[19].mxu1 }
 0x119   :  { %671 = vst.msk [vmem:[%s1337_s3 + $0x1c] sm:$0xf] %vm663_vm0, %v788_v20  ;;  %687 = vst.msk [vmem:[%s1337_s3 + $0x5c] sm:$0xf] %vm663_vm0, %v804_v21  ;;  %v409_v28 = vadd.f32 %v855_v22, %v1172_v50  ;;  %v858_v30 = vadd.f32 %v857_v26, %v856_v24  ;;  %v906_v31 = vadd.f32 %v905_v27, %v904_v25 }
 0x11a   :  { %v473_v29 = vadd.f32 %v903_v23, %v1172_v50 }
 0x11b   :  { %v511_v32 = vmax.f32 %v409_v28, 0.0  ;;  %v412_v34 = vadd.f32 %v858_v30, %v1172_v50  ;;  %v476_v35 = vadd.f32 %v906_v31, %v1172_v50 }
 0x11c   :  { %v527_v33 = vmax.f32 %v473_v29, 0.0 }
 0x11d   :  { %v789_v36 = vpack.c.bf16 %v511_v32, %v511_v32  ;;  %v512_v38 = vmax.f32 %v412_v34, 0.0  ;;  %v528_v39 = vmax.f32 %v476_v35, 0.0  ;;  %v859_v40 = vpop.f32.mrb[20].mxu0  ;;  %v907_v41 = vpop.f32.mrb[20].mxu1 }
 0x11e   :  { %v805_v37 = vpack.c.bf16 %v527_v33, %v527_v33  ;;  %v860_v42 = vpop.f32.mrb[21].mxu0  ;;  %v908_v43 = vpop.f32.mrb[21].mxu1 }
 0x11f   :  { %672 = vst.msk [vmem:[%s1337_s3 + $0x20] sm:$0xf] %vm663_vm0, %v789_v36  ;;  %v790_v44 = vpack.c.bf16 %v512_v38, %v512_v38  ;;  %v806_v45 = vpack.c.bf16 %v528_v39, %v528_v39  ;;  %v861_v46 = vadd.f32 %v860_v42, %v859_v40  ;;  %v909_v47 = vadd.f32 %v908_v43, %v907_v41  ;;  %v862_v48 = vpop.f32.mrb[22].mxu0  ;;  %v910_v49 = vpop.f32.mrb[22].mxu1 }
 0x120   :  { %688 = vst.msk [vmem:[%s1337_s3 + $0x60] sm:$0xf] %vm663_vm0, %v805_v37  ;;  %v863_v51 = vpop.f32.mrb[23].mxu0  ;;  %v911_v52 = vpop.f32.mrb[23].mxu1 }
 0x121   :  { %673 = vst.msk [vmem:[%s1337_s3 + $0x24] sm:$0xf] %vm663_vm0, %v790_v44  ;;  %689 = vst.msk [vmem:[%s1337_s3 + $0x64] sm:$0xf] %vm663_vm0, %v806_v45  ;;  %v417_v53 = vadd.f32 %v861_v46, %v1172_v50  ;;  %v481_v54 = vadd.f32 %v909_v47, %v1172_v50  ;;  %v864_v55 = vadd.f32 %v863_v51, %v862_v48 }
 0x122   :  { %v912_v56 = vadd.f32 %v911_v52, %v910_v49 }
 0x123   :  { %v513_v57 = vmax.f32 %v417_v53, 0.0  ;;  %v529_v58 = vmax.f32 %v481_v54, 0.0  ;;  %v420_v59 = vadd.f32 %v864_v55, %v1172_v50 }
 0x124   :  { %v484_v60 = vadd.f32 %v912_v56, %v1172_v50 }
 0x125   :  { %v791_v61 = vpack.c.bf16 %v513_v57, %v513_v57  ;;  %v807_v62 = vpack.c.bf16 %v529_v58, %v529_v58  ;;  %v514_v63 = vmax.f32 %v420_v59, 0.0  ;;  %v865_v1 = vpop.f32.mrb[24].mxu0  ;;  %v913_v2 = vpop.f32.mrb[24].mxu1 }
 0x126   :  { %v530_v0 = vmax.f32 %v484_v60, 0.0  ;;  %v866_v3 = vpop.f32.mrb[25].mxu0  ;;  %v914_v4 = vpop.f32.mrb[25].mxu1 }
 0x127   :  { %674 = vst.msk [vmem:[%s1337_s3 + $0x28] sm:$0xf] %vm663_vm0, %v791_v61  ;;  %690 = vst.msk [vmem:[%s1337_s3 + $0x68] sm:$0xf] %vm663_vm0, %v807_v62  ;;  %v792_v5 = vpack.c.bf16 %v514_v63, %v514_v63  ;;  %v867_v7 = vadd.f32 %v866_v3, %v865_v1  ;;  %v915_v8 = vadd.f32 %v914_v4, %v913_v2  ;;  %v868_v9 = vpop.f32.mrb[26].mxu0  ;;  %v916_v10 = vpop.f32.mrb[26].mxu1 }
 0x128   :  { %v808_v6 = vpack.c.bf16 %v530_v0, %v530_v0  ;;  %v869_v11 = vpop.f32.mrb[27].mxu0  ;;  %v917_v12 = vpop.f32.mrb[27].mxu1 }
 0x129   :  { %675 = vst.msk [vmem:[%s1337_s3 + $0x2c] sm:$0xf] %vm663_vm0, %v792_v5  ;;  %v425_v13 = vadd.f32 %v867_v7, %v1172_v50  ;;  %v489_v14 = vadd.f32 %v915_v8, %v1172_v50  ;;  %v870_v15 = vadd.f32 %v869_v11, %v868_v9  ;;  %v918_v16 = vadd.f32 %v917_v12, %v916_v10 }
 0x12a   :  { %691 = vst.msk [vmem:[%s1337_s3 + $0x6c] sm:$0xf] %vm663_vm0, %v808_v6 }
 0x12b   :  { %v515_v17 = vmax.f32 %v425_v13, 0.0  ;;  %v531_v18 = vmax.f32 %v489_v14, 0.0  ;;  %v428_v19 = vadd.f32 %v870_v15, %v1172_v50  ;;  %v492_v20 = vadd.f32 %v918_v16, %v1172_v50 }
 0x12d   :  { %v793_v21 = vpack.c.bf16 %v515_v17, %v515_v17  ;;  %v809_v22 = vpack.c.bf16 %v531_v18, %v531_v18  ;;  %v516_v23 = vmax.f32 %v428_v19, 0.0  ;;  %v532_v24 = vmax.f32 %v492_v20, 0.0  ;;  %v871_v25 = vpop.f32.mrb[28].mxu0  ;;  %v919_v26 = vpop.f32.mrb[28].mxu1 }
 0x12e   :  { %v872_v27 = vpop.f32.mrb[29].mxu0  ;;  %v920_v28 = vpop.f32.mrb[29].mxu1 }
 0x12f   :  { %676 = vst.msk [vmem:[%s1337_s3 + $0x30] sm:$0xf] %vm663_vm0, %v793_v21  ;;  %692 = vst.msk [vmem:[%s1337_s3 + $0x70] sm:$0xf] %vm663_vm0, %v809_v22  ;;  %v794_v29 = vpack.c.bf16 %v516_v23, %v516_v23  ;;  %v810_v30 = vpack.c.bf16 %v532_v24, %v532_v24  ;;  %v873_v31 = vadd.f32 %v872_v27, %v871_v25  ;;  %v874_v33 = vpop.f32.mrb[30].mxu0  ;;  %v922_v34 = vpop.f32.mrb[30].mxu1 }
 0x130   :  { %v921_v32 = vadd.f32 %v920_v28, %v919_v26  ;;  %v875_v35 = vpop.f32.mrb[31].mxu0  ;;  %v923_v36 = vpop.f32.mrb[31].mxu1 }
 0x131   :  { %677 = vst.msk [vmem:[%s1337_s3 + $0x34] sm:$0xf] %vm663_vm0, %v794_v29  ;;  %693 = vst.msk [vmem:[%s1337_s3 + $0x74] sm:$0xf] %vm663_vm0, %v810_v30  ;;  %v433_v37 = vadd.f32 %v873_v31, %v1172_v50  ;;  %v876_v39 = vadd.f32 %v875_v35, %v874_v33  ;;  %v924_v40 = vadd.f32 %v923_v36, %v922_v34 }
 0x132   :  { %v497_v38 = vadd.f32 %v921_v32, %v1172_v50 }
 0x133   :  { %v517_v41 = vmax.f32 %v433_v37, 0.0  ;;  %v436_v43 = vadd.f32 %v876_v39, %v1172_v50  ;;  %v500_v44 = vadd.f32 %v924_v40, %v1172_v50 }
 0x134   :  { %v533_v42 = vmax.f32 %v497_v38, 0.0 }
 0x135   :  { %v795_v45 = vpack.c.bf16 %v517_v41, %v517_v41  ;;  %v518_v47 = vmax.f32 %v436_v43, 0.0  ;;  %v534_v48 = vmax.f32 %v500_v44, 0.0 }
 0x136   :  { %v811_v46 = vpack.c.bf16 %v533_v42, %v533_v42 }
 0x137   :  { %678 = vst.msk [vmem:[%s1337_s3 + $0x38] sm:$0xf] %vm663_vm0, %v795_v45  ;;  %v796_v49 = vpack.c.bf16 %v518_v47, %v518_v47  ;;  %v812_v51 = vpack.c.bf16 %v534_v48, %v534_v48 }
 0x138   :  { %694 = vst.msk [vmem:[%s1337_s3 + $0x78] sm:$0xf] %vm663_vm0, %v811_v46 }
 0x139   :  { %679 = vst.msk [vmem:[%s1337_s3 + $0x3c] sm:$0xf] %vm663_vm0, %v796_v49  ;;  %695 = vst.msk [vmem:[%s1337_s3 + $0x7c] sm:$0xf] %vm663_vm0, %v812_v51 }

// kernel: super_wide_resnet_forward.10
= control target key start
LH: loop header
LB: loop body
LE: loop exit
PB: predicated region body
PF: predicated region fallthrough
CT: control target
= control target key end

     0   :  { %vm688_vm0 = vcmask 125952   ;;  %s1448_s1 = inlined_call_operand.vmem [shape: bf16[256,16], index: 1, kind: input, shape index: {}]   ;;  %s1449_s0 = inlined_call_operand.vmem [shape: bf16[256,256], index: 0, kind: input, shape index: {}]   ;;  %s1450_s2 = inlined_call_operand.vmem [shape: bf16[256,16], index: 2, kind: input, shape index: {}]   ;;  %s1451_s3 = inlined_call_operand.vmem [shape: bf16[256,16], index: 3, kind: output, shape index: {}]  }
   0x1   :  { %v1044_v0 = vld [vmem:[%s1448_s1 + $0x40] sm:$0xff]   ;;  %v1046_v2 = vld [vmem:[%s1448_s1 + $0x48] sm:$0xff]   ;;  %v1048_v4 = vld [vmem:[%s1448_s1 + $0x50] sm:$0xff]  }
   0x2   :  { %v1045_v1 = vld [vmem:[%s1448_s1] sm:$0xff]   ;;  %916 = vmatprep.subr.bf16.mxu0 %v1044_v0  ;;  %1028 = vmatprep.subr.bf16.mxu1 %v1044_v0  ;;  %v1047_v3 = vld [vmem:[%s1448_s1 + $0x8] sm:$0xff]   ;;  %v1049_v5 = vld [vmem:[%s1448_s1 + $0x10] sm:$0xff]  }
   0x3   :  { %917 = vmatpush3.bf16.msra.mxu0 %v1045_v1  ;;  %1036 = vmatpush3.bf16.msra.mxu1 %v1045_v1  ;;  %v1050_v6 = vld [vmem:[%s1448_s1 + $0x58] sm:$0xff]   ;;  %v1052_v8 = vld [vmem:[%s1448_s1 + $0x60] sm:$0xff]   ;;  %v1054_v10 = vld [vmem:[%s1448_s1 + $0x68] sm:$0xff]  }
   0x4   :  { %918 = vmatprep.subr.bf16.mxu0 %v1046_v2  ;;  %1029 = vmatprep.subr.bf16.mxu1 %v1046_v2  ;;  %v1051_v7 = vld [vmem:[%s1448_s1 + $0x18] sm:$0xff]   ;;  %v1053_v9 = vld [vmem:[%s1448_s1 + $0x20] sm:$0xff]   ;;  %v1055_v13 = vld [vmem:[%s1448_s1 + $0x28] sm:$0xff]  }
   0x5   :  { %v1062_v11 = vld [vmem:[%s1449_s0 + $0x4] ss:$8 sps:$4 sm:$0xff]   ;;  %v1056_v14 = vld [vmem:[%s1448_s1 + $0x70] sm:$0xff]   ;;  %v1058_v16 = vld [vmem:[%s1448_s1 + $0x78] sm:$0xff]  }
   0x6   :  { %v1065_v12 = vld [vmem:[%s1449_s0 + $0x84] ss:$8 sps:$4 sm:$0xff]   ;;  %431 = vmatprep.mubr.bf16.mxu0 %v1062_v11  ;;  %v1057_v15 = vld [vmem:[%s1448_s1 + $0x30] sm:$0xff]   ;;  %v1059_v17 = vld [vmem:[%s1448_s1 + $0x38] sm:$0xff]  }
   0x7   :  { %919 = vmatpush3.bf16.msra.mxu0 %v1047_v3  ;;  %1037 = vmatpush3.bf16.msra.mxu1 %v1047_v3  ;;  %v1060_v18 = vld [vmem:[%s1449_s0] ss:$8 sps:$4 sm:$0xff]   ;;  %v1066_v20 = vld [vmem:[%s1449_s0 + $0x14] ss:$8 sps:$4 sm:$0xff]   ;;  %v1070_v22 = vld [vmem:[%s1449_s0 + $0x10] ss:$8 sps:$4 sm:$0xff]  }
   0x8   :  { %920 = vmatprep.subr.bf16.mxu0 %v1048_v4  ;;  %1030 = vmatprep.subr.bf16.mxu1 %v1048_v4  ;;  %v1063_v19 = vld [vmem:[%s1449_s0 + $0x80] ss:$8 sps:$4 sm:$0xff]   ;;  %v1068_v21 = vld [vmem:[%s1449_s0 + $0x94] ss:$8 sps:$4 sm:$0xff]   ;;  %v1071_v23 = vld [vmem:[%s1449_s0 + $0x90] ss:$8 sps:$4 sm:$0xff]  }
   0x9   :  { %495 = vmatprep.mubr.bf16.mxu1 %v1065_v12  ;;  %v1072_v24 = vld [vmem:[%s1449_s0 + $0x24] ss:$8 sps:$4 sm:$0xff]   ;;  %v1076_v26 = vld [vmem:[%s1449_s0 + $0x20] ss:$8 sps:$4 sm:$0xff]   ;;  %v1078_v28 = vld [vmem:[%s1449_s0 + $0x34] ss:$8 sps:$4 sm:$0xff]  }
   0xa   :  { %v1074_v25 = vld [vmem:[%s1449_s0 + $0xa4] ss:$8 sps:$4 sm:$0xff]   ;;  %v1077_v27 = vld [vmem:[%s1449_s0 + $0xa0] ss:$8 sps:$4 sm:$0xff]   ;;  %v1080_v29 = vld [vmem:[%s1449_s0 + $0xb4] ss:$8 sps:$4 sm:$0xff]  }
   0xb   :  { %921 = vmatpush3.bf16.msra.mxu0 %v1049_v5  ;;  %1038 = vmatpush3.bf16.msra.mxu1 %v1049_v5  ;;  %v1082_v30 = vld [vmem:[%s1449_s0 + $0x30] ss:$8 sps:$4 sm:$0xff]   ;;  %v1084_v32 = vld [vmem:[%s1449_s0 + $0x44] ss:$8 sps:$4 sm:$0xff]   ;;  %v1088_v34 = vld [vmem:[%s1449_s0 + $0x40] ss:$8 sps:$4 sm:$0xff]  }
   0xc   :  { %922 = vmatprep.subr.bf16.mxu0 %v1050_v6  ;;  %1031 = vmatprep.subr.bf16.mxu1 %v1050_v6  ;;  %v1083_v31 = vld [vmem:[%s1449_s0 + $0xb0] ss:$8 sps:$4 sm:$0xff]   ;;  %v1086_v33 = vld [vmem:[%s1449_s0 + $0xc4] ss:$8 sps:$4 sm:$0xff]   ;;  %v1089_v35 = vld [vmem:[%s1449_s0 + $0xc0] ss:$8 sps:$4 sm:$0xff]  }
   0xd   :  { %v1090_v36 = vld [vmem:[%s1449_s0 + $0x54] ss:$8 sps:$4 sm:$0xff]   ;;  %v1094_v38 = vld [vmem:[%s1449_s0 + $0x50] ss:$8 sps:$4 sm:$0xff]   ;;  %v1096_v40 = vld [vmem:[%s1449_s0 + $0x64] ss:$8 sps:$4 sm:$0xff]  }
   0xe   :  { %v1092_v37 = vld [vmem:[%s1449_s0 + $0xd4] ss:$8 sps:$4 sm:$0xff]   ;;  %v1095_v39 = vld [vmem:[%s1449_s0 + $0xd0] ss:$8 sps:$4 sm:$0xff]   ;;  %v1098_v41 = vld [vmem:[%s1449_s0 + $0xe4] ss:$8 sps:$4 sm:$0xff]  }
   0xf   :  { %923 = vmatpush3.bf16.msra.mxu0 %v1051_v7  ;;  %1039 = vmatpush3.bf16.msra.mxu1 %v1051_v7  ;;  %v1100_v42 = vld [vmem:[%s1449_s0 + $0x60] ss:$8 sps:$4 sm:$0xff]   ;;  %v1102_v44 = vld [vmem:[%s1449_s0 + $0x74] ss:$8 sps:$4 sm:$0xff]   ;;  %v1106_v46 = vld [vmem:[%s1449_s0 + $0x70] ss:$8 sps:$4 sm:$0xff]  }
  0x10   :  { %924 = vmatprep.subr.bf16.mxu0 %v1052_v8  ;;  %1032 = vmatprep.subr.bf16.mxu1 %v1052_v8  ;;  %v1101_v43 = vld [vmem:[%s1449_s0 + $0xe0] ss:$8 sps:$4 sm:$0xff]   ;;  %v1104_v45 = vld [vmem:[%s1449_s0 + $0xf4] ss:$8 sps:$4 sm:$0xff]   ;;  %v1107_v47 = vld [vmem:[%s1449_s0 + $0xf0] ss:$8 sps:$4 sm:$0xff]  }
  0x11   :  { %v838_v48 = vld [vmem:[%s1450_s2] sm:$0xff]   ;;  %v901_v4 = vld [vmem:[%s1450_s2 + $0x8] sm:$0xff]  }
  0x12   :  { %v908_v49 = vld [vmem:[%s1450_s2 + $0x40] sm:$0xff]   ;;  %v839_v52 = vunpack.c.l.bf16 %v838_v48  ;;  %v840_v60 = vunpack.c.h.bf16 %v838_v48  ;;  %v909_v5 = vld [vmem:[%s1450_s2 + $0x48] sm:$0xff]  }
  0x13   :  { %925 = vmatpush3.bf16.msra.mxu0 %v1053_v9  ;;  %1040 = vmatpush3.bf16.msra.mxu1 %v1053_v9  ;;  %v871_v53 = vunpack.c.l.bf16 %v908_v49  ;;  %v872_v61 = vunpack.c.h.bf16 %v908_v49 }
  0x14   :  { %926 = vmatprep.subr.bf16.mxu0 %v1054_v10  ;;  %1033 = vmatprep.subr.bf16.mxu1 %v1054_v10 }
  0x17   :  { %927 = vmatpush3.bf16.msra.mxu0 %v1055_v13  ;;  %1041 = vmatpush3.bf16.msra.mxu1 %v1055_v13 }
  0x18   :  { %928 = vmatprep.subr.bf16.mxu0 %v1056_v14  ;;  %1034 = vmatprep.subr.bf16.mxu1 %v1056_v14  ;;  %v843_v14 = vunpack.c.l.bf16 %v901_v4 }
  0x1b   :  { %929 = vmatpush3.bf16.msra.mxu0 %v1057_v15  ;;  %1042 = vmatpush3.bf16.msra.mxu1 %v1057_v15  ;;  %v875_v15 = vunpack.c.l.bf16 %v909_v5 }
  0x1c   :  { %930 = vmatprep.subr.bf16.mxu0 %v1058_v16  ;;  %1035 = vmatprep.subr.bf16.mxu1 %v1058_v16 }
  0x1f   :  { %931 = vmatpush3.bf16.msra.mxu0 %v1059_v17  ;;  %1043 = vmatpush3.bf16.msra.mxu1 %v1059_v17 }
  0x22   :  { %432 = vmatmul.mubr.bf16.vlgmr.msra.gmra.mrb[0].mxu0 %v1060_v18  ;;  %496 = vmatmul.mubr.bf16.vlgmr.msra.gmra.mrb[0].mxu1 %v1063_v19 }
  0x23   :  { %439 = vmatprep.mubr.bf16.mxu0 %v1066_v20  ;;  %503 = vmatprep.mubr.bf16.mxu1 %v1068_v21 }
  0x2a   :  { %440 = vmatmul.mubr.bf16.gmra.mrb[4].mxu0 %v1070_v22  ;;  %504 = vmatmul.mubr.bf16.gmra.mrb[4].mxu1 %v1071_v23  ;;  %v844_v22 = vunpack.c.h.bf16 %v901_v4  ;;  %v876_v23 = vunpack.c.h.bf16 %v909_v5 }
  0x2b   :  { %447 = vmatprep.mubr.bf16.mxu0 %v1072_v24  ;;  %511 = vmatprep.mubr.bf16.mxu1 %v1074_v25 }
  0x32   :  { %448 = vmatmul.mubr.bf16.gmra.mrb[8].mxu0 %v1076_v26  ;;  %512 = vmatmul.mubr.bf16.gmra.mrb[8].mxu1 %v1077_v27 }
  0x33   :  { %455 = vmatprep.mubr.bf16.mxu0 %v1078_v28  ;;  %519 = vmatprep.mubr.bf16.mxu1 %v1080_v29 }
  0x3a   :  { %456 = vmatmul.mubr.bf16.gmra.mrb[12].mxu0 %v1082_v30  ;;  %520 = vmatmul.mubr.bf16.gmra.mrb[12].mxu1 %v1083_v31  ;;  %v902_v30 = vld [vmem:[%s1450_s2 + $0x10] sm:$0xff]  }
  0x3b   :  { %463 = vmatprep.mubr.bf16.mxu0 %v1084_v32  ;;  %527 = vmatprep.mubr.bf16.mxu1 %v1086_v33  ;;  %v910_v31 = vld [vmem:[%s1450_s2 + $0x50] sm:$0xff]   ;;  %v848_v48 = vunpack.c.h.bf16 %v902_v30 }
  0x3c   :  { %v880_v49 = vunpack.c.h.bf16 %v910_v31 }
  0x42   :  { %464 = vmatmul.mubr.bf16.gmra.mrb[16].mxu0 %v1088_v34  ;;  %528 = vmatmul.mubr.bf16.gmra.mrb[16].mxu1 %v1089_v35 }
  0x43   :  { %471 = vmatprep.mubr.bf16.mxu0 %v1090_v36  ;;  %535 = vmatprep.mubr.bf16.mxu1 %v1092_v37 }
  0x4a   :  { %472 = vmatmul.mubr.bf16.gmra.mrb[20].mxu0 %v1094_v38  ;;  %536 = vmatmul.mubr.bf16.gmra.mrb[20].mxu1 %v1095_v39 }
  0x4b   :  { %479 = vmatprep.mubr.bf16.mxu0 %v1096_v40  ;;  %543 = vmatprep.mubr.bf16.mxu1 %v1098_v41  ;;  %v847_v40 = vunpack.c.l.bf16 %v902_v30  ;;  %v879_v41 = vunpack.c.l.bf16 %v910_v31 }
  0x52   :  { %480 = vmatmul.mubr.bf16.gmra.mrb[24].mxu0 %v1100_v42  ;;  %544 = vmatmul.mubr.bf16.gmra.mrb[24].mxu1 %v1101_v43 }
  0x53   :  { %487 = vmatprep.mubr.bf16.mxu0 %v1102_v44  ;;  %551 = vmatprep.mubr.bf16.mxu1 %v1104_v45 }
  0x5a   :  { %488 = vmatmul.mubr.bf16.gmra.mrb[28].mxu0 %v1106_v46  ;;  %552 = vmatmul.mubr.bf16.gmra.mrb[28].mxu1 %v1107_v47 }
  0xf5   :  { %v932_v50 = vpop.f32.mrb[0].mxu0  ;;  %v980_v51 = vpop.f32.mrb[0].mxu1 }
  0xf6   :  { %v933_v54 = vpop.f32.mrb[1].mxu0  ;;  %v981_v55 = vpop.f32.mrb[1].mxu1 }
  0xf7   :  { %v934_v56 = vadd.f32 %v933_v54, %v932_v50  ;;  %v982_v57 = vadd.f32 %v981_v55, %v980_v51  ;;  %v935_v58 = vpop.f32.mrb[2].mxu0  ;;  %v983_v59 = vpop.f32.mrb[2].mxu1 }
  0xf8   :  { %v936_v62 = vpop.f32.mrb[3].mxu0  ;;  %v984_v63 = vpop.f32.mrb[3].mxu1 }
  0xf9   :  { %v434_v0 = vadd.f32 %v934_v56, %v839_v52  ;;  %v498_v1 = vadd.f32 %v982_v57, %v871_v53  ;;  %v937_v2 = vadd.f32 %v936_v62, %v935_v58  ;;  %v985_v3 = vadd.f32 %v984_v63, %v983_v59  ;;  %v903_v56 = vld [vmem:[%s1450_s2 + $0x18] sm:$0xff]  }
  0xfa   :  { %v911_v57 = vld [vmem:[%s1450_s2 + $0x58] sm:$0xff]  }
  0xfb   :  { %v805_v6 = vpack.c.bf16 %v434_v0, %v434_v0  ;;  %v821_v7 = vpack.c.bf16 %v498_v1, %v498_v1  ;;  %v437_v8 = vadd.f32 %v937_v2, %v840_v60  ;;  %v501_v9 = vadd.f32 %v985_v3, %v872_v61 }
  0xfc   :  { %v851_v2 = vunpack.c.l.bf16 %v903_v56  ;;  %v883_v3 = vunpack.c.l.bf16 %v911_v57 }
  0xfd   :  { %689 = vst.msk [vmem:[%s1451_s3] sm:$0xf] %vm688_vm0, %v805_v6  ;;  %705 = vst.msk [vmem:[%s1451_s3 + $0x40] sm:$0xf] %vm688_vm0, %v821_v7  ;;  %v806_v10 = vpack.c.bf16 %v437_v8, %v437_v8  ;;  %v822_v11 = vpack.c.bf16 %v501_v9, %v501_v9  ;;  %v938_v12 = vpop.f32.mrb[4].mxu0  ;;  %v986_v13 = vpop.f32.mrb[4].mxu1 }
  0xfe   :  { %v939_v16 = vpop.f32.mrb[5].mxu0  ;;  %v987_v17 = vpop.f32.mrb[5].mxu1 }
  0xff   :  { %690 = vst.msk [vmem:[%s1451_s3 + $0x4] sm:$0xf] %vm688_vm0, %v806_v10  ;;  %706 = vst.msk [vmem:[%s1451_s3 + $0x44] sm:$0xf] %vm688_vm0, %v822_v11  ;;  %v940_v18 = vadd.f32 %v939_v16, %v938_v12  ;;  %v988_v19 = vadd.f32 %v987_v17, %v986_v13  ;;  %v941_v20 = vpop.f32.mrb[6].mxu0  ;;  %v989_v21 = vpop.f32.mrb[6].mxu1  ;;  %v852_v10 = vunpack.c.h.bf16 %v903_v56  ;;  %v884_v11 = vunpack.c.h.bf16 %v911_v57 }
 0x100   :  { %v942_v24 = vpop.f32.mrb[7].mxu0  ;;  %v990_v25 = vpop.f32.mrb[7].mxu1 }
 0x101   :  { %v442_v26 = vadd.f32 %v940_v18, %v843_v14  ;;  %v506_v27 = vadd.f32 %v988_v19, %v875_v15  ;;  %v943_v28 = vadd.f32 %v942_v24, %v941_v20  ;;  %v991_v29 = vadd.f32 %v990_v25, %v989_v21  ;;  %v904_v18 = vld [vmem:[%s1450_s2 + $0x20] sm:$0xff]  }
 0x102   :  { %v912_v19 = vld [vmem:[%s1450_s2 + $0x60] sm:$0xff]  }
 0x103   :  { %v807_v32 = vpack.c.bf16 %v442_v26, %v442_v26  ;;  %v823_v33 = vpack.c.bf16 %v506_v27, %v506_v27  ;;  %v445_v34 = vadd.f32 %v943_v28, %v844_v22  ;;  %v509_v35 = vadd.f32 %v991_v29, %v876_v23 }
 0x104   :  { %v855_v28 = vunpack.c.l.bf16 %v904_v18  ;;  %v887_v29 = vunpack.c.l.bf16 %v912_v19 }
 0x105   :  { %691 = vst.msk [vmem:[%s1451_s3 + $0x8] sm:$0xf] %vm688_vm0, %v807_v32  ;;  %707 = vst.msk [vmem:[%s1451_s3 + $0x48] sm:$0xf] %vm688_vm0, %v823_v33  ;;  %v808_v36 = vpack.c.bf16 %v445_v34, %v445_v34  ;;  %v824_v37 = vpack.c.bf16 %v509_v35, %v509_v35  ;;  %v944_v38 = vpop.f32.mrb[8].mxu0  ;;  %v992_v39 = vpop.f32.mrb[8].mxu1 }
 0x106   :  { %v945_v42 = vpop.f32.mrb[9].mxu0  ;;  %v993_v43 = vpop.f32.mrb[9].mxu1 }
 0x107   :  { %692 = vst.msk [vmem:[%s1451_s3 + $0xc] sm:$0xf] %vm688_vm0, %v808_v36  ;;  %708 = vst.msk [vmem:[%s1451_s3 + $0x4c] sm:$0xf] %vm688_vm0, %v824_v37  ;;  %v946_v44 = vadd.f32 %v945_v42, %v944_v38  ;;  %v994_v45 = vadd.f32 %v993_v43, %v992_v39  ;;  %v947_v46 = vpop.f32.mrb[10].mxu0  ;;  %v995_v47 = vpop.f32.mrb[10].mxu1  ;;  %v856_v36 = vunpack.c.h.bf16 %v904_v18  ;;  %v888_v37 = vunpack.c.h.bf16 %v912_v19 }
 0x108   :  { %v948_v50 = vpop.f32.mrb[11].mxu0  ;;  %v996_v51 = vpop.f32.mrb[11].mxu1 }
 0x109   :  { %v450_v52 = vadd.f32 %v946_v44, %v847_v40  ;;  %v514_v53 = vadd.f32 %v994_v45, %v879_v41  ;;  %v949_v54 = vadd.f32 %v948_v50, %v947_v46  ;;  %v997_v55 = vadd.f32 %v996_v51, %v995_v47  ;;  %v905_v44 = vld [vmem:[%s1450_s2 + $0x28] sm:$0xff]  }
 0x10a   :  { %v913_v45 = vld [vmem:[%s1450_s2 + $0x68] sm:$0xff]  }
 0x10b   :  { %v809_v58 = vpack.c.bf16 %v450_v52, %v450_v52  ;;  %v825_v59 = vpack.c.bf16 %v514_v53, %v514_v53  ;;  %v453_v60 = vadd.f32 %v949_v54, %v848_v48  ;;  %v517_v61 = vadd.f32 %v997_v55, %v880_v49 }
 0x10c   :  { %v859_v54 = vunpack.c.l.bf16 %v905_v44  ;;  %v891_v55 = vunpack.c.l.bf16 %v913_v45 }
 0x10d   :  { %693 = vst.msk [vmem:[%s1451_s3 + $0x10] sm:$0xf] %vm688_vm0, %v809_v58  ;;  %709 = vst.msk [vmem:[%s1451_s3 + $0x50] sm:$0xf] %vm688_vm0, %v825_v59  ;;  %v810_v62 = vpack.c.bf16 %v453_v60, %v453_v60  ;;  %v826_v63 = vpack.c.bf16 %v517_v61, %v517_v61  ;;  %v950_v0 = vpop.f32.mrb[12].mxu0  ;;  %v998_v1 = vpop.f32.mrb[12].mxu1 }
 0x10e   :  { %v951_v4 = vpop.f32.mrb[13].mxu0  ;;  %v999_v5 = vpop.f32.mrb[13].mxu1 }
 0x10f   :  { %694 = vst.msk [vmem:[%s1451_s3 + $0x14] sm:$0xf] %vm688_vm0, %v810_v62  ;;  %710 = vst.msk [vmem:[%s1451_s3 + $0x54] sm:$0xf] %vm688_vm0, %v826_v63  ;;  %v952_v6 = vadd.f32 %v951_v4, %v950_v0  ;;  %v1000_v7 = vadd.f32 %v999_v5, %v998_v1  ;;  %v953_v8 = vpop.f32.mrb[14].mxu0  ;;  %v1001_v9 = vpop.f32.mrb[14].mxu1  ;;  %v860_v62 = vunpack.c.h.bf16 %v905_v44  ;;  %v892_v63 = vunpack.c.h.bf16 %v913_v45 }
 0x110   :  { %v954_v12 = vpop.f32.mrb[15].mxu0  ;;  %v1002_v13 = vpop.f32.mrb[15].mxu1 }
 0x111   :  { %v458_v14 = vadd.f32 %v952_v6, %v851_v2  ;;  %v522_v15 = vadd.f32 %v1000_v7, %v883_v3  ;;  %v955_v16 = vadd.f32 %v954_v12, %v953_v8  ;;  %v1003_v17 = vadd.f32 %v1002_v13, %v1001_v9  ;;  %v906_v6 = vld [vmem:[%s1450_s2 + $0x30] sm:$0xff]  }
 0x112   :  { %v914_v7 = vld [vmem:[%s1450_s2 + $0x70] sm:$0xff]  }
 0x113   :  { %v811_v20 = vpack.c.bf16 %v458_v14, %v458_v14  ;;  %v827_v21 = vpack.c.bf16 %v522_v15, %v522_v15  ;;  %v461_v22 = vadd.f32 %v955_v16, %v852_v10  ;;  %v525_v23 = vadd.f32 %v1003_v17, %v884_v11 }
 0x114   :  { %v863_v16 = vunpack.c.l.bf16 %v906_v6  ;;  %v895_v17 = vunpack.c.l.bf16 %v914_v7 }
 0x115   :  { %695 = vst.msk [vmem:[%s1451_s3 + $0x18] sm:$0xf] %vm688_vm0, %v811_v20  ;;  %711 = vst.msk [vmem:[%s1451_s3 + $0x58] sm:$0xf] %vm688_vm0, %v827_v21  ;;  %v812_v24 = vpack.c.bf16 %v461_v22, %v461_v22  ;;  %v828_v25 = vpack.c.bf16 %v525_v23, %v525_v23  ;;  %v956_v26 = vpop.f32.mrb[16].mxu0  ;;  %v1004_v27 = vpop.f32.mrb[16].mxu1 }
 0x116   :  { %v957_v30 = vpop.f32.mrb[17].mxu0  ;;  %v1005_v31 = vpop.f32.mrb[17].mxu1 }
 0x117   :  { %696 = vst.msk [vmem:[%s1451_s3 + $0x1c] sm:$0xf] %vm688_vm0, %v812_v24  ;;  %712 = vst.msk [vmem:[%s1451_s3 + $0x5c] sm:$0xf] %vm688_vm0, %v828_v25  ;;  %v958_v32 = vadd.f32 %v957_v30, %v956_v26  ;;  %v1006_v33 = vadd.f32 %v1005_v31, %v1004_v27  ;;  %v959_v34 = vpop.f32.mrb[18].mxu0  ;;  %v1007_v35 = vpop.f32.mrb[18].mxu1  ;;  %v864_v24 = vunpack.c.h.bf16 %v906_v6  ;;  %v896_v25 = vunpack.c.h.bf16 %v914_v7 }
 0x118   :  { %v960_v38 = vpop.f32.mrb[19].mxu0  ;;  %v1008_v39 = vpop.f32.mrb[19].mxu1 }
 0x119   :  { %v466_v40 = vadd.f32 %v958_v32, %v855_v28  ;;  %v530_v41 = vadd.f32 %v1006_v33, %v887_v29  ;;  %v961_v42 = vadd.f32 %v960_v38, %v959_v34  ;;  %v1009_v43 = vadd.f32 %v1008_v39, %v1007_v35  ;;  %v907_v32 = vld [vmem:[%s1450_s2 + $0x38] sm:$0xff]  }
 0x11a   :  { %v915_v33 = vld [vmem:[%s1450_s2 + $0x78] sm:$0xff]  }
 0x11b   :  { %v813_v46 = vpack.c.bf16 %v466_v40, %v466_v40  ;;  %v829_v47 = vpack.c.bf16 %v530_v41, %v530_v41  ;;  %v469_v48 = vadd.f32 %v961_v42, %v856_v36  ;;  %v533_v49 = vadd.f32 %v1009_v43, %v888_v37 }
 0x11c   :  { %v867_v42 = vunpack.c.l.bf16 %v907_v32  ;;  %v899_v43 = vunpack.c.l.bf16 %v915_v33 }
 0x11d   :  { %697 = vst.msk [vmem:[%s1451_s3 + $0x20] sm:$0xf] %vm688_vm0, %v813_v46  ;;  %713 = vst.msk [vmem:[%s1451_s3 + $0x60] sm:$0xf] %vm688_vm0, %v829_v47  ;;  %v814_v50 = vpack.c.bf16 %v469_v48, %v469_v48  ;;  %v830_v51 = vpack.c.bf16 %v533_v49, %v533_v49  ;;  %v962_v52 = vpop.f32.mrb[20].mxu0  ;;  %v1010_v53 = vpop.f32.mrb[20].mxu1 }
 0x11e   :  { %v963_v56 = vpop.f32.mrb[21].mxu0  ;;  %v1011_v57 = vpop.f32.mrb[21].mxu1 }
 0x11f   :  { %698 = vst.msk [vmem:[%s1451_s3 + $0x24] sm:$0xf] %vm688_vm0, %v814_v50  ;;  %714 = vst.msk [vmem:[%s1451_s3 + $0x64] sm:$0xf] %vm688_vm0, %v830_v51  ;;  %v964_v58 = vadd.f32 %v963_v56, %v962_v52  ;;  %v1012_v59 = vadd.f32 %v1011_v57, %v1010_v53  ;;  %v965_v60 = vpop.f32.mrb[22].mxu0  ;;  %v1013_v61 = vpop.f32.mrb[22].mxu1  ;;  %v868_v50 = vunpack.c.h.bf16 %v907_v32  ;;  %v900_v51 = vunpack.c.h.bf16 %v915_v33 }
 0x120   :  { %v966_v0 = vpop.f32.mrb[23].mxu0  ;;  %v1014_v1 = vpop.f32.mrb[23].mxu1 }
 0x121   :  { %v474_v2 = vadd.f32 %v964_v58, %v859_v54  ;;  %v538_v3 = vadd.f32 %v1012_v59, %v891_v55  ;;  %v967_v4 = vadd.f32 %v966_v0, %v965_v60  ;;  %v1015_v5 = vadd.f32 %v1014_v1, %v1013_v61 }
 0x123   :  { %v815_v8 = vpack.c.bf16 %v474_v2, %v474_v2  ;;  %v831_v9 = vpack.c.bf16 %v538_v3, %v538_v3  ;;  %v477_v10 = vadd.f32 %v967_v4, %v860_v62  ;;  %v541_v11 = vadd.f32 %v1015_v5, %v892_v63 }
 0x125   :  { %699 = vst.msk [vmem:[%s1451_s3 + $0x28] sm:$0xf] %vm688_vm0, %v815_v8  ;;  %715 = vst.msk [vmem:[%s1451_s3 + $0x68] sm:$0xf] %vm688_vm0, %v831_v9  ;;  %v816_v12 = vpack.c.bf16 %v477_v10, %v477_v10  ;;  %v832_v13 = vpack.c.bf16 %v541_v11, %v541_v11  ;;  %v968_v14 = vpop.f32.mrb[24].mxu0  ;;  %v1016_v15 = vpop.f32.mrb[24].mxu1 }
 0x126   :  { %v969_v18 = vpop.f32.mrb[25].mxu0  ;;  %v1017_v19 = vpop.f32.mrb[25].mxu1 }
 0x127   :  { %700 = vst.msk [vmem:[%s1451_s3 + $0x2c] sm:$0xf] %vm688_vm0, %v816_v12  ;;  %716 = vst.msk [vmem:[%s1451_s3 + $0x6c] sm:$0xf] %vm688_vm0, %v832_v13  ;;  %v970_v20 = vadd.f32 %v969_v18, %v968_v14  ;;  %v1018_v21 = vadd.f32 %v1017_v19, %v1016_v15  ;;  %v971_v22 = vpop.f32.mrb[26].mxu0  ;;  %v1019_v23 = vpop.f32.mrb[26].mxu1 }
 0x128   :  { %v972_v26 = vpop.f32.mrb[27].mxu0  ;;  %v1020_v27 = vpop.f32.mrb[27].mxu1 }
 0x129   :  { %v482_v28 = vadd.f32 %v970_v20, %v863_v16  ;;  %v546_v29 = vadd.f32 %v1018_v21, %v895_v17  ;;  %v973_v30 = vadd.f32 %v972_v26, %v971_v22  ;;  %v1021_v31 = vadd.f32 %v1020_v27, %v1019_v23 }
 0x12b   :  { %v817_v34 = vpack.c.bf16 %v482_v28, %v482_v28  ;;  %v833_v35 = vpack.c.bf16 %v546_v29, %v546_v29  ;;  %v485_v36 = vadd.f32 %v973_v30, %v864_v24  ;;  %v549_v37 = vadd.f32 %v1021_v31, %v896_v25 }
 0x12d   :  { %701 = vst.msk [vmem:[%s1451_s3 + $0x30] sm:$0xf] %vm688_vm0, %v817_v34  ;;  %717 = vst.msk [vmem:[%s1451_s3 + $0x70] sm:$0xf] %vm688_vm0, %v833_v35  ;;  %v818_v38 = vpack.c.bf16 %v485_v36, %v485_v36  ;;  %v834_v39 = vpack.c.bf16 %v549_v37, %v549_v37  ;;  %v974_v40 = vpop.f32.mrb[28].mxu0  ;;  %v1022_v41 = vpop.f32.mrb[28].mxu1 }
 0x12e   :  { %v975_v44 = vpop.f32.mrb[29].mxu0  ;;  %v1023_v45 = vpop.f32.mrb[29].mxu1 }
 0x12f   :  { %702 = vst.msk [vmem:[%s1451_s3 + $0x34] sm:$0xf] %vm688_vm0, %v818_v38  ;;  %718 = vst.msk [vmem:[%s1451_s3 + $0x74] sm:$0xf] %vm688_vm0, %v834_v39  ;;  %v976_v46 = vadd.f32 %v975_v44, %v974_v40  ;;  %v1024_v47 = vadd.f32 %v1023_v45, %v1022_v41  ;;  %v977_v48 = vpop.f32.mrb[30].mxu0  ;;  %v1025_v49 = vpop.f32.mrb[30].mxu1 }
 0x130   :  { %v978_v52 = vpop.f32.mrb[31].mxu0  ;;  %v1026_v53 = vpop.f32.mrb[31].mxu1 }
 0x131   :  { %v490_v54 = vadd.f32 %v976_v46, %v867_v42  ;;  %v554_v55 = vadd.f32 %v1024_v47, %v899_v43  ;;  %v979_v56 = vadd.f32 %v978_v52, %v977_v48  ;;  %v1027_v57 = vadd.f32 %v1026_v53, %v1025_v49 }
 0x133   :  { %v819_v58 = vpack.c.bf16 %v490_v54, %v490_v54  ;;  %v835_v59 = vpack.c.bf16 %v554_v55, %v554_v55  ;;  %v493_v60 = vadd.f32 %v979_v56, %v868_v50  ;;  %v557_v61 = vadd.f32 %v1027_v57, %v900_v51 }
 0x135   :  { %703 = vst.msk [vmem:[%s1451_s3 + $0x38] sm:$0xf] %vm688_vm0, %v819_v58  ;;  %719 = vst.msk [vmem:[%s1451_s3 + $0x78] sm:$0xf] %vm688_vm0, %v835_v59  ;;  %v820_v62 = vpack.c.bf16 %v493_v60, %v493_v60  ;;  %v836_v63 = vpack.c.bf16 %v557_v61, %v557_v61 }
 0x137   :  { %704 = vst.msk [vmem:[%s1451_s3 + $0x3c] sm:$0xf] %vm688_vm0, %v820_v62  ;;  %720 = vst.msk [vmem:[%s1451_s3 + $0x7c] sm:$0xf] %vm688_vm0, %v836_v63 }

// kernel: super_wide_resnet_forward.11
= control target key start
LH: loop header
LB: loop body
LE: loop exit
PB: predicated region body
PF: predicated region fallthrough
CT: control target
= control target key end

     0   :  { %vm303_vm0 = vcmask 257024   ;;  %s568_s1 = inlined_call_operand.vmem [shape: bf16[256,32], index: 1, kind: input, shape index: {}]   ;;  %s569_s0 = inlined_call_operand.vmem [shape: bf16[64,256], index: 0, kind: input, shape index: {}]   ;;  %s570_s2 = inlined_call_operand.vmem [shape: f32[1,32], index: 2, kind: input, shape index: {}]   ;;  %s571_s3 = inlined_call_operand.vmem [shape: bf16[64,32], index: 3, kind: output, shape index: {}]  }
   0x1   :  { %v413_v0 = vld [vmem:[%s568_s1 + $0x40] sm:$0xff]   ;;  %v415_v2 = vld [vmem:[%s568_s1 + $0x48] sm:$0xff]   ;;  %v417_v4 = vld [vmem:[%s568_s1 + $0x50] sm:$0xff]  }
   0x2   :  { %v414_v1 = vld [vmem:[%s568_s1] sm:$0xff]   ;;  %357 = vmatprep.subr.bf16.mxu0 %v413_v0  ;;  %397 = vmatprep.subr.bf16.mxu1 %v413_v0  ;;  %v416_v3 = vld [vmem:[%s568_s1 + $0x8] sm:$0xff]   ;;  %v418_v5 = vld [vmem:[%s568_s1 + $0x10] sm:$0xff]  }
   0x3   :  { %358 = vmatpush3.bf16.msra.mxu0 %v414_v1  ;;  %405 = vmatpush3.bf16.msra.mxu1 %v414_v1  ;;  %v419_v6 = vld [vmem:[%s568_s1 + $0x58] sm:$0xff]   ;;  %v421_v8 = vld [vmem:[%s568_s1 + $0x60] sm:$0xff]   ;;  %v423_v10 = vld [vmem:[%s568_s1 + $0x68] sm:$0xff]  }
   0x4   :  { %359 = vmatprep.subr.bf16.mxu0 %v415_v2  ;;  %398 = vmatprep.subr.bf16.mxu1 %v415_v2  ;;  %v420_v7 = vld [vmem:[%s568_s1 + $0x18] sm:$0xff]   ;;  %v422_v9 = vld [vmem:[%s568_s1 + $0x20] sm:$0xff]   ;;  %v424_v13 = vld [vmem:[%s568_s1 + $0x28] sm:$0xff]  }
   0x5   :  { %v431_v11 = vld [vmem:[%s569_s0 + $0x4] ss:$8 sps:$4 sm:$0xff]   ;;  %v425_v14 = vld [vmem:[%s568_s1 + $0x70] sm:$0xff]   ;;  %v427_v16 = vld [vmem:[%s568_s1 + $0x78] sm:$0xff]  }
   0x6   :  { %v434_v12 = vld [vmem:[%s569_s0 + $0x24] ss:$8 sps:$4 sm:$0xff]   ;;  %230 = vmatprep.mubr.bf16.mxu0 %v431_v11  ;;  %v426_v15 = vld [vmem:[%s568_s1 + $0x30] sm:$0xff]   ;;  %v428_v17 = vld [vmem:[%s568_s1 + $0x38] sm:$0xff]  }
   0x7   :  { %360 = vmatpush3.bf16.msra.mxu0 %v416_v3  ;;  %406 = vmatpush3.bf16.msra.mxu1 %v416_v3  ;;  %v429_v18 = vld [vmem:[%s569_s0] ss:$8 sps:$4 sm:$0xff]   ;;  %v435_v20 = vld [vmem:[%s569_s0 + $0x14] ss:$8 sps:$4 sm:$0xff]   ;;  %v439_v22 = vld [vmem:[%s569_s0 + $0x10] ss:$8 sps:$4 sm:$0xff]  }
   0x8   :  { %361 = vmatprep.subr.bf16.mxu0 %v417_v4  ;;  %399 = vmatprep.subr.bf16.mxu1 %v417_v4  ;;  %v432_v19 = vld [vmem:[%s569_s0 + $0x20] ss:$8 sps:$4 sm:$0xff]   ;;  %v437_v21 = vld [vmem:[%s569_s0 + $0x34] ss:$8 sps:$4 sm:$0xff]   ;;  %v440_v23 = vld [vmem:[%s569_s0 + $0x30] ss:$8 sps:$4 sm:$0xff]  }
   0x9   :  { %246 = vmatprep.mubr.bf16.mxu1 %v434_v12  ;;  %v316_v26 = vld [vmem:[%s570_s2] ss:$0 sm:$0xff] }
   0xb   :  { %362 = vmatpush3.bf16.msra.mxu0 %v418_v5  ;;  %407 = vmatpush3.bf16.msra.mxu1 %v418_v5 }
   0xc   :  { %363 = vmatprep.subr.bf16.mxu0 %v419_v6  ;;  %400 = vmatprep.subr.bf16.mxu1 %v419_v6 }
   0xf   :  { %364 = vmatpush3.bf16.msra.mxu0 %v420_v7  ;;  %408 = vmatpush3.bf16.msra.mxu1 %v420_v7 }
  0x10   :  { %365 = vmatprep.subr.bf16.mxu0 %v421_v8  ;;  %401 = vmatprep.subr.bf16.mxu1 %v421_v8 }
  0x13   :  { %366 = vmatpush3.bf16.msra.mxu0 %v422_v9  ;;  %409 = vmatpush3.bf16.msra.mxu1 %v422_v9 }
  0x14   :  { %367 = vmatprep.subr.bf16.mxu0 %v423_v10  ;;  %402 = vmatprep.subr.bf16.mxu1 %v423_v10 }
  0x17   :  { %368 = vmatpush3.bf16.msra.mxu0 %v424_v13  ;;  %410 = vmatpush3.bf16.msra.mxu1 %v424_v13 }
  0x18   :  { %369 = vmatprep.subr.bf16.mxu0 %v425_v14  ;;  %403 = vmatprep.subr.bf16.mxu1 %v425_v14 }
  0x1b   :  { %370 = vmatpush3.bf16.msra.mxu0 %v426_v15  ;;  %411 = vmatpush3.bf16.msra.mxu1 %v426_v15 }
  0x1c   :  { %371 = vmatprep.subr.bf16.mxu0 %v427_v16  ;;  %404 = vmatprep.subr.bf16.mxu1 %v427_v16 }
  0x1f   :  { %372 = vmatpush3.bf16.msra.mxu0 %v428_v17  ;;  %412 = vmatpush3.bf16.msra.mxu1 %v428_v17 }
  0x22   :  { %231 = vmatmul.mubr.bf16.vlgmr.msra.gmra.mrb[0].mxu0 %v429_v18  ;;  %247 = vmatmul.mubr.bf16.vlgmr.msra.gmra.mrb[0].mxu1 %v432_v19 }
  0x23   :  { %238 = vmatprep.mubr.bf16.mxu0 %v435_v20  ;;  %254 = vmatprep.mubr.bf16.mxu1 %v437_v21 }
  0x2a   :  { %239 = vmatmul.mubr.bf16.gmra.mrb[4].mxu0 %v439_v22  ;;  %255 = vmatmul.mubr.bf16.gmra.mrb[4].mxu1 %v440_v23 }
  0xf5   :  { %v373_v24 = vpop.f32.mrb[0].mxu0  ;;  %v385_v25 = vpop.f32.mrb[0].mxu1 }
  0xf6   :  { %v374_v27 = vpop.f32.mrb[1].mxu0  ;;  %v386_v28 = vpop.f32.mrb[1].mxu1 }
  0xf7   :  { %v375_v29 = vadd.f32 %v374_v27, %v373_v24  ;;  %v387_v30 = vadd.f32 %v386_v28, %v385_v25  ;;  %v376_v31 = vpop.f32.mrb[2].mxu0  ;;  %v388_v32 = vpop.f32.mrb[2].mxu1 }
  0xf8   :  { %v377_v33 = vpop.f32.mrb[3].mxu0  ;;  %v389_v34 = vpop.f32.mrb[3].mxu1 }
  0xf9   :  { %v233_v35 = vadd.f32 %v375_v29, %v316_v26  ;;  %v249_v36 = vadd.f32 %v387_v30, %v316_v26  ;;  %v378_v37 = vadd.f32 %v377_v33, %v376_v31  ;;  %v390_v38 = vadd.f32 %v389_v34, %v388_v32 }
  0xfb   :  { %v263_v39 = vmax.f32 %v233_v35, 0.0  ;;  %v267_v40 = vmax.f32 %v249_v36, 0.0  ;;  %v236_v41 = vadd.f32 %v378_v37, %v316_v26  ;;  %v252_v42 = vadd.f32 %v390_v38, %v316_v26 }
  0xfd   :  { %v349_v43 = vpack.c.bf16 %v263_v39, %v263_v39  ;;  %v353_v44 = vpack.c.bf16 %v267_v40, %v267_v40  ;;  %v264_v45 = vmax.f32 %v236_v41, 0.0  ;;  %v268_v46 = vmax.f32 %v252_v42, 0.0  ;;  %v379_v47 = vpop.f32.mrb[4].mxu0  ;;  %v391_v48 = vpop.f32.mrb[4].mxu1 }
  0xfe   :  { %v380_v49 = vpop.f32.mrb[5].mxu0  ;;  %v392_v50 = vpop.f32.mrb[5].mxu1 }
  0xff   :  { %304 = vst.msk [vmem:[%s571_s3] sm:$0xf] %vm303_vm0, %v349_v43  ;;  %308 = vst.msk [vmem:[%s571_s3 + $0x10] sm:$0xf] %vm303_vm0, %v353_v44  ;;  %v350_v51 = vpack.c.bf16 %v264_v45, %v264_v45  ;;  %v354_v52 = vpack.c.bf16 %v268_v46, %v268_v46  ;;  %v381_v53 = vadd.f32 %v380_v49, %v379_v47  ;;  %v382_v55 = vpop.f32.mrb[6].mxu0  ;;  %v394_v56 = vpop.f32.mrb[6].mxu1 }
 0x100   :  { %v393_v54 = vadd.f32 %v392_v50, %v391_v48  ;;  %v383_v57 = vpop.f32.mrb[7].mxu0  ;;  %v395_v58 = vpop.f32.mrb[7].mxu1 }
 0x101   :  { %305 = vst.msk [vmem:[%s571_s3 + $0x4] sm:$0xf] %vm303_vm0, %v350_v51  ;;  %309 = vst.msk [vmem:[%s571_s3 + $0x14] sm:$0xf] %vm303_vm0, %v354_v52  ;;  %v241_v59 = vadd.f32 %v381_v53, %v316_v26  ;;  %v384_v61 = vadd.f32 %v383_v57, %v382_v55  ;;  %v396_v62 = vadd.f32 %v395_v58, %v394_v56 }
 0x102   :  { %v257_v60 = vadd.f32 %v393_v54, %v316_v26 }
 0x103   :  { %v265_v63 = vmax.f32 %v241_v59, 0.0  ;;  %v244_v1 = vadd.f32 %v384_v61, %v316_v26  ;;  %v260_v2 = vadd.f32 %v396_v62, %v316_v26 }
 0x104   :  { %v269_v0 = vmax.f32 %v257_v60, 0.0 }
 0x105   :  { %v351_v3 = vpack.c.bf16 %v265_v63, %v265_v63  ;;  %v266_v5 = vmax.f32 %v244_v1, 0.0  ;;  %v270_v6 = vmax.f32 %v260_v2, 0.0 }
 0x106   :  { %v355_v4 = vpack.c.bf16 %v269_v0, %v269_v0 }
 0x107   :  { %306 = vst.msk [vmem:[%s571_s3 + $0x8] sm:$0xf] %vm303_vm0, %v351_v3  ;;  %v352_v7 = vpack.c.bf16 %v266_v5, %v266_v5  ;;  %v356_v8 = vpack.c.bf16 %v270_v6, %v270_v6 }
 0x108   :  { %310 = vst.msk [vmem:[%s571_s3 + $0x18] sm:$0xf] %vm303_vm0, %v355_v4 }
 0x109   :  { %307 = vst.msk [vmem:[%s571_s3 + $0xc] sm:$0xf] %vm303_vm0, %v352_v7  ;;  %311 = vst.msk [vmem:[%s571_s3 + $0x1c] sm:$0xf] %vm303_vm0, %v356_v8 }

// kernel: super_wide_resnet_forward.12
= control target key start
LH: loop header
LB: loop body
LE: loop exit
PB: predicated region body
PF: predicated region fallthrough
CT: control target
= control target key end

     0   :  { %vm456_vm0 = vcmask 257024   ;;  %s801_s1 = inlined_call_operand.vmem [shape: bf16[384,32], index: 1, kind: input, shape index: {}]   ;;  %s802_s0 = inlined_call_operand.vmem [shape: bf16[64,384], index: 0, kind: input, shape index: {}]   ;;  %s803_s2 = inlined_call_operand.vmem [shape: f32[1,32], index: 2, kind: input, shape index: {}]   ;;  %s804_s3 = inlined_call_operand.vmem [shape: bf16[64,32], index: 3, kind: output, shape index: {}]  }
   0x1   :  { %v598_v0 = vld [vmem:[%s801_s1 + $0x40] sm:$0xff]   ;;  %v600_v2 = vld [vmem:[%s801_s1 + $0x48] sm:$0xff]   ;;  %v603_v5 = vld [vmem:[%s801_s1 + $0x50] sm:$0xff]  }
   0x2   :  { %v599_v1 = vld [vmem:[%s801_s1] sm:$0xff]   ;;  %522 = vmatprep.subr.bf16.mxu0 %v598_v0  ;;  %v602_v4 = vld [vmem:[%s801_s1 + $0x8] sm:$0xff]   ;;  %v605_v7 = vld [vmem:[%s801_s1 + $0x10] sm:$0xff]  }
   0x3   :  { %523 = vmatpush3.bf16.msra.mxu0 %v599_v1  ;;  %v601_v3 = vld [vmem:[%s801_s1 + $0x80] sm:$0xff]   ;;  %v604_v6 = vld [vmem:[%s801_s1 + $0x88] sm:$0xff]   ;;  %v606_v8 = vld [vmem:[%s801_s1 + $0x58] sm:$0xff]  }
   0x4   :  { %524 = vmatprep.subr.bf16.mxu0 %v600_v2  ;;  %574 = vmatprep.subr.bf16.mxu1 %v601_v3  ;;  %v607_v9 = vld [vmem:[%s801_s1 + $0x90] sm:$0xff]   ;;  %v608_v10 = vld [vmem:[%s801_s1 + $0x18] sm:$0xff]   ;;  %v609_v11 = vld [vmem:[%s801_s1 + $0x60] sm:$0xff]  }
   0x5   :  { %575 = vmatpush3.bf16.msra.mxu1 %v601_v3  ;;  %v610_v12 = vld [vmem:[%s801_s1 + $0x98] sm:$0xff]   ;;  %v611_v13 = vld [vmem:[%s801_s1 + $0x20] sm:$0xff]   ;;  %v612_v15 = vld [vmem:[%s801_s1 + $0x68] sm:$0xff]  }
   0x6   :  { %576 = vmatprep.subr.bf16.mxu1 %v604_v6  ;;  %v613_v14 = vld [vmem:[%s801_s1 + $0xa0] sm:$0xff]   ;;  %v614_v16 = vld [vmem:[%s801_s1 + $0x28] sm:$0xff]   ;;  %v615_v18 = vld [vmem:[%s801_s1 + $0x70] sm:$0xff]  }
   0x7   :  { %525 = vmatpush3.bf16.msra.mxu0 %v602_v4  ;;  %v616_v17 = vld [vmem:[%s801_s1 + $0xa8] sm:$0xff]   ;;  %v617_v19 = vld [vmem:[%s801_s1 + $0x30] sm:$0xff]   ;;  %v618_v20 = vld [vmem:[%s801_s1 + $0x78] sm:$0xff]  }
   0x8   :  { %526 = vmatprep.subr.bf16.mxu0 %v603_v5  ;;  %v619_v21 = vld [vmem:[%s801_s1 + $0xb0] sm:$0xff]   ;;  %v620_v23 = vld [vmem:[%s801_s1 + $0x38] sm:$0xff]   ;;  %v621_v26 = vld [vmem:[%s802_s0] ss:$12 sps:$4 sm:$0xff]  }
   0x9   :  { %577 = vmatpush3.bf16.msra.mxu1 %v604_v6  ;;  %v623_v22 = vld [vmem:[%s802_s0 + $0x4] ss:$12 sps:$4 sm:$0xff]   ;;  %v625_v24 = vld [vmem:[%s802_s0 + $0x8] ss:$12 sps:$4 sm:$0xff]   ;;  %v624_v25 = vld [vmem:[%s801_s1 + $0xb8] sm:$0xff]  }
   0xa   :  { %578 = vmatprep.subr.bf16.mxu1 %v607_v9  ;;  %326 = vmatprep.mubr.bf16.mxu0 %v623_v22  ;;  %v627_v27 = vld [vmem:[%s802_s0 + $0x1c] ss:$12 sps:$4 sm:$0xff]   ;;  %v626_v28 = vld [vmem:[%s802_s0 + $0x20] ss:$12 sps:$4 sm:$0xff]   ;;  %v633_v29 = vld [vmem:[%s802_s0 + $0x38] ss:$12 sps:$4 sm:$0xff]  }
   0xb   :  { %527 = vmatpush3.bf16.msra.mxu0 %v605_v7  ;;  %590 = vmatprep.mubr.bf16.mxu1 %v625_v24  ;;  %v629_v30 = vld [vmem:[%s802_s0 + $0x18] ss:$12 sps:$4 sm:$0xff]   ;;  %v630_v31 = vld [vmem:[%s802_s0 + $0x34] ss:$12 sps:$4 sm:$0xff]   ;;  %v634_v32 = vld [vmem:[%s802_s0 + $0x50] ss:$12 sps:$4 sm:$0xff]  }
   0xc   :  { %528 = vmatprep.subr.bf16.mxu0 %v606_v8  ;;  %v632_v33 = vld [vmem:[%s802_s0 + $0x30] ss:$12 sps:$4 sm:$0xff]   ;;  %v635_v34 = vld [vmem:[%s802_s0 + $0x4c] ss:$12 sps:$4 sm:$0xff]   ;;  %v637_v35 = vld [vmem:[%s802_s0 + $0x48] ss:$12 sps:$4 sm:$0xff]  }
   0xd   :  { %579 = vmatpush3.bf16.msra.mxu1 %v607_v9  ;;  %v469_v38 = vld [vmem:[%s803_s2] ss:$0 sm:$0xff] }
   0xe   :  { %580 = vmatprep.subr.bf16.mxu1 %v610_v12 }
   0xf   :  { %529 = vmatpush3.bf16.msra.mxu0 %v608_v10 }
  0x10   :  { %530 = vmatprep.subr.bf16.mxu0 %v609_v11 }
  0x11   :  { %581 = vmatpush3.bf16.msra.mxu1 %v610_v12 }
  0x12   :  { %582 = vmatprep.subr.bf16.mxu1 %v613_v14 }
  0x13   :  { %531 = vmatpush3.bf16.msra.mxu0 %v611_v13 }
  0x14   :  { %532 = vmatprep.subr.bf16.mxu0 %v612_v15 }
  0x15   :  { %583 = vmatpush3.bf16.msra.mxu1 %v613_v14 }
  0x16   :  { %584 = vmatprep.subr.bf16.mxu1 %v616_v17 }
  0x17   :  { %533 = vmatpush3.bf16.msra.mxu0 %v614_v16 }
  0x18   :  { %534 = vmatprep.subr.bf16.mxu0 %v615_v18 }
  0x19   :  { %585 = vmatpush3.bf16.msra.mxu1 %v616_v17 }
  0x1a   :  { %586 = vmatprep.subr.bf16.mxu1 %v619_v21 }
  0x1b   :  { %535 = vmatpush3.bf16.msra.mxu0 %v617_v19 }
  0x1c   :  { %536 = vmatprep.subr.bf16.mxu0 %v618_v20 }
  0x1d   :  { %587 = vmatpush3.bf16.msra.mxu1 %v619_v21 }
  0x1e   :  { %588 = vmatprep.subr.bf16.mxu1 %v624_v25 }
  0x1f   :  { %537 = vmatpush3.bf16.msra.mxu0 %v620_v23 }
  0x21   :  { %589 = vmatpush3.bf16.msra.mxu1 %v624_v25 }
  0x22   :  { %327 = vmatmul.mubr.bf16.vlgmr.msra.gmra.mrb[0].mxu0 %v621_v26 }
  0x23   :  { %334 = vmatprep.mubr.bf16.mxu0 %v627_v27 }
  0x24   :  { %591 = vmatmul.mubr.bf16.vlgmr.msra.gmra.mrb[0].mxu1 %v626_v28 }
  0x25   :  { %594 = vmatprep.mubr.bf16.mxu1 %v633_v29 }
  0x2a   :  { %335 = vmatmul.mubr.bf16.gmra.mrb[4].mxu0 %v629_v30 }
  0x2b   :  { %342 = vmatprep.mubr.bf16.mxu0 %v630_v31 }
  0x2c   :  { %595 = vmatmul.mubr.bf16.gmra.mrb[4].mxu1 %v634_v32 }
  0x32   :  { %343 = vmatmul.mubr.bf16.gmra.mrb[8].mxu0 %v632_v33 }
  0x33   :  { %350 = vmatprep.mubr.bf16.mxu0 %v635_v34 }
  0x3a   :  { %351 = vmatmul.mubr.bf16.gmra.mrb[12].mxu0 %v637_v35 }
  0xf5   :  { %v538_v36 = vpop.f32.mrb[0].mxu0 }
  0xf6   :  { %v539_v37 = vpop.f32.mrb[1].mxu0 }
  0xf7   :  { %v540_v39 = vadd.f32 %v539_v37, %v538_v36  ;;  %v541_v40 = vpop.f32.mrb[2].mxu0  ;;  %v592_v42 = vpop.f32.mrb[0].mxu1 }
  0xf8   :  { %v542_v41 = vpop.f32.mrb[3].mxu0  ;;  %v393_v45 = vpop.f32.mrb[1].mxu1 }
  0xf9   :  { %v543_v43 = vadd.f32 %v542_v41, %v541_v40  ;;  %v329_v44 = vadd.f32 %v540_v39, %v469_v38  ;;  %v593_v46 = vpop.f32.mrb[2].mxu1 }
  0xfa   :  { %v396_v49 = vpop.f32.mrb[3].mxu1 }
  0xfb   :  { %v394_v47 = vadd.f32 %v393_v45, %v329_v44  ;;  %v332_v48 = vadd.f32 %v543_v43, %v469_v38 }
  0xfd   :  { %v514_v50 = vpack.c.bf16 %v394_v47, %v394_v47  ;;  %v397_v51 = vadd.f32 %v396_v49, %v332_v48  ;;  %v544_v52 = vpop.f32.mrb[4].mxu0 }
  0xfe   :  { %v545_v53 = vpop.f32.mrb[5].mxu0 }
  0xff   :  { %457 = vst.msk [vmem:[%s804_s3] sm:$0xf] %vm456_vm0, %v514_v50  ;;  %v515_v54 = vpack.c.bf16 %v397_v51, %v397_v51  ;;  %v546_v55 = vadd.f32 %v545_v53, %v544_v52  ;;  %v547_v56 = vpop.f32.mrb[6].mxu0  ;;  %v596_v58 = vpop.f32.mrb[4].mxu1 }
 0x100   :  { %v548_v57 = vpop.f32.mrb[7].mxu0  ;;  %v409_v61 = vpop.f32.mrb[5].mxu1 }
 0x101   :  { %458 = vst.msk [vmem:[%s804_s3 + $0x4] sm:$0xf] %vm456_vm0, %v515_v54  ;;  %v337_v59 = vadd.f32 %v546_v55, %v469_v38  ;;  %v549_v60 = vadd.f32 %v548_v57, %v547_v56  ;;  %v597_v62 = vpop.f32.mrb[6].mxu1 }
 0x102   :  { %v412_v1 = vpop.f32.mrb[7].mxu1 }
 0x103   :  { %v402_v63 = vadd.f32 %v592_v42, %v337_v59  ;;  %v340_v0 = vadd.f32 %v549_v60, %v469_v38 }
 0x105   :  { %v516_v2 = vpack.c.bf16 %v402_v63, %v402_v63  ;;  %v405_v3 = vadd.f32 %v593_v46, %v340_v0  ;;  %v550_v4 = vpop.f32.mrb[8].mxu0 }
 0x106   :  { %v551_v5 = vpop.f32.mrb[9].mxu0 }
 0x107   :  { %459 = vst.msk [vmem:[%s804_s3 + $0x8] sm:$0xf] %vm456_vm0, %v516_v2  ;;  %v517_v6 = vpack.c.bf16 %v405_v3, %v405_v3  ;;  %v552_v7 = vadd.f32 %v551_v5, %v550_v4  ;;  %v553_v8 = vpop.f32.mrb[10].mxu0 }
 0x108   :  { %v554_v9 = vpop.f32.mrb[11].mxu0 }
 0x109   :  { %460 = vst.msk [vmem:[%s804_s3 + $0xc] sm:$0xf] %vm456_vm0, %v517_v6  ;;  %v555_v10 = vadd.f32 %v554_v9, %v553_v8  ;;  %v345_v11 = vadd.f32 %v552_v7, %v469_v38 }
 0x10b   :  { %v410_v12 = vadd.f32 %v409_v61, %v345_v11  ;;  %v348_v13 = vadd.f32 %v555_v10, %v469_v38 }
 0x10d   :  { %v518_v14 = vpack.c.bf16 %v410_v12, %v410_v12  ;;  %v413_v15 = vadd.f32 %v412_v1, %v348_v13  ;;  %v556_v16 = vpop.f32.mrb[12].mxu0 }
 0x10e   :  { %v557_v17 = vpop.f32.mrb[13].mxu0 }
 0x10f   :  { %461 = vst.msk [vmem:[%s804_s3 + $0x10] sm:$0xf] %vm456_vm0, %v518_v14  ;;  %v519_v18 = vpack.c.bf16 %v413_v15, %v413_v15  ;;  %v558_v19 = vadd.f32 %v557_v17, %v556_v16  ;;  %v559_v20 = vpop.f32.mrb[14].mxu0 }
 0x110   :  { %v560_v21 = vpop.f32.mrb[15].mxu0 }
 0x111   :  { %462 = vst.msk [vmem:[%s804_s3 + $0x14] sm:$0xf] %vm456_vm0, %v519_v18  ;;  %v353_v22 = vadd.f32 %v558_v19, %v469_v38  ;;  %v561_v23 = vadd.f32 %v560_v21, %v559_v20 }
 0x113   :  { %v418_v24 = vadd.f32 %v596_v58, %v353_v22  ;;  %v356_v25 = vadd.f32 %v561_v23, %v469_v38 }
 0x115   :  { %v520_v26 = vpack.c.bf16 %v418_v24, %v418_v24  ;;  %v421_v27 = vadd.f32 %v597_v62, %v356_v25 }
 0x117   :  { %463 = vst.msk [vmem:[%s804_s3 + $0x18] sm:$0xf] %vm456_vm0, %v520_v26  ;;  %v521_v28 = vpack.c.bf16 %v421_v27, %v421_v27 }
 0x119   :  { %464 = vst.msk [vmem:[%s804_s3 + $0x1c] sm:$0xf] %vm456_vm0, %v521_v28 }

// kernel: super_wide_resnet_forward.13
= control target key start
LH: loop header
LB: loop body
LE: loop exit
PB: predicated region body
PF: predicated region fallthrough
CT: control target
= control target key end

     0   :  { %v446_v1 = vmov 0.0   ;;  %vm447_vm0 = vmmov 0   ;;  %vm326_vm1 = vcmask 519168   ;;  %s558_s1 = inlined_call_operand.vmem [shape: bf16[384,64], index: 1, kind: input, shape index: {}]   ;;  %s559_s0 = inlined_call_operand.vmem [shape: bf16[16,384], index: 0, kind: input, shape index: {}]   ;;  %s560_s2 = inlined_call_operand.vmem [shape: f32[1,64], index: 2, kind: input, shape index: {}]   ;;  %s561_s3 = inlined_call_operand.vmem [shape: bf16[16,64], index: 3, kind: output, shape index: {}]  }
   0x1   :  { %v418_v0 = vld [vmem:[%s558_s1 + $0x40] sm:$0xff]   ;;  %396 = vmatprep.subr.bf16.mxu1 %v446_v1  ;;  %412 = vmatprep.mubr.msk.bf16.mxu1 %vm447_vm0, %v446_v1  ;;  %v421_v4 = vld [vmem:[%s558_s1 + $0x48] sm:$0xff]   ;;  %v424_v7 = vld [vmem:[%s558_s1 + $0x50] sm:$0xff]  }
   0x2   :  { %v419_v2 = vld [vmem:[%s558_s1] sm:$0xff]   ;;  %365 = vmatprep.subr.bf16.mxu0 %v418_v0  ;;  %v422_v5 = vld [vmem:[%s558_s1 + $0x8] sm:$0xff]   ;;  %v425_v8 = vld [vmem:[%s558_s1 + $0x10] sm:$0xff]  }
   0x3   :  { %v420_v3 = vld [vmem:[%s558_s1 + $0x80] sm:$0xff]   ;;  %366 = vmatpush3.bf16.msra.mxu0 %v419_v2  ;;  %v423_v6 = vld [vmem:[%s558_s1 + $0x88] sm:$0xff]   ;;  %v426_v9 = vld [vmem:[%s558_s1 + $0x90] sm:$0xff]  }
   0x4   :  { %397 = vmatpush3.bf16.msra.mxu1 %v420_v3  ;;  %367 = vmatprep.subr.bf16.mxu0 %v421_v4  ;;  %v427_v10 = vld [vmem:[%s558_s1 + $0x58] sm:$0xff]   ;;  %v430_v13 = vld [vmem:[%s558_s1 + $0x60] sm:$0xff]   ;;  %v433_v16 = vld [vmem:[%s558_s1 + $0x68] sm:$0xff]  }
   0x5   :  { %398 = vmatprep.subr.bf16.mxu1 %v446_v1  ;;  %v428_v11 = vld [vmem:[%s558_s1 + $0x18] sm:$0xff]   ;;  %v431_v14 = vld [vmem:[%s558_s1 + $0x20] sm:$0xff]   ;;  %v434_v17 = vld [vmem:[%s558_s1 + $0x28] sm:$0xff]  }
   0x6   :  { %v429_v12 = vld [vmem:[%s558_s1 + $0x98] sm:$0xff]   ;;  %v432_v15 = vld [vmem:[%s558_s1 + $0xa0] sm:$0xff]   ;;  %v435_v18 = vld [vmem:[%s558_s1 + $0xa8] sm:$0xff]  }
   0x7   :  { %368 = vmatpush3.bf16.msra.mxu0 %v422_v5  ;;  %v436_v19 = vld [vmem:[%s558_s1 + $0x70] sm:$0xff]   ;;  %v439_v22 = vld [vmem:[%s558_s1 + $0x78] sm:$0xff]   ;;  %v441_v26 = vld [vmem:[%s559_s0] ss:$12 sps:$4 sm:$0xff]  }
   0x8   :  { %399 = vmatpush3.bf16.msra.mxu1 %v423_v6  ;;  %369 = vmatprep.subr.bf16.mxu0 %v424_v7  ;;  %v437_v20 = vld [vmem:[%s558_s1 + $0x30] sm:$0xff]   ;;  %v440_v24 = vld [vmem:[%s558_s1 + $0x38] sm:$0xff]   ;;  %v333_v30 = vld [vmem:[%s560_s2] ss:$0 sm:$0xff] }
   0x9   :  { %400 = vmatprep.subr.bf16.mxu1 %v446_v1  ;;  %v438_v21 = vld [vmem:[%s558_s1 + $0xb0] sm:$0xff]   ;;  %v444_v25 = vld [vmem:[%s558_s1 + $0xb8] sm:$0xff]  }
   0xa   :  { %v443_v23 = vld [vmem:[%s559_s0 + $0x4] ss:$12 sps:$4 sm:$0xff]   ;;  %v445_v27 = vld [vmem:[%s559_s0 + $0x8] ss:$12 sps:$4 sm:$0xff]  }
   0xb   :  { %370 = vmatpush3.bf16.msra.mxu0 %v425_v8  ;;  %266 = vmatprep.mubr.bf16.mxu0 %v443_v23 }
   0xc   :  { %401 = vmatpush3.bf16.msra.mxu1 %v426_v9  ;;  %371 = vmatprep.subr.bf16.mxu0 %v427_v10 }
   0xd   :  { %402 = vmatprep.subr.bf16.mxu1 %v446_v1 }
   0xf   :  { %372 = vmatpush3.bf16.msra.mxu0 %v428_v11 }
  0x10   :  { %403 = vmatpush3.bf16.msra.mxu1 %v429_v12  ;;  %373 = vmatprep.subr.bf16.mxu0 %v430_v13 }
  0x11   :  { %404 = vmatprep.subr.bf16.mxu1 %v446_v1 }
  0x13   :  { %374 = vmatpush3.bf16.msra.mxu0 %v431_v14 }
  0x14   :  { %405 = vmatpush3.bf16.msra.mxu1 %v432_v15  ;;  %375 = vmatprep.subr.bf16.mxu0 %v433_v16 }
  0x15   :  { %406 = vmatprep.subr.bf16.mxu1 %v446_v1 }
  0x17   :  { %376 = vmatpush3.bf16.msra.mxu0 %v434_v17 }
  0x18   :  { %407 = vmatpush3.bf16.msra.mxu1 %v435_v18  ;;  %377 = vmatprep.subr.bf16.mxu0 %v436_v19 }
  0x19   :  { %408 = vmatprep.subr.bf16.mxu1 %v446_v1 }
  0x1b   :  { %378 = vmatpush3.bf16.msra.mxu0 %v437_v20 }
  0x1c   :  { %409 = vmatpush3.bf16.msra.mxu1 %v438_v21  ;;  %379 = vmatprep.subr.bf16.mxu0 %v439_v22 }
  0x1d   :  { %410 = vmatprep.subr.bf16.mxu1 %v446_v1 }
  0x1f   :  { %380 = vmatpush3.bf16.msra.mxu0 %v440_v24 }
  0x20   :  { %411 = vmatpush3.bf16.msra.mxu1 %v444_v25 }
  0x22   :  { %267 = vmatmul.mubr.bf16.vlgmr.msra.gmra.mrb[0].mxu0 %v441_v26 }
  0x23   :  { %413 = vmatmul.mubr.bf16.vlgmr.msra.gmra.mrb[0].mxu1 %v445_v27 }
  0xf5   :  { %v381_v28 = vpop.f32.mrb[0].mxu0 }
  0xf6   :  { %v382_v29 = vpop.f32.mrb[1].mxu0  ;;  %v309_v31 = vpop.f32.mrb[0].mxu1 }
  0xf7   :  { %v383_v32 = vadd.f32 %v382_v29, %v381_v28  ;;  %v384_v33 = vpop.f32.mrb[2].mxu0  ;;  %v414_v34 = vpop.f32.mrb[1].mxu1 }
  0xf8   :  { %v385_v35 = vpop.f32.mrb[3].mxu0  ;;  %v312_v36 = vpop.f32.mrb[2].mxu1 }
  0xf9   :  { %v269_v37 = vadd.f32 %v383_v32, %v333_v30  ;;  %v386_v38 = vadd.f32 %v385_v35, %v384_v33  ;;  %v415_v39 = vpop.f32.mrb[3].mxu1 }
  0xfb   :  { %v310_v40 = vadd.f32 %v309_v31, %v269_v37  ;;  %v272_v41 = vadd.f32 %v386_v38, %v333_v30 }
  0xfd   :  { %v316_v42 = vmax.f32 %v310_v40, 0.0  ;;  %v313_v43 = vadd.f32 %v312_v36, %v272_v41 }
  0xff   :  { %v363_v44 = vpack.c.bf16 %v316_v42, %v316_v42  ;;  %v317_v45 = vmax.f32 %v313_v43, 0.0 }
 0x101   :  { %327 = vst.msk [vmem:[%s561_s3] sm:$0xf] %vm326_vm1, %v363_v44  ;;  %v364_v46 = vpack.c.bf16 %v317_v45, %v317_v45 }
 0x103   :  { %328 = vst.msk [vmem:[%s561_s3 + $0x4] sm:$0xf] %vm326_vm1, %v364_v46 }

// kernel: super_wide_resnet_forward.15
= control target key start
LH: loop header
LB: loop body
LE: loop exit
PB: predicated region body
PF: predicated region fallthrough
CT: control target
= control target key end

     0   :  { %v294_v1 = vmov 0.0   ;;  %vm295_vm0 = vmmov 0   ;;  %vm20_vm1 = vcmask 523264   ;;  %s365_s0 = inlined_call_operand.vmem [shape: bf16[1,16,64], index: 0, kind: input, shape index: {}]   ;;  %s366_s1 = inlined_call_operand.vmem [shape: bf16[2,64,128], index: 1, kind: input, shape index: {}]   ;;  %s367_s2 = inlined_call_operand.vmem [shape: f32[1,128], index: 2, kind: input, shape index: {}]   ;;  %s368_s3 = inlined_call_operand.hbm [shape: f32[2,1,128], index: 3, kind: output, shape index: {}]  }
   0x1   :  { %v262_v0 = vld [vmem:[%s366_s1] sm:$0xff]   ;;  %233 = vmatprep.subr.bf16.mxu0 %v294_v1  ;;  %245 = vmatprep.subr.bf16.mxu1 %v294_v1  ;;  %v264_v3 = vld [vmem:[%s366_s1 + $0x8] sm:$0xff]   ;;  %v266_v5 = vld [vmem:[%s366_s1 + $0x10] sm:$0xff]  }
   0x2   :  { %v263_v2 = vld [vmem:[%s366_s1 + $0x20] sm:$0xff]   ;;  %234 = vmatpush3.bf16.msra.mxu0 %v262_v0  ;;  %241 = vmatprep.mubr.msk.bf16.mxu0 %vm295_vm0, %v294_v1  ;;  %v265_v4 = vld [vmem:[%s366_s1 + $0x28] sm:$0xff]   ;;  %v267_v6 = vld [vmem:[%s366_s1 + $0x30] sm:$0xff]  }
   0x3   :  { %246 = vmatpush3.bf16.msra.mxu1 %v263_v2  ;;  %235 = vmatprep.subr.bf16.mxu0 %v294_v1  ;;  %v220_v7 = vld [vmem:[%s365_s0] sm:$0xff]  }
   0x4   :  { %247 = vmatprep.subr.bf16.mxu1 %v294_v1  ;;  %253 = vmatprep.mubr.msk.bf16.mxu1 %vm295_vm0, %v294_v1 }
   0x6   :  { %236 = vmatpush3.bf16.msra.mxu0 %v264_v3 }
   0x7   :  { %248 = vmatpush3.bf16.msra.mxu1 %v265_v4  ;;  %237 = vmatprep.subr.bf16.mxu0 %v294_v1 }
   0x8   :  { %249 = vmatprep.subr.bf16.mxu1 %v294_v1 }
   0x9   :  { %8 = vsyncpa [#allocation3], 0  ;;  %v221_v8 = vunpack.c.l.bf16 %v220_v7  ;;  %v222_v9 = vunpack.c.h.bf16 %v220_v7  ;;  %v268_v10 = vld [vmem:[%s366_s1 + $0x18] sm:$0xff]   ;;  %s296_s0 = smov [#allocation2]   ;;  %v33_v23 = vld [vmem:[%s367_s2] sm:$0x1] }
   0xa   :  { %238 = vmatpush3.bf16.msra.mxu0 %v266_v5  ;;  %v269_v11 = vld [vmem:[%s366_s1 + $0x38] sm:$0xff]   ;;  %s190_s1 = sshll.u32 %s296_s0, 4  ;;  %s191_s1 = int_to_ptr.vmem [resolvable:$true] %s190_s1 }
   0xb   :  { %250 = vmatpush3.bf16.msra.mxu1 %v267_v6  ;;  %239 = vmatprep.subr.bf16.mxu0 %v294_v1  ;;  %v21_v12 = vsel %vm20_vm1, %v221_v8, 0.0  ;;  %v22_v13 = vsel %vm20_vm1, %v222_v9, 0.0  ;;  %s270_s5 = scalar_lea.vmem %s191_s1, 32  ;;  %p275_p1 = scmp.lt.s32.totalorder %s191_s1, %s191_s1 }
   0xc   :  { %251 = vmatprep.subr.bf16.mxu1 %v294_v1  ;;  %v23_v14 = vadd.f32 %v22_v13, %v21_v12  ;;  %p271_p0 = scmp.ne.s32.totalorder %s191_s1, %s270_s5  ;;  %p276_p2 = scmp.lt.s32.totalorder %s270_s5, %s270_s5 }
   0xe   :  { %240 = vmatpush3.bf16.msra.mxu0 %v268_v10  ;;  %v24_v15 = vrot.slane %v23_v14, 4  ;;  %p277_p3 = por %p276_p2, %p275_p1 }
   0xf   :  { %252 = vmatpush3.bf16.msra.mxu1 %v269_v11 }
  0x10   :  { %v25_v16 = vadd.f32 %v24_v15, %v23_v14  ;;  %p278_p4 = pnand %p277_p3, %p271_p0 }
  0x12   :  { %v26_v17 = vrot.slane %v25_v16, 2 }
  0x14   :  { %v27_v18 = vadd.f32 %v26_v17, %v25_v16 }
  0x16   :  { %v28_v19 = vrot.slane %v27_v18, 1 }
  0x18   :  { %v29_v20 = vadd.f32 %v28_v19, %v27_v18 }
  0x1a   :  { %v31_v21 = vmul.f32 0.0625, %v29_v20 }
  0x1c   :  { %v32_v22 = vpack.c.bf16 %v31_v21, %v31_v21 }
  0x1e   :  { %242 = vmatmul.mubr.msk.bf16.vlgmr.msra.gmra.mrb[0].mxu0 %vm20_vm1, %v32_v22  ;;  %254 = vmatmul.mubr.msk.bf16.vlgmr.msra.gmra.mrb[0].mxu1 %vm20_vm1, %v32_v22 }
  0xf1   :  { %v103_v24 = vpop.f32.mrb[0].mxu0  ;;  %v177_v25 = vpop.f32.mrb[0].mxu1 }
  0xf2   :  { %v104_v26 = vadd.f32 %v103_v24, %v33_v23  ;;  %v178_v27 = vadd.f32 %v177_v25, %v33_v23  ;;  %v243_v28 = vpop.f32.mrb[1].mxu0  ;;  %v255_v29 = vpop.f32.mrb[1].mxu1 }
  0xf3   :  { %v106_v30 = vpop.f32.mrb[2].mxu0  ;;  %v180_v31 = vpop.f32.mrb[2].mxu1 }
  0xf4   :  { %109 = vst [vmem:[#allocation2] sm:$0x1] %v104_v26  ;;  %184 = vst [vmem:[#allocation2 + $0x1] sm:$0x1] %v178_v27  ;;  %v244_v32 = vpop.f32.mrb[3].mxu0  ;;  %v256_v33 = vpop.f32.mrb[3].mxu1 }
  0xf5   :  { %281 = shalt.err (!%p278_p4)
}
  0xf6   :  { %s282_s7 = scalar_lea.hbm %s368_s3, 32 }
  0xf7   :  { %p283_p5 = scmp.ne.s32.totalorder %s368_s3, %s282_s7  ;;  %p286_p6 = scmp.lt.u32.totalorder %s282_s7, %s368_s3 }
  0xf9   :  { %p288_p7 = pnand %p286_p6, %p283_p5 }
  0xfb   :  { %291 = shalt.err (!%p288_p7)
}
  0xfc   :  { %s297_s12 = smov 16   ;;  %s298_s13 = smov 1  }
  0xfd   :  { %196 = dma.vmem_to_hbm [thread:$0]  %s191_s1, 32, %s368_s3, [#allocation3], %s297_s12, %s297_s12, %s298_s13  }
  0xfe   :  { %292 = dma.done.wait [#allocation3], 32  }
  0xff   :  { %293 = vsyncadd [#allocation3], 4294967264 }
 0x100   :  { %200 = vsyncpa [#allocation3], 1 }

// kernel: super_wide_resnet_forward.14
= control target key start
LH: loop header
LB: loop body
LE: loop exit
PB: predicated region body
PF: predicated region fallthrough
CT: control target
= control target key end

     0   :  { %v684_v33 = vmov 0.0   ;;  %vm685_vm0 = vmmov 0   ;;  %vm505_vm1 = vcmask 519168   ;;  %s850_s1 = inlined_call_operand.vmem [shape: bf16[640,64], index: 1, kind: input, shape index: {}]   ;;  %s851_s0 = inlined_call_operand.vmem [shape: bf16[16,640], index: 0, kind: input, shape index: {}]   ;;  %s852_s2 = inlined_call_operand.vmem [shape: f32[1,64], index: 2, kind: input, shape index: {}]   ;;  %s853_s3 = inlined_call_operand.vmem [shape: bf16[16,64], index: 3, kind: output, shape index: {}]  }
   0x1   :  { %v637_v0 = vld [vmem:[%s850_s1 + $0x40] sm:$0xff]   ;;  %v641_v4 = vld [vmem:[%s850_s1 + $0x48] sm:$0xff]   ;;  %v645_v8 = vld [vmem:[%s850_s1 + $0x50] sm:$0xff]  }
   0x2   :  { %v638_v1 = vld [vmem:[%s850_s1] sm:$0xff]   ;;  %562 = vmatprep.subr.bf16.mxu0 %v637_v0  ;;  %v642_v5 = vld [vmem:[%s850_s1 + $0x8] sm:$0xff]   ;;  %v646_v9 = vld [vmem:[%s850_s1 + $0x10] sm:$0xff]  }
   0x3   :  { %v639_v2 = vld [vmem:[%s850_s1 + $0xc0] sm:$0xff]   ;;  %563 = vmatpush3.bf16.msra.mxu0 %v638_v1  ;;  %v643_v6 = vld [vmem:[%s850_s1 + $0xc8] sm:$0xff]   ;;  %v647_v10 = vld [vmem:[%s850_s1 + $0xd0] sm:$0xff]  }
   0x4   :  { %v640_v3 = vld [vmem:[%s850_s1 + $0x80] sm:$0xff]   ;;  %584 = vmatprep.subr.bf16.mxu1 %v639_v2  ;;  %564 = vmatprep.subr.bf16.mxu0 %v641_v4  ;;  %v644_v7 = vld [vmem:[%s850_s1 + $0x88] sm:$0xff]   ;;  %v648_v11 = vld [vmem:[%s850_s1 + $0x90] sm:$0xff]  }
   0x5   :  { %585 = vmatpush3.bf16.msra.mxu1 %v640_v3  ;;  %v649_v12 = vld [vmem:[%s850_s1 + $0x58] sm:$0xff]   ;;  %v653_v16 = vld [vmem:[%s850_s1 + $0x60] sm:$0xff]   ;;  %v657_v20 = vld [vmem:[%s850_s1 + $0x68] sm:$0xff]  }
   0x6   :  { %586 = vmatprep.subr.bf16.mxu1 %v643_v6  ;;  %v650_v13 = vld [vmem:[%s850_s1 + $0x18] sm:$0xff]   ;;  %v654_v17 = vld [vmem:[%s850_s1 + $0x20] sm:$0xff]   ;;  %v658_v21 = vld [vmem:[%s850_s1 + $0x28] sm:$0xff]  }
   0x7   :  { %565 = vmatpush3.bf16.msra.mxu0 %v642_v5  ;;  %v651_v14 = vld [vmem:[%s850_s1 + $0xd8] sm:$0xff]   ;;  %v655_v18 = vld [vmem:[%s850_s1 + $0xe0] sm:$0xff]   ;;  %v659_v22 = vld [vmem:[%s850_s1 + $0xe8] sm:$0xff]  }
   0x8   :  { %566 = vmatprep.subr.bf16.mxu0 %v645_v8  ;;  %v652_v15 = vld [vmem:[%s850_s1 + $0x98] sm:$0xff]   ;;  %v656_v19 = vld [vmem:[%s850_s1 + $0xa0] sm:$0xff]   ;;  %v660_v23 = vld [vmem:[%s850_s1 + $0xa8] sm:$0xff]  }
   0x9   :  { %587 = vmatpush3.bf16.msra.mxu1 %v644_v7  ;;  %v661_v24 = vld [vmem:[%s850_s1 + $0x70] sm:$0xff]   ;;  %v665_v28 = vld [vmem:[%s850_s1 + $0x78] sm:$0xff]   ;;  %v674_v36 = vld [vmem:[%s851_s0 + $0xc] ss:$20 sps:$4 sm:$0xff]  }
   0xa   :  { %588 = vmatprep.subr.bf16.mxu1 %v647_v10  ;;  %v662_v25 = vld [vmem:[%s850_s1 + $0x30] sm:$0xff]   ;;  %v666_v29 = vld [vmem:[%s850_s1 + $0x38] sm:$0xff]   ;;  %v675_v37 = vld [vmem:[%s850_s1 + $0x100] sm:$0xff]   ;;  %447 = vmatprep.mubr.bf16.mxu1 %v674_v36 }
   0xb   :  { %567 = vmatpush3.bf16.msra.mxu0 %v646_v9  ;;  %v663_v26 = vld [vmem:[%s850_s1 + $0xf0] sm:$0xff]   ;;  %v667_v30 = vld [vmem:[%s850_s1 + $0xf8] sm:$0xff]   ;;  %v676_v38 = vld [vmem:[%s850_s1 + $0x108] sm:$0xff]  }
   0xc   :  { %568 = vmatprep.subr.bf16.mxu0 %v649_v12  ;;  %v664_v27 = vld [vmem:[%s850_s1 + $0xb0] sm:$0xff]   ;;  %v670_v32 = vld [vmem:[%s851_s0 + $0x4] ss:$20 sps:$4 sm:$0xff]   ;;  %v672_v35 = vld [vmem:[%s851_s0 + $0x8] ss:$20 sps:$4 sm:$0xff]  }
   0xd   :  { %589 = vmatpush3.bf16.msra.mxu1 %v648_v11  ;;  %v668_v31 = vld [vmem:[%s851_s0] ss:$20 sps:$4 sm:$0xff]   ;;  %v671_v34 = vld [vmem:[%s850_s1 + $0xb8] sm:$0xff]   ;;  %406 = vmatprep.mubr.bf16.mxu0 %v670_v32  ;;  %v680_v42 = vld [vmem:[%s850_s1 + $0x128] sm:$0xff]  }
   0xe   :  { %590 = vmatprep.subr.bf16.mxu1 %v651_v14  ;;  %v677_v39 = vld [vmem:[%s850_s1 + $0x110] sm:$0xff]   ;;  %v678_v40 = vld [vmem:[%s850_s1 + $0x118] sm:$0xff]   ;;  %v679_v41 = vld [vmem:[%s850_s1 + $0x120] sm:$0xff]  }
   0xf   :  { %569 = vmatpush3.bf16.msra.mxu0 %v650_v13  ;;  %v681_v43 = vld [vmem:[%s850_s1 + $0x130] sm:$0xff]   ;;  %v682_v44 = vld [vmem:[%s850_s1 + $0x138] sm:$0xff]   ;;  %v512_v47 = vld [vmem:[%s852_s2] ss:$0 sm:$0xff] }
  0x10   :  { %570 = vmatprep.subr.bf16.mxu0 %v653_v16  ;;  %v683_v45 = vld [vmem:[%s851_s0 + $0x10] ss:$20 sps:$4 sm:$0xff]  }
  0x11   :  { %591 = vmatpush3.bf16.msra.mxu1 %v652_v15 }
  0x12   :  { %592 = vmatprep.subr.bf16.mxu1 %v655_v18 }
  0x13   :  { %571 = vmatpush3.bf16.msra.mxu0 %v654_v17 }
  0x14   :  { %572 = vmatprep.subr.bf16.mxu0 %v657_v20 }
  0x15   :  { %593 = vmatpush3.bf16.msra.mxu1 %v656_v19 }
  0x16   :  { %594 = vmatprep.subr.bf16.mxu1 %v659_v22 }
  0x17   :  { %573 = vmatpush3.bf16.msra.mxu0 %v658_v21 }
  0x18   :  { %574 = vmatprep.subr.bf16.mxu0 %v661_v24 }
  0x19   :  { %595 = vmatpush3.bf16.msra.mxu1 %v660_v23 }
  0x1a   :  { %596 = vmatprep.subr.bf16.mxu1 %v663_v26 }
  0x1b   :  { %575 = vmatpush3.bf16.msra.mxu0 %v662_v25 }
  0x1c   :  { %576 = vmatprep.subr.bf16.mxu0 %v665_v28 }
  0x1d   :  { %597 = vmatpush3.bf16.msra.mxu1 %v664_v27 }
  0x1e   :  { %598 = vmatprep.subr.bf16.mxu1 %v667_v30 }
  0x1f   :  { %577 = vmatpush3.bf16.msra.mxu0 %v666_v29 }
  0x20   :  { %615 = vmatprep.subr.bf16.mxu0 %v684_v33 }
  0x21   :  { %599 = vmatpush3.bf16.msra.mxu1 %v671_v34 }
  0x22   :  { %407 = vmatmul.mubr.bf16.vlgmr.msra.gmra.mrb[0].mxu0 %v668_v31 }
  0x23   :  { %631 = vmatprep.mubr.msk.bf16.mxu0 %vm685_vm0, %v684_v33  ;;  %616 = vmatpush3.bf16.msra.mxu0 %v675_v37 }
  0x24   :  { %448 = vmatmul.mubr.bf16.vlgmr.msra.gmra.mrb[0].mxu1 %v672_v35  ;;  %617 = vmatprep.subr.bf16.mxu0 %v684_v33 }
  0x27   :  { %618 = vmatpush3.bf16.msra.mxu0 %v676_v38 }
  0x28   :  { %619 = vmatprep.subr.bf16.mxu0 %v684_v33 }
  0x2b   :  { %620 = vmatpush3.bf16.msra.mxu0 %v677_v39 }
  0x2c   :  { %621 = vmatprep.subr.bf16.mxu0 %v684_v33 }
  0x2f   :  { %622 = vmatpush3.bf16.msra.mxu0 %v678_v40 }
  0x30   :  { %623 = vmatprep.subr.bf16.mxu0 %v684_v33 }
  0x33   :  { %624 = vmatpush3.bf16.msra.mxu0 %v679_v41 }
  0x34   :  { %625 = vmatprep.subr.bf16.mxu0 %v684_v33 }
  0x37   :  { %626 = vmatpush3.bf16.msra.mxu0 %v680_v42 }
  0x38   :  { %627 = vmatprep.subr.bf16.mxu0 %v684_v33 }
  0x3b   :  { %628 = vmatpush3.bf16.msra.mxu0 %v681_v43 }
  0x3c   :  { %629 = vmatprep.subr.bf16.mxu0 %v684_v33 }
  0x3f   :  { %630 = vmatpush3.bf16.msra.mxu0 %v682_v44 }
  0x42   :  { %632 = vmatmul.mubr.bf16.vlgmr.msra.gmra.mrb[4].mxu0 %v683_v45 }
  0xf5   :  { %v578_v46 = vpop.f32.mrb[0].mxu0 }
  0xf6   :  { %v579_v48 = vpop.f32.mrb[1].mxu0 }
  0xf7   :  { %v580_v49 = vadd.f32 %v579_v48, %v578_v46  ;;  %v581_v50 = vpop.f32.mrb[2].mxu0  ;;  %v600_v51 = vpop.f32.mrb[0].mxu1 }
  0xf8   :  { %v582_v52 = vpop.f32.mrb[3].mxu0  ;;  %v601_v55 = vpop.f32.mrb[1].mxu1 }
  0xf9   :  { %v409_v53 = vadd.f32 %v580_v49, %v512_v47  ;;  %v583_v54 = vadd.f32 %v582_v52, %v581_v50  ;;  %v602_v56 = vadd.f32 %v601_v55, %v600_v51  ;;  %v603_v57 = vpop.f32.mrb[2].mxu1 }
  0xfa   :  { %v604_v59 = vpop.f32.mrb[3].mxu1 }
  0xfb   :  { %v412_v58 = vadd.f32 %v583_v54, %v512_v47  ;;  %v605_v60 = vadd.f32 %v604_v59, %v603_v57  ;;  %v450_v61 = vadd.f32 %v602_v56, %v409_v53 }
  0xfd   :  { %v453_v62 = vadd.f32 %v605_v60, %v412_v58 }
 0x115   :  { %v490_v63 = vpop.f32.mrb[4].mxu0 }
 0x116   :  { %v491_v0 = vadd.f32 %v490_v63, %v450_v61  ;;  %v633_v1 = vpop.f32.mrb[5].mxu0 }
 0x117   :  { %v493_v2 = vpop.f32.mrb[6].mxu0 }
 0x118   :  { %v560_v3 = vpack.c.bf16 %v491_v0, %v491_v0  ;;  %v494_v4 = vadd.f32 %v493_v2, %v453_v62  ;;  %v634_v5 = vpop.f32.mrb[7].mxu0 }
 0x11a   :  { %506 = vst.msk [vmem:[%s853_s3] sm:$0xf] %vm505_vm1, %v560_v3  ;;  %v561_v6 = vpack.c.bf16 %v494_v4, %v494_v4 }
 0x11c   :  { %507 = vst.msk [vmem:[%s853_s3 + $0x4] sm:$0xf] %vm505_vm1, %v561_v6 }

</bundles_post_ra>
